<compile_context>
chip_gen: v7x
topology: tpu7x:2x2x1
jax: 0.10.0
libtpu: 0.0.40
codegen_flags: <defaults>
</compile_context>

<pallas_src>
import jax
import jax.numpy as jnp
from jax.experimental import pallas as pl
from jax.experimental.pallas import tpu as pltpu


def _round_up(x, m):
    return ((x + m - 1) // m) * m


# ---------------------------------------------------------------------------
# One-time parameter packing: one contiguous (rows, 3*HP) f32 buffer.
# Each gate gets its own 128-lane segment; padded lanes/rows are exact zeros
# so padded hidden lanes stay exactly zero through the recurrence.
# ---------------------------------------------------------------------------

def prepare_pallas_params(params, hidden_size):
    H = hidden_size
    HP = _round_up(H, 128)          # per-gate lane segment
    WC = 3 * HP                     # packed-buffer width

    fc_in_w = params["fc_in_w"]     # (ISZ, Fin)   torch storage layout
    fc_in_b = params["fc_in_b"]     # (ISZ,)
    fc_out_w = params["fc_out_w"]   # (O, H)
    fc_out_b = params["fc_out_b"]   # (O,)
    ISZ, Fin = fc_in_w.shape
    O = fc_out_w.shape[0]
    L = len(params["gru"])

    offs = {}
    row = 0

    def add(name, rows):
        nonlocal row
        offs[name] = row
        row += _round_up(rows, 8)   # keep every section 8-sublane aligned

    add("fiw", Fin)
    add("fib", 1)
    for l in range(L):
        add(f"wih{l}", ISZ if l == 0 else HP)
        add(f"gib{l}", 1)
        add(f"whh{l}", HP)
        add(f"bhn{l}", 1)
    add("fow", HP)
    add("fob", 1)
    total_rows = _round_up(row, 8)

    buf = jnp.zeros((total_rows, WC), jnp.float32)
    buf = buf.at[offs["fiw"]:offs["fiw"] + Fin, 0:ISZ].set(fc_in_w.T)
    buf = buf.at[offs["fib"], 0:ISZ].set(fc_in_b)

    for l, p in enumerate(params["gru"]):
        w_ih, w_hh = p["w_ih"], p["w_hh"]        # (3H, I_l), (3H, H)
        b_ih, b_hh = p["b_ih"], p["b_hh"]        # (3H,), (3H,)
        I_act = w_ih.shape[1]
        for g in range(3):
            buf = buf.at[offs[f"wih{l}"]:offs[f"wih{l}"] + I_act,
                         g * HP:g * HP + H].set(w_ih[g * H:(g + 1) * H, :].T)
            buf = buf.at[offs[f"whh{l}"]:offs[f"whh{l}"] + H,
                         g * HP:g * HP + H].set(w_hh[g * H:(g + 1) * H, :].T)
            gb = b_ih[g * H:(g + 1) * H]
            if g < 2:                             # fold b_hh into r/z bias
                gb = gb + b_hh[g * H:(g + 1) * H]
            buf = buf.at[offs[f"gib{l}"], g * HP:g * HP + H].set(gb)
        buf = buf.at[offs[f"bhn{l}"], 0:H].set(b_hh[2 * H:3 * H])

    buf = buf.at[offs["fow"]:offs["fow"] + H, 0:O].set(fc_out_w.T)
    buf = buf.at[offs["fob"], 0:O].set(fc_out_b)

    meta = dict(H=H, HP=HP, ISZ=ISZ, Fin=Fin, O=O, L=L, offs=offs,
                total_rows=total_rows)
    return buf, meta


# ---------------------------------------------------------------------------
# Fused kernel: fc_in + all GRU layers + fc_out, everything VMEM/vreg resident.
# ---------------------------------------------------------------------------

def _make_fused_kernel(meta, S, BP):
    H, HP = meta["H"], meta["HP"]
    ISZ, Fin, O, L = meta["ISZ"], meta["Fin"], meta["O"], meta["L"]
    offs = meta["offs"]
    f32 = jnp.float32

    def kernel(x_ref, st_ref, w_ref, y_ref, ns_ref):
        # ---- fc_in: one batched matmul over all S*BP rows ----
        w_fi = w_ref[offs["fiw"]:offs["fiw"] + Fin, 0:ISZ]        # (Fin, ISZ)
        b_fi = w_ref[offs["fib"]:offs["fib"] + 1, 0:ISZ]          # (1, ISZ)
        cur = jnp.dot(x_ref[...], w_fi,
                      preferred_element_type=f32) + b_fi          # (S*BP, ISZ)

        # ---- GRU stack ----
        for l in range(L):
            I_rows = ISZ if l == 0 else HP
            wih = w_ref[offs[f"wih{l}"]:offs[f"wih{l}"] + I_rows, :]   # (I,3HP)
            gib = w_ref[offs[f"gib{l}"]:offs[f"gib{l}"] + 1, :]        # (1,3HP)
            whh = w_ref[offs[f"whh{l}"]:offs[f"whh{l}"] + HP, :]       # (HP,3HP)
            bhn = w_ref[offs[f"bhn{l}"]:offs[f"bhn{l}"] + 1, 0:HP]     # (1,HP)

            # Input projection hoisted out of the recurrence: one MXU op for
            # all timesteps of this layer; stays in registers.
            gi = jnp.dot(cur, wih, preferred_element_type=f32) + gib   # (S*BP,3HP)

            h = st_ref[l * BP:(l + 1) * BP, :]                         # (BP, HP)
            outs = []
            for t in range(S):                       # fully unrolled (S static)
                gi_t = gi[t * BP:(t + 1) * BP, :]    # aligned 8-sublane slice
                gh = jnp.dot(h, whh, preferred_element_type=f32)       # (BP,3HP)
                # PyTorch gate order (r, z, n); each slice = one whole vreg.
                r = jax.nn.sigmoid(gi_t[:, 0:HP] + gh[:, 0:HP])
                z = jax.nn.sigmoid(gi_t[:, HP:2 * HP] + gh[:, HP:2 * HP])
                n = jnp.tanh(gi_t[:, 2 * HP:3 * HP]
                             + r * (gh[:, 2 * HP:3 * HP] + bhn))
                h = n + z * (h - n)                  # == (1-z)*n + z*h
                outs.append(h)

            ns_ref[l * BP:(l + 1) * BP, :] = h.astype(ns_ref.dtype)
            cur = jnp.concatenate(outs, axis=0)      # (S*BP, HP), aligned pieces

        # ---- fc_out: one batched matmul, single output store ----
        w_fo = w_ref[offs["fow"]:offs["fow"] + HP, 0:O]
        b_fo = w_ref[offs["fob"]:offs["fob"] + 1, 0:O]
        y_ref[...] = (jnp.dot(cur, w_fo, preferred_element_type=f32)
                      + b_fo).astype(y_ref.dtype)

    return kernel


# ---------------------------------------------------------------------------
# Forward wrapper (tiny pad/reshape glue; hot path is one pallas_call)
# ---------------------------------------------------------------------------

def custom_time_series_forward(wbuf, meta, x, state):
    """x: (S, B, fc_input_size), state: (num_layers, B, hidden_size)."""
    S, B, Fin = x.shape
    L, _, H = state.shape
    HP, O = meta["HP"], meta["O"]
    BP = _round_up(B, 8)                             # sublane-aligned batch

    x_p = jnp.pad(x, ((0, 0), (0, BP - B), (0, 0))).reshape(S * BP, Fin)
    st_p = jnp.pad(state, ((0, 0), (0, BP - B), (0, HP - H))).reshape(L * BP, HP)

    kernel = _make_fused_kernel(meta, S, BP)
    y_p, ns_p = pl.pallas_call(
        kernel,
        out_shape=(jax.ShapeDtypeStruct((S * BP, O), x.dtype),
                   jax.ShapeDtypeStruct((L * BP, HP), x.dtype)),
        input_output_aliases={1: 1},                 # state in -> new state out
        compiler_params=pltpu.CompilerParams(vmem_limit_bytes=32 * 1024 * 1024),
    )(x_p, st_p, wbuf)

    y = y_p.reshape(S, BP, O)[:, :B, :]
    new_state = ns_p.reshape(L, BP, HP)[:, :B, :H]
    return y, new_state


# ---------------------------------------------------------------------------
# Pure-JAX reference (torch-convention weights) for correctness check
# ---------------------------------------------------------------------------

def reference_forward(params, x, state):
    S, B, Fin = x.shape
    layer_in = x @ params["fc_in_w"].T + params["fc_in_b"]
    new_states = []
    for l, p in enumerate(params["gru"]):
        H = p["w_hh"].shape[1]
        hcur = state[l]
        outs = []
        for t in range(S):
            gi = layer_in[t] @ p["w_ih"].T + p["b_ih"]
            gh = hcur @ p["w_hh"].T + p["b_hh"]
            r = jax.nn.sigmoid(gi[:, 0:H] + gh[:, 0:H])
            z = jax.nn.sigmoid(gi[:, H:2 * H] + gh[:, H:2 * H])
            n = jnp.tanh(gi[:, 2 * H:3 * H] + r * gh[:, 2 * H:3 * H])
            hcur = (1.0 - z) * n + z * hcur
            outs.append(hcur)
        layer_in = jnp.stack(outs, axis=0)
        new_states.append(hcur)
    y = layer_in @ params["fc_out_w"].T + params["fc_out_b"]
    return y, jnp.stack(new_states, axis=0)


# ---------------------------------------------------------------------------
# Parameter construction (PyTorch-style storage shapes)
# ---------------------------------------------------------------------------

def init_params(key, fc_input_size, input_size, hidden_size, num_layers, fc_output_size):
    ks = jax.random.split(key, 4 + 4 * num_layers)

    def u(k, shape, fan):
        bound = 1.0 / jnp.sqrt(fan)
        return jax.random.uniform(k, shape, jnp.float32, -bound, bound)

    params = {
        "fc_in_w": u(ks[0], (input_size, fc_input_size), fc_input_size),
        "fc_in_b": u(ks[1], (input_size,), fc_input_size),
        "fc_out_w": u(ks[2], (fc_output_size, hidden_size), hidden_size),
        "fc_out_b": u(ks[3], (fc_output_size,), hidden_size),
        "gru": [],
    }
    for l in range(num_layers):
        in_sz = input_size if l == 0 else hidden_size
        base = 4 + 4 * l
        params["gru"].append({
            "w_ih": u(ks[base + 0], (3 * hidden_size, in_sz), hidden_size),
            "w_hh": u(ks[base + 1], (3 * hidden_size, hidden_size), hidden_size),
            "b_ih": u(ks[base + 2], (3 * hidden_size,), hidden_size),
            "b_hh": u(ks[base + 3], (3 * hidden_size,), hidden_size),
        })
    return params


# ---------------------------------------------------------------------------
# Main
# ---------------------------------------------------------------------------

if __name__ == "__main__":
    # Small shapes consistent with the module's forward (distinct sizes to
    # exercise the general layout path):
    S, B = 8, 2                     # seq_len, batch
    fc_input_size = 16
    input_size = 24                 # kwargs['input_size']
    hidden_size = 32                # kwargs['hidden_size']
    num_layers = 2                  # kwargs['num_layers']
    fc_output_size = 4

    key = jax.random.PRNGKey(0)
    kp, kx = jax.random.split(key)

    params = init_params(kp, fc_input_size, input_size, hidden_size,
                         num_layers, fc_output_size)
    wbuf, meta = prepare_pallas_params(params, hidden_size)   # one-time packing

    x = jax.random.normal(kx, (S, B, fc_input_size), jnp.float32)
    state = jnp.zeros((num_layers, B, hidden_size), jnp.float32)  # reset_hidden_states()

    fwd = jax.jit(lambda w, xx, st: custom_time_series_forward(w, meta, xx, st))
    y, new_state = fwd(wbuf, x, state)
    y = jax.block_until_ready(y)
    new_state = jax.block_until_ready(new_state)

    y_ref, state_ref = reference_forward(params, x, state)
    assert jnp.allclose(y, y_ref, atol=1e-4, rtol=1e-4), "output mismatch"
    assert jnp.allclose(new_state, state_ref, atol=1e-4, rtol=1e-4), "hidden state mismatch"

    print("KERNEL_OK")
</pallas_src>

<mosaic_0001>
module attributes {stable_mosaic.version = 11 : i64} {
  func.func @kernel(%arg0: memref<64x16xf32, #tpu.memory_space<vmem>>, %arg1: memref<16x128xf32, #tpu.memory_space<vmem>>, %arg2: memref<600x384xf32, #tpu.memory_space<vmem>>, %arg3: memref<64x4xf32, #tpu.memory_space<vmem>>, %arg4: memref<16x128xf32, #tpu.memory_space<vmem>>) attributes {dimension_semantics = [], scalar_prefetch = 0 : i64, scratch_operands = 0 : i64, tpu.core_type = #tpu.core_type<tc>} {
    %c0 = arith.constant 0 : index
    %c0_0 = arith.constant 0 : index
    %0 = vector.load %arg2[%c0, %c0_0] : memref<600x384xf32, #tpu.memory_space<vmem>>, vector<16x24xf32>
    %c16 = arith.constant 16 : index
    %c0_1 = arith.constant 0 : index
    %1 = vector.load %arg2[%c16, %c0_1] : memref<600x384xf32, #tpu.memory_space<vmem>>, vector<1x24xf32>
    %c0_2 = arith.constant 0 : index
    %c0_3 = arith.constant 0 : index
    %2 = vector.load %arg0[%c0_2, %c0_3] : memref<64x16xf32, #tpu.memory_space<vmem>>, vector<64x16xf32>
    %cst = arith.constant dense<0.000000e+00> : vector<64x24xf32>
    %3 = tpu.matmul %2, %0, %cst {dimension_numbers = #tpu.dot_dimension_numbers<[1], [0], [0], [1], [0, 0, 1, 1], [], []>} : vector<64x16xf32>, vector<16x24xf32>, vector<64x24xf32> -> vector<64x24xf32>
    %4 = vector.broadcast %1 : vector<1x24xf32> to vector<64x24xf32>
    %5 = arith.addf %3, %4 : vector<64x24xf32>
    %c24 = arith.constant 24 : index
    %c0_4 = arith.constant 0 : index
    %6 = vector.load %arg2[%c24, %c0_4] : memref<600x384xf32, #tpu.memory_space<vmem>>, vector<24x384xf32>
    %c48 = arith.constant 48 : index
    %c0_5 = arith.constant 0 : index
    %7 = vector.load %arg2[%c48, %c0_5] : memref<600x384xf32, #tpu.memory_space<vmem>>, vector<1x384xf32>
    %c56 = arith.constant 56 : index
    %c0_6 = arith.constant 0 : index
    %8 = vector.load %arg2[%c56, %c0_6] : memref<600x384xf32, #tpu.memory_space<vmem>>, vector<128x384xf32>
    %c184 = arith.constant 184 : index
    %c0_7 = arith.constant 0 : index
    %9 = vector.load %arg2[%c184, %c0_7] : memref<600x384xf32, #tpu.memory_space<vmem>>, vector<1x128xf32>
    %cst_8 = arith.constant dense<0.000000e+00> : vector<64x384xf32>
    %10 = tpu.matmul %5, %6, %cst_8 {dimension_numbers = #tpu.dot_dimension_numbers<[1], [0], [0], [1], [0, 0, 1, 1], [], []>} : vector<64x24xf32>, vector<24x384xf32>, vector<64x384xf32> -> vector<64x384xf32>
    %11 = vector.broadcast %7 : vector<1x384xf32> to vector<64x384xf32>
    %12 = arith.addf %10, %11 : vector<64x384xf32>
    %c0_9 = arith.constant 0 : index
    %c0_10 = arith.constant 0 : index
    %13 = vector.load %arg1[%c0_9, %c0_10] : memref<16x128xf32, #tpu.memory_space<vmem>>, vector<8x128xf32>
    %14 = vector.extract_strided_slice %12 {offsets = [0, 0], sizes = [8, 384], strides = [1, 1]} : vector<64x384xf32> to vector<8x384xf32>
    %cst_11 = arith.constant dense<0.000000e+00> : vector<8x384xf32>
    %15 = tpu.matmul %13, %8, %cst_11 {dimension_numbers = #tpu.dot_dimension_numbers<[1], [0], [0], [1], [0, 0, 1, 1], [], []>} : vector<8x128xf32>, vector<128x384xf32>, vector<8x384xf32> -> vector<8x384xf32>
    %16 = vector.extract_strided_slice %14 {offsets = [0, 0], sizes = [8, 128], strides = [1, 1]} : vector<8x384xf32> to vector<8x128xf32>
    %17 = vector.extract_strided_slice %15 {offsets = [0, 0], sizes = [8, 128], strides = [1, 1]} : vector<8x384xf32> to vector<8x128xf32>
    %18 = arith.addf %16, %17 : vector<8x128xf32>
    %19 = arith.negf %18 : vector<8x128xf32>
    %20 = math.exp %19 : vector<8x128xf32>
    %cst_12 = arith.constant 1.000000e+00 : f32
    %21 = vector.broadcast %cst_12 : f32 to vector<8x128xf32>
    %22 = arith.addf %21, %20 : vector<8x128xf32>
    %23 = arith.divf %21, %22 : vector<8x128xf32>
    %24 = vector.extract_strided_slice %14 {offsets = [0, 128], sizes = [8, 128], strides = [1, 1]} : vector<8x384xf32> to vector<8x128xf32>
    %25 = vector.extract_strided_slice %15 {offsets = [0, 128], sizes = [8, 128], strides = [1, 1]} : vector<8x384xf32> to vector<8x128xf32>
    %26 = arith.addf %24, %25 : vector<8x128xf32>
    %27 = arith.negf %26 : vector<8x128xf32>
    %28 = math.exp %27 : vector<8x128xf32>
    %cst_13 = arith.constant 1.000000e+00 : f32
    %29 = vector.broadcast %cst_13 : f32 to vector<8x128xf32>
    %30 = arith.addf %29, %28 : vector<8x128xf32>
    %31 = arith.divf %29, %30 : vector<8x128xf32>
    %32 = vector.extract_strided_slice %14 {offsets = [0, 256], sizes = [8, 128], strides = [1, 1]} : vector<8x384xf32> to vector<8x128xf32>
    %33 = vector.extract_strided_slice %15 {offsets = [0, 256], sizes = [8, 128], strides = [1, 1]} : vector<8x384xf32> to vector<8x128xf32>
    %34 = vector.broadcast %9 : vector<1x128xf32> to vector<8x128xf32>
    %35 = arith.addf %33, %34 : vector<8x128xf32>
    %36 = arith.mulf %23, %35 : vector<8x128xf32>
    %37 = arith.addf %32, %36 : vector<8x128xf32>
    %38 = math.tanh %37 : vector<8x128xf32>
    %39 = arith.subf %13, %38 : vector<8x128xf32>
    %40 = arith.mulf %31, %39 : vector<8x128xf32>
    %41 = arith.addf %38, %40 : vector<8x128xf32>
    %42 = vector.extract_strided_slice %12 {offsets = [8, 0], sizes = [8, 384], strides = [1, 1]} : vector<64x384xf32> to vector<8x384xf32>
    %cst_14 = arith.constant dense<0.000000e+00> : vector<8x384xf32>
    %43 = tpu.matmul %41, %8, %cst_14 {dimension_numbers = #tpu.dot_dimension_numbers<[1], [0], [0], [1], [0, 0, 1, 1], [], []>} : vector<8x128xf32>, vector<128x384xf32>, vector<8x384xf32> -> vector<8x384xf32>
    %44 = vector.extract_strided_slice %42 {offsets = [0, 0], sizes = [8, 128], strides = [1, 1]} : vector<8x384xf32> to vector<8x128xf32>
    %45 = vector.extract_strided_slice %43 {offsets = [0, 0], sizes = [8, 128], strides = [1, 1]} : vector<8x384xf32> to vector<8x128xf32>
    %46 = arith.addf %44, %45 : vector<8x128xf32>
    %47 = arith.negf %46 : vector<8x128xf32>
    %48 = math.exp %47 : vector<8x128xf32>
    %cst_15 = arith.constant 1.000000e+00 : f32
    %49 = vector.broadcast %cst_15 : f32 to vector<8x128xf32>
    %50 = arith.addf %49, %48 : vector<8x128xf32>
    %51 = arith.divf %49, %50 : vector<8x128xf32>
    %52 = vector.extract_strided_slice %42 {offsets = [0, 128], sizes = [8, 128], strides = [1, 1]} : vector<8x384xf32> to vector<8x128xf32>
    %53 = vector.extract_strided_slice %43 {offsets = [0, 128], sizes = [8, 128], strides = [1, 1]} : vector<8x384xf32> to vector<8x128xf32>
    %54 = arith.addf %52, %53 : vector<8x128xf32>
    %55 = arith.negf %54 : vector<8x128xf32>
    %56 = math.exp %55 : vector<8x128xf32>
    %cst_16 = arith.constant 1.000000e+00 : f32
    %57 = vector.broadcast %cst_16 : f32 to vector<8x128xf32>
    %58 = arith.addf %57, %56 : vector<8x128xf32>
    %59 = arith.divf %57, %58 : vector<8x128xf32>
    %60 = vector.extract_strided_slice %42 {offsets = [0, 256], sizes = [8, 128], strides = [1, 1]} : vector<8x384xf32> to vector<8x128xf32>
    %61 = vector.extract_strided_slice %43 {offsets = [0, 256], sizes = [8, 128], strides = [1, 1]} : vector<8x384xf32> to vector<8x128xf32>
    %62 = vector.broadcast %9 : vector<1x128xf32> to vector<8x128xf32>
    %63 = arith.addf %61, %62 : vector<8x128xf32>
    %64 = arith.mulf %51, %63 : vector<8x128xf32>
    %65 = arith.addf %60, %64 : vector<8x128xf32>
    %66 = math.tanh %65 : vector<8x128xf32>
    %67 = arith.subf %41, %66 : vector<8x128xf32>
    %68 = arith.mulf %59, %67 : vector<8x128xf32>
    %69 = arith.addf %66, %68 : vector<8x128xf32>
    %70 = vector.extract_strided_slice %12 {offsets = [16, 0], sizes = [8, 384], strides = [1, 1]} : vector<64x384xf32> to vector<8x384xf32>
    %cst_17 = arith.constant dense<0.000000e+00> : vector<8x384xf32>
    %71 = tpu.matmul %69, %8, %cst_17 {dimension_numbers = #tpu.dot_dimension_numbers<[1], [0], [0], [1], [0, 0, 1, 1], [], []>} : vector<8x128xf32>, vector<128x384xf32>, vector<8x384xf32> -> vector<8x384xf32>
    %72 = vector.extract_strided_slice %70 {offsets = [0, 0], sizes = [8, 128], strides = [1, 1]} : vector<8x384xf32> to vector<8x128xf32>
    %73 = vector.extract_strided_slice %71 {offsets = [0, 0], sizes = [8, 128], strides = [1, 1]} : vector<8x384xf32> to vector<8x128xf32>
    %74 = arith.addf %72, %73 : vector<8x128xf32>
    %75 = arith.negf %74 : vector<8x128xf32>
    %76 = math.exp %75 : vector<8x128xf32>
    %cst_18 = arith.constant 1.000000e+00 : f32
    %77 = vector.broadcast %cst_18 : f32 to vector<8x128xf32>
    %78 = arith.addf %77, %76 : vector<8x128xf32>
    %79 = arith.divf %77, %78 : vector<8x128xf32>
    %80 = vector.extract_strided_slice %70 {offsets = [0, 128], sizes = [8, 128], strides = [1, 1]} : vector<8x384xf32> to vector<8x128xf32>
    %81 = vector.extract_strided_slice %71 {offsets = [0, 128], sizes = [8, 128], strides = [1, 1]} : vector<8x384xf32> to vector<8x128xf32>
    %82 = arith.addf %80, %81 : vector<8x128xf32>
    %83 = arith.negf %82 : vector<8x128xf32>
    %84 = math.exp %83 : vector<8x128xf32>
    %cst_19 = arith.constant 1.000000e+00 : f32
    %85 = vector.broadcast %cst_19 : f32 to vector<8x128xf32>
    %86 = arith.addf %85, %84 : vector<8x128xf32>
    %87 = arith.divf %85, %86 : vector<8x128xf32>
    %88 = vector.extract_strided_slice %70 {offsets = [0, 256], sizes = [8, 128], strides = [1, 1]} : vector<8x384xf32> to vector<8x128xf32>
    %89 = vector.extract_strided_slice %71 {offsets = [0, 256], sizes = [8, 128], strides = [1, 1]} : vector<8x384xf32> to vector<8x128xf32>
    %90 = vector.broadcast %9 : vector<1x128xf32> to vector<8x128xf32>
    %91 = arith.addf %89, %90 : vector<8x128xf32>
    %92 = arith.mulf %79, %91 : vector<8x128xf32>
    %93 = arith.addf %88, %92 : vector<8x128xf32>
    %94 = math.tanh %93 : vector<8x128xf32>
    %95 = arith.subf %69, %94 : vector<8x128xf32>
    %96 = arith.mulf %87, %95 : vector<8x128xf32>
    %97 = arith.addf %94, %96 : vector<8x128xf32>
    %98 = vector.extract_strided_slice %12 {offsets = [24, 0], sizes = [8, 384], strides = [1, 1]} : vector<64x384xf32> to vector<8x384xf32>
    %cst_20 = arith.constant dense<0.000000e+00> : vector<8x384xf32>
    %99 = tpu.matmul %97, %8, %cst_20 {dimension_numbers = #tpu.dot_dimension_numbers<[1], [0], [0], [1], [0, 0, 1, 1], [], []>} : vector<8x128xf32>, vector<128x384xf32>, vector<8x384xf32> -> vector<8x384xf32>
    %100 = vector.extract_strided_slice %98 {offsets = [0, 0], sizes = [8, 128], strides = [1, 1]} : vector<8x384xf32> to vector<8x128xf32>
    %101 = vector.extract_strided_slice %99 {offsets = [0, 0], sizes = [8, 128], strides = [1, 1]} : vector<8x384xf32> to vector<8x128xf32>
    %102 = arith.addf %100, %101 : vector<8x128xf32>
    %103 = arith.negf %102 : vector<8x128xf32>
    %104 = math.exp %103 : vector<8x128xf32>
    %cst_21 = arith.constant 1.000000e+00 : f32
    %105 = vector.broadcast %cst_21 : f32 to vector<8x128xf32>
    %106 = arith.addf %105, %104 : vector<8x128xf32>
    %107 = arith.divf %105, %106 : vector<8x128xf32>
    %108 = vector.extract_strided_slice %98 {offsets = [0, 128], sizes = [8, 128], strides = [1, 1]} : vector<8x384xf32> to vector<8x128xf32>
    %109 = vector.extract_strided_slice %99 {offsets = [0, 128], sizes = [8, 128], strides = [1, 1]} : vector<8x384xf32> to vector<8x128xf32>
    %110 = arith.addf %108, %109 : vector<8x128xf32>
    %111 = arith.negf %110 : vector<8x128xf32>
    %112 = math.exp %111 : vector<8x128xf32>
    %cst_22 = arith.constant 1.000000e+00 : f32
    %113 = vector.broadcast %cst_22 : f32 to vector<8x128xf32>
    %114 = arith.addf %113, %112 : vector<8x128xf32>
    %115 = arith.divf %113, %114 : vector<8x128xf32>
    %116 = vector.extract_strided_slice %98 {offsets = [0, 256], sizes = [8, 128], strides = [1, 1]} : vector<8x384xf32> to vector<8x128xf32>
    %117 = vector.extract_strided_slice %99 {offsets = [0, 256], sizes = [8, 128], strides = [1, 1]} : vector<8x384xf32> to vector<8x128xf32>
    %118 = vector.broadcast %9 : vector<1x128xf32> to vector<8x128xf32>
    %119 = arith.addf %117, %118 : vector<8x128xf32>
    %120 = arith.mulf %107, %119 : vector<8x128xf32>
    %121 = arith.addf %116, %120 : vector<8x128xf32>
    %122 = math.tanh %121 : vector<8x128xf32>
    %123 = arith.subf %97, %122 : vector<8x128xf32>
    %124 = arith.mulf %115, %123 : vector<8x128xf32>
    %125 = arith.addf %122, %124 : vector<8x128xf32>
    %126 = vector.extract_strided_slice %12 {offsets = [32, 0], sizes = [8, 384], strides = [1, 1]} : vector<64x384xf32> to vector<8x384xf32>
    %cst_23 = arith.constant dense<0.000000e+00> : vector<8x384xf32>
    %127 = tpu.matmul %125, %8, %cst_23 {dimension_numbers = #tpu.dot_dimension_numbers<[1], [0], [0], [1], [0, 0, 1, 1], [], []>} : vector<8x128xf32>, vector<128x384xf32>, vector<8x384xf32> -> vector<8x384xf32>
    %128 = vector.extract_strided_slice %126 {offsets = [0, 0], sizes = [8, 128], strides = [1, 1]} : vector<8x384xf32> to vector<8x128xf32>
    %129 = vector.extract_strided_slice %127 {offsets = [0, 0], sizes = [8, 128], strides = [1, 1]} : vector<8x384xf32> to vector<8x128xf32>
    %130 = arith.addf %128, %129 : vector<8x128xf32>
    %131 = arith.negf %130 : vector<8x128xf32>
    %132 = math.exp %131 : vector<8x128xf32>
    %cst_24 = arith.constant 1.000000e+00 : f32
    %133 = vector.broadcast %cst_24 : f32 to vector<8x128xf32>
    %134 = arith.addf %133, %132 : vector<8x128xf32>
    %135 = arith.divf %133, %134 : vector<8x128xf32>
    %136 = vector.extract_strided_slice %126 {offsets = [0, 128], sizes = [8, 128], strides = [1, 1]} : vector<8x384xf32> to vector<8x128xf32>
    %137 = vector.extract_strided_slice %127 {offsets = [0, 128], sizes = [8, 128], strides = [1, 1]} : vector<8x384xf32> to vector<8x128xf32>
    %138 = arith.addf %136, %137 : vector<8x128xf32>
    %139 = arith.negf %138 : vector<8x128xf32>
    %140 = math.exp %139 : vector<8x128xf32>
    %cst_25 = arith.constant 1.000000e+00 : f32
    %141 = vector.broadcast %cst_25 : f32 to vector<8x128xf32>
    %142 = arith.addf %141, %140 : vector<8x128xf32>
    %143 = arith.divf %141, %142 : vector<8x128xf32>
    %144 = vector.extract_strided_slice %126 {offsets = [0, 256], sizes = [8, 128], strides = [1, 1]} : vector<8x384xf32> to vector<8x128xf32>
    %145 = vector.extract_strided_slice %127 {offsets = [0, 256], sizes = [8, 128], strides = [1, 1]} : vector<8x384xf32> to vector<8x128xf32>
    %146 = vector.broadcast %9 : vector<1x128xf32> to vector<8x128xf32>
    %147 = arith.addf %145, %146 : vector<8x128xf32>
    %148 = arith.mulf %135, %147 : vector<8x128xf32>
    %149 = arith.addf %144, %148 : vector<8x128xf32>
    %150 = math.tanh %149 : vector<8x128xf32>
    %151 = arith.subf %125, %150 : vector<8x128xf32>
    %152 = arith.mulf %143, %151 : vector<8x128xf32>
    %153 = arith.addf %150, %152 : vector<8x128xf32>
    %154 = vector.extract_strided_slice %12 {offsets = [40, 0], sizes = [8, 384], strides = [1, 1]} : vector<64x384xf32> to vector<8x384xf32>
    %cst_26 = arith.constant dense<0.000000e+00> : vector<8x384xf32>
    %155 = tpu.matmul %153, %8, %cst_26 {dimension_numbers = #tpu.dot_dimension_numbers<[1], [0], [0], [1], [0, 0, 1, 1], [], []>} : vector<8x128xf32>, vector<128x384xf32>, vector<8x384xf32> -> vector<8x384xf32>
    %156 = vector.extract_strided_slice %154 {offsets = [0, 0], sizes = [8, 128], strides = [1, 1]} : vector<8x384xf32> to vector<8x128xf32>
    %157 = vector.extract_strided_slice %155 {offsets = [0, 0], sizes = [8, 128], strides = [1, 1]} : vector<8x384xf32> to vector<8x128xf32>
    %158 = arith.addf %156, %157 : vector<8x128xf32>
    %159 = arith.negf %158 : vector<8x128xf32>
    %160 = math.exp %159 : vector<8x128xf32>
    %cst_27 = arith.constant 1.000000e+00 : f32
    %161 = vector.broadcast %cst_27 : f32 to vector<8x128xf32>
    %162 = arith.addf %161, %160 : vector<8x128xf32>
    %163 = arith.divf %161, %162 : vector<8x128xf32>
    %164 = vector.extract_strided_slice %154 {offsets = [0, 128], sizes = [8, 128], strides = [1, 1]} : vector<8x384xf32> to vector<8x128xf32>
    %165 = vector.extract_strided_slice %155 {offsets = [0, 128], sizes = [8, 128], strides = [1, 1]} : vector<8x384xf32> to vector<8x128xf32>
    %166 = arith.addf %164, %165 : vector<8x128xf32>
    %167 = arith.negf %166 : vector<8x128xf32>
    %168 = math.exp %167 : vector<8x128xf32>
    %cst_28 = arith.constant 1.000000e+00 : f32
    %169 = vector.broadcast %cst_28 : f32 to vector<8x128xf32>
    %170 = arith.addf %169, %168 : vector<8x128xf32>
    %171 = arith.divf %169, %170 : vector<8x128xf32>
    %172 = vector.extract_strided_slice %154 {offsets = [0, 256], sizes = [8, 128], strides = [1, 1]} : vector<8x384xf32> to vector<8x128xf32>
    %173 = vector.extract_strided_slice %155 {offsets = [0, 256], sizes = [8, 128], strides = [1, 1]} : vector<8x384xf32> to vector<8x128xf32>
    %174 = vector.broadcast %9 : vector<1x128xf32> to vector<8x128xf32>
    %175 = arith.addf %173, %174 : vector<8x128xf32>
    %176 = arith.mulf %163, %175 : vector<8x128xf32>
    %177 = arith.addf %172, %176 : vector<8x128xf32>
    %178 = math.tanh %177 : vector<8x128xf32>
    %179 = arith.subf %153, %178 : vector<8x128xf32>
    %180 = arith.mulf %171, %179 : vector<8x128xf32>
    %181 = arith.addf %178, %180 : vector<8x128xf32>
    %182 = vector.extract_strided_slice %12 {offsets = [48, 0], sizes = [8, 384], strides = [1, 1]} : vector<64x384xf32> to vector<8x384xf32>
    %cst_29 = arith.constant dense<0.000000e+00> : vector<8x384xf32>
    %183 = tpu.matmul %181, %8, %cst_29 {dimension_numbers = #tpu.dot_dimension_numbers<[1], [0], [0], [1], [0, 0, 1, 1], [], []>} : vector<8x128xf32>, vector<128x384xf32>, vector<8x384xf32> -> vector<8x384xf32>
    %184 = vector.extract_strided_slice %182 {offsets = [0, 0], sizes = [8, 128], strides = [1, 1]} : vector<8x384xf32> to vector<8x128xf32>
    %185 = vector.extract_strided_slice %183 {offsets = [0, 0], sizes = [8, 128], strides = [1, 1]} : vector<8x384xf32> to vector<8x128xf32>
    %186 = arith.addf %184, %185 : vector<8x128xf32>
    %187 = arith.negf %186 : vector<8x128xf32>
    %188 = math.exp %187 : vector<8x128xf32>
    %cst_30 = arith.constant 1.000000e+00 : f32
    %189 = vector.broadcast %cst_30 : f32 to vector<8x128xf32>
    %190 = arith.addf %189, %188 : vector<8x128xf32>
    %191 = arith.divf %189, %190 : vector<8x128xf32>
    %192 = vector.extract_strided_slice %182 {offsets = [0, 128], sizes = [8, 128], strides = [1, 1]} : vector<8x384xf32> to vector<8x128xf32>
    %193 = vector.extract_strided_slice %183 {offsets = [0, 128], sizes = [8, 128], strides = [1, 1]} : vector<8x384xf32> to vector<8x128xf32>
    %194 = arith.addf %192, %193 : vector<8x128xf32>
    %195 = arith.negf %194 : vector<8x128xf32>
    %196 = math.exp %195 : vector<8x128xf32>
    %cst_31 = arith.constant 1.000000e+00 : f32
    %197 = vector.broadcast %cst_31 : f32 to vector<8x128xf32>
    %198 = arith.addf %197, %196 : vector<8x128xf32>
    %199 = arith.divf %197, %198 : vector<8x128xf32>
    %200 = vector.extract_strided_slice %182 {offsets = [0, 256], sizes = [8, 128], strides = [1, 1]} : vector<8x384xf32> to vector<8x128xf32>
    %201 = vector.extract_strided_slice %183 {offsets = [0, 256], sizes = [8, 128], strides = [1, 1]} : vector<8x384xf32> to vector<8x128xf32>
    %202 = vector.broadcast %9 : vector<1x128xf32> to vector<8x128xf32>
    %203 = arith.addf %201, %202 : vector<8x128xf32>
    %204 = arith.mulf %191, %203 : vector<8x128xf32>
    %205 = arith.addf %200, %204 : vector<8x128xf32>
    %206 = math.tanh %205 : vector<8x128xf32>
    %207 = arith.subf %181, %206 : vector<8x128xf32>
    %208 = arith.mulf %199, %207 : vector<8x128xf32>
    %209 = arith.addf %206, %208 : vector<8x128xf32>
    %210 = vector.extract_strided_slice %12 {offsets = [56, 0], sizes = [8, 384], strides = [1, 1]} : vector<64x384xf32> to vector<8x384xf32>
    %cst_32 = arith.constant dense<0.000000e+00> : vector<8x384xf32>
    %211 = tpu.matmul %209, %8, %cst_32 {dimension_numbers = #tpu.dot_dimension_numbers<[1], [0], [0], [1], [0, 0, 1, 1], [], []>} : vector<8x128xf32>, vector<128x384xf32>, vector<8x384xf32> -> vector<8x384xf32>
    %212 = vector.extract_strided_slice %210 {offsets = [0, 0], sizes = [8, 128], strides = [1, 1]} : vector<8x384xf32> to vector<8x128xf32>
    %213 = vector.extract_strided_slice %211 {offsets = [0, 0], sizes = [8, 128], strides = [1, 1]} : vector<8x384xf32> to vector<8x128xf32>
    %214 = arith.addf %212, %213 : vector<8x128xf32>
    %215 = arith.negf %214 : vector<8x128xf32>
    %216 = math.exp %215 : vector<8x128xf32>
    %cst_33 = arith.constant 1.000000e+00 : f32
    %217 = vector.broadcast %cst_33 : f32 to vector<8x128xf32>
    %218 = arith.addf %217, %216 : vector<8x128xf32>
    %219 = arith.divf %217, %218 : vector<8x128xf32>
    %220 = vector.extract_strided_slice %210 {offsets = [0, 128], sizes = [8, 128], strides = [1, 1]} : vector<8x384xf32> to vector<8x128xf32>
    %221 = vector.extract_strided_slice %211 {offsets = [0, 128], sizes = [8, 128], strides = [1, 1]} : vector<8x384xf32> to vector<8x128xf32>
    %222 = arith.addf %220, %221 : vector<8x128xf32>
    %223 = arith.negf %222 : vector<8x128xf32>
    %224 = math.exp %223 : vector<8x128xf32>
    %cst_34 = arith.constant 1.000000e+00 : f32
    %225 = vector.broadcast %cst_34 : f32 to vector<8x128xf32>
    %226 = arith.addf %225, %224 : vector<8x128xf32>
    %227 = arith.divf %225, %226 : vector<8x128xf32>
    %228 = vector.extract_strided_slice %210 {offsets = [0, 256], sizes = [8, 128], strides = [1, 1]} : vector<8x384xf32> to vector<8x128xf32>
    %229 = vector.extract_strided_slice %211 {offsets = [0, 256], sizes = [8, 128], strides = [1, 1]} : vector<8x384xf32> to vector<8x128xf32>
    %230 = vector.broadcast %9 : vector<1x128xf32> to vector<8x128xf32>
    %231 = arith.addf %229, %230 : vector<8x128xf32>
    %232 = arith.mulf %219, %231 : vector<8x128xf32>
    %233 = arith.addf %228, %232 : vector<8x128xf32>
    %234 = math.tanh %233 : vector<8x128xf32>
    %235 = arith.subf %209, %234 : vector<8x128xf32>
    %236 = arith.mulf %227, %235 : vector<8x128xf32>
    %237 = arith.addf %234, %236 : vector<8x128xf32>
    %c0_35 = arith.constant 0 : index
    %c0_36 = arith.constant 0 : index
    %238 = vector.load %arg4[%c0_35, %c0_36] : memref<16x128xf32, #tpu.memory_space<vmem>>, vector<8x128xf32>
    tpu.vector_store %arg4[%c0_35, %c0_36], %237 {strides = array<i32>} : memref<16x128xf32, #tpu.memory_space<vmem>>, vector<8x128xf32>,
    %239 = tpu.concatenate %41, %69, %97, %125, %153, %181, %209, %237 in 0 : vector<8x128xf32>, vector<8x128xf32>, vector<8x128xf32>, vector<8x128xf32>, vector<8x128xf32>, vector<8x128xf32>, vector<8x128xf32>, vector<8x128xf32> -> vector<64x128xf32>
    %c192 = arith.constant 192 : index
    %c0_37 = arith.constant 0 : index
    %240 = vector.load %arg2[%c192, %c0_37] : memref<600x384xf32, #tpu.memory_space<vmem>>, vector<128x384xf32>
    %c320 = arith.constant 320 : index
    %c0_38 = arith.constant 0 : index
    %241 = vector.load %arg2[%c320, %c0_38] : memref<600x384xf32, #tpu.memory_space<vmem>>, vector<1x384xf32>
    %c328 = arith.constant 328 : index
    %c0_39 = arith.constant 0 : index
    %242 = vector.load %arg2[%c328, %c0_39] : memref<600x384xf32, #tpu.memory_space<vmem>>, vector<128x384xf32>
    %c456 = arith.constant 456 : index
    %c0_40 = arith.constant 0 : index
    %243 = vector.load %arg2[%c456, %c0_40] : memref<600x384xf32, #tpu.memory_space<vmem>>, vector<1x128xf32>
    %cst_41 = arith.constant dense<0.000000e+00> : vector<64x384xf32>
    %244 = tpu.matmul %239, %240, %cst_41 {dimension_numbers = #tpu.dot_dimension_numbers<[1], [0], [0], [1], [0, 0, 1, 1], [], []>} : vector<64x128xf32>, vector<128x384xf32>, vector<64x384xf32> -> vector<64x384xf32>
    %245 = vector.broadcast %241 : vector<1x384xf32> to vector<64x384xf32>
    %246 = arith.addf %244, %245 : vector<64x384xf32>
    %c8 = arith.constant 8 : index
    %c0_42 = arith.constant 0 : index
    %247 = vector.load %arg1[%c8, %c0_42] : memref<16x128xf32, #tpu.memory_space<vmem>>, vector<8x128xf32>
    %248 = vector.extract_strided_slice %246 {offsets = [0, 0], sizes = [8, 384], strides = [1, 1]} : vector<64x384xf32> to vector<8x384xf32>
    %cst_43 = arith.constant dense<0.000000e+00> : vector<8x384xf32>
    %249 = tpu.matmul %247, %242, %cst_43 {dimension_numbers = #tpu.dot_dimension_numbers<[1], [0], [0], [1], [0, 0, 1, 1], [], []>} : vector<8x128xf32>, vector<128x384xf32>, vector<8x384xf32> -> vector<8x384xf32>
    %250 = vector.extract_strided_slice %248 {offsets = [0, 0], sizes = [8, 128], strides = [1, 1]} : vector<8x384xf32> to vector<8x128xf32>
    %251 = vector.extract_strided_slice %249 {offsets = [0, 0], sizes = [8, 128], strides = [1, 1]} : vector<8x384xf32> to vector<8x128xf32>
    %252 = arith.addf %250, %251 : vector<8x128xf32>
    %253 = arith.negf %252 : vector<8x128xf32>
    %254 = math.exp %253 : vector<8x128xf32>
    %cst_44 = arith.constant 1.000000e+00 : f32
    %255 = vector.broadcast %cst_44 : f32 to vector<8x128xf32>
    %256 = arith.addf %255, %254 : vector<8x128xf32>
    %257 = arith.divf %255, %256 : vector<8x128xf32>
    %258 = vector.extract_strided_slice %248 {offsets = [0, 128], sizes = [8, 128], strides = [1, 1]} : vector<8x384xf32> to vector<8x128xf32>
    %259 = vector.extract_strided_slice %249 {offsets = [0, 128], sizes = [8, 128], strides = [1, 1]} : vector<8x384xf32> to vector<8x128xf32>
    %260 = arith.addf %258, %259 : vector<8x128xf32>
    %261 = arith.negf %260 : vector<8x128xf32>
    %262 = math.exp %261 : vector<8x128xf32>
    %cst_45 = arith.constant 1.000000e+00 : f32
    %263 = vector.broadcast %cst_45 : f32 to vector<8x128xf32>
    %264 = arith.addf %263, %262 : vector<8x128xf32>
    %265 = arith.divf %263, %264 : vector<8x128xf32>
    %266 = vector.extract_strided_slice %248 {offsets = [0, 256], sizes = [8, 128], strides = [1, 1]} : vector<8x384xf32> to vector<8x128xf32>
    %267 = vector.extract_strided_slice %249 {offsets = [0, 256], sizes = [8, 128], strides = [1, 1]} : vector<8x384xf32> to vector<8x128xf32>
    %268 = vector.broadcast %243 : vector<1x128xf32> to vector<8x128xf32>
    %269 = arith.addf %267, %268 : vector<8x128xf32>
    %270 = arith.mulf %257, %269 : vector<8x128xf32>
    %271 = arith.addf %266, %270 : vector<8x128xf32>
    %272 = math.tanh %271 : vector<8x128xf32>
    %273 = arith.subf %247, %272 : vector<8x128xf32>
    %274 = arith.mulf %265, %273 : vector<8x128xf32>
    %275 = arith.addf %272, %274 : vector<8x128xf32>
    %276 = vector.extract_strided_slice %246 {offsets = [8, 0], sizes = [8, 384], strides = [1, 1]} : vector<64x384xf32> to vector<8x384xf32>
    %cst_46 = arith.constant dense<0.000000e+00> : vector<8x384xf32>
    %277 = tpu.matmul %275, %242, %cst_46 {dimension_numbers = #tpu.dot_dimension_numbers<[1], [0], [0], [1], [0, 0, 1, 1], [], []>} : vector<8x128xf32>, vector<128x384xf32>, vector<8x384xf32> -> vector<8x384xf32>
    %278 = vector.extract_strided_slice %276 {offsets = [0, 0], sizes = [8, 128], strides = [1, 1]} : vector<8x384xf32> to vector<8x128xf32>
    %279 = vector.extract_strided_slice %277 {offsets = [0, 0], sizes = [8, 128], strides = [1, 1]} : vector<8x384xf32> to vector<8x128xf32>
    %280 = arith.addf %278, %279 : vector<8x128xf32>
    %281 = arith.negf %280 : vector<8x128xf32>
    %282 = math.exp %281 : vector<8x128xf32>
    %cst_47 = arith.constant 1.000000e+00 : f32
    %283 = vector.broadcast %cst_47 : f32 to vector<8x128xf32>
    %284 = arith.addf %283, %282 : vector<8x128xf32>
    %285 = arith.divf %283, %284 : vector<8x128xf32>
    %286 = vector.extract_strided_slice %276 {offsets = [0, 128], sizes = [8, 128], strides = [1, 1]} : vector<8x384xf32> to vector<8x128xf32>
    %287 = vector.extract_strided_slice %277 {offsets = [0, 128], sizes = [8, 128], strides = [1, 1]} : vector<8x384xf32> to vector<8x128xf32>
    %288 = arith.addf %286, %287 : vector<8x128xf32>
    %289 = arith.negf %288 : vector<8x128xf32>
    %290 = math.exp %289 : vector<8x128xf32>
    %cst_48 = arith.constant 1.000000e+00 : f32
    %291 = vector.broadcast %cst_48 : f32 to vector<8x128xf32>
    %292 = arith.addf %291, %290 : vector<8x128xf32>
    %293 = arith.divf %291, %292 : vector<8x128xf32>
    %294 = vector.extract_strided_slice %276 {offsets = [0, 256], sizes = [8, 128], strides = [1, 1]} : vector<8x384xf32> to vector<8x128xf32>
    %295 = vector.extract_strided_slice %277 {offsets = [0, 256], sizes = [8, 128], strides = [1, 1]} : vector<8x384xf32> to vector<8x128xf32>
    %296 = vector.broadcast %243 : vector<1x128xf32> to vector<8x128xf32>
    %297 = arith.addf %295, %296 : vector<8x128xf32>
    %298 = arith.mulf %285, %297 : vector<8x128xf32>
    %299 = arith.addf %294, %298 : vector<8x128xf32>
    %300 = math.tanh %299 : vector<8x128xf32>
    %301 = arith.subf %275, %300 : vector<8x128xf32>
    %302 = arith.mulf %293, %301 : vector<8x128xf32>
    %303 = arith.addf %300, %302 : vector<8x128xf32>
    %304 = vector.extract_strided_slice %246 {offsets = [16, 0], sizes = [8, 384], strides = [1, 1]} : vector<64x384xf32> to vector<8x384xf32>
    %cst_49 = arith.constant dense<0.000000e+00> : vector<8x384xf32>
    %305 = tpu.matmul %303, %242, %cst_49 {dimension_numbers = #tpu.dot_dimension_numbers<[1], [0], [0], [1], [0, 0, 1, 1], [], []>} : vector<8x128xf32>, vector<128x384xf32>, vector<8x384xf32> -> vector<8x384xf32>
    %306 = vector.extract_strided_slice %304 {offsets = [0, 0], sizes = [8, 128], strides = [1, 1]} : vector<8x384xf32> to vector<8x128xf32>
    %307 = vector.extract_strided_slice %305 {offsets = [0, 0], sizes = [8, 128], strides = [1, 1]} : vector<8x384xf32> to vector<8x128xf32>
    %308 = arith.addf %306, %307 : vector<8x128xf32>
    %309 = arith.negf %308 : vector<8x128xf32>
    %310 = math.exp %309 : vector<8x128xf32>
    %cst_50 = arith.constant 1.000000e+00 : f32
    %311 = vector.broadcast %cst_50 : f32 to vector<8x128xf32>
    %312 = arith.addf %311, %310 : vector<8x128xf32>
    %313 = arith.divf %311, %312 : vector<8x128xf32>
    %314 = vector.extract_strided_slice %304 {offsets = [0, 128], sizes = [8, 128], strides = [1, 1]} : vector<8x384xf32> to vector<8x128xf32>
    %315 = vector.extract_strided_slice %305 {offsets = [0, 128], sizes = [8, 128], strides = [1, 1]} : vector<8x384xf32> to vector<8x128xf32>
    %316 = arith.addf %314, %315 : vector<8x128xf32>
    %317 = arith.negf %316 : vector<8x128xf32>
    %318 = math.exp %317 : vector<8x128xf32>
    %cst_51 = arith.constant 1.000000e+00 : f32
    %319 = vector.broadcast %cst_51 : f32 to vector<8x128xf32>
    %320 = arith.addf %319, %318 : vector<8x128xf32>
    %321 = arith.divf %319, %320 : vector<8x128xf32>
    %322 = vector.extract_strided_slice %304 {offsets = [0, 256], sizes = [8, 128], strides = [1, 1]} : vector<8x384xf32> to vector<8x128xf32>
    %323 = vector.extract_strided_slice %305 {offsets = [0, 256], sizes = [8, 128], strides = [1, 1]} : vector<8x384xf32> to vector<8x128xf32>
    %324 = vector.broadcast %243 : vector<1x128xf32> to vector<8x128xf32>
    %325 = arith.addf %323, %324 : vector<8x128xf32>
    %326 = arith.mulf %313, %325 : vector<8x128xf32>
    %327 = arith.addf %322, %326 : vector<8x128xf32>
    %328 = math.tanh %327 : vector<8x128xf32>
    %329 = arith.subf %303, %328 : vector<8x128xf32>
    %330 = arith.mulf %321, %329 : vector<8x128xf32>
    %331 = arith.addf %328, %330 : vector<8x128xf32>
    %332 = vector.extract_strided_slice %246 {offsets = [24, 0], sizes = [8, 384], strides = [1, 1]} : vector<64x384xf32> to vector<8x384xf32>
    %cst_52 = arith.constant dense<0.000000e+00> : vector<8x384xf32>
    %333 = tpu.matmul %331, %242, %cst_52 {dimension_numbers = #tpu.dot_dimension_numbers<[1], [0], [0], [1], [0, 0, 1, 1], [], []>} : vector<8x128xf32>, vector<128x384xf32>, vector<8x384xf32> -> vector<8x384xf32>
    %334 = vector.extract_strided_slice %332 {offsets = [0, 0], sizes = [8, 128], strides = [1, 1]} : vector<8x384xf32> to vector<8x128xf32>
    %335 = vector.extract_strided_slice %333 {offsets = [0, 0], sizes = [8, 128], strides = [1, 1]} : vector<8x384xf32> to vector<8x128xf32>
    %336 = arith.addf %334, %335 : vector<8x128xf32>
    %337 = arith.negf %336 : vector<8x128xf32>
    %338 = math.exp %337 : vector<8x128xf32>
    %cst_53 = arith.constant 1.000000e+00 : f32
    %339 = vector.broadcast %cst_53 : f32 to vector<8x128xf32>
    %340 = arith.addf %339, %338 : vector<8x128xf32>
    %341 = arith.divf %339, %340 : vector<8x128xf32>
    %342 = vector.extract_strided_slice %332 {offsets = [0, 128], sizes = [8, 128], strides = [1, 1]} : vector<8x384xf32> to vector<8x128xf32>
    %343 = vector.extract_strided_slice %333 {offsets = [0, 128], sizes = [8, 128], strides = [1, 1]} : vector<8x384xf32> to vector<8x128xf32>
    %344 = arith.addf %342, %343 : vector<8x128xf32>
    %345 = arith.negf %344 : vector<8x128xf32>
    %346 = math.exp %345 : vector<8x128xf32>
    %cst_54 = arith.constant 1.000000e+00 : f32
    %347 = vector.broadcast %cst_54 : f32 to vector<8x128xf32>
    %348 = arith.addf %347, %346 : vector<8x128xf32>
    %349 = arith.divf %347, %348 : vector<8x128xf32>
    %350 = vector.extract_strided_slice %332 {offsets = [0, 256], sizes = [8, 128], strides = [1, 1]} : vector<8x384xf32> to vector<8x128xf32>
    %351 = vector.extract_strided_slice %333 {offsets = [0, 256], sizes = [8, 128], strides = [1, 1]} : vector<8x384xf32> to vector<8x128xf32>
    %352 = vector.broadcast %243 : vector<1x128xf32> to vector<8x128xf32>
    %353 = arith.addf %351, %352 : vector<8x128xf32>
    %354 = arith.mulf %341, %353 : vector<8x128xf32>
    %355 = arith.addf %350, %354 : vector<8x128xf32>
    %356 = math.tanh %355 : vector<8x128xf32>
    %357 = arith.subf %331, %356 : vector<8x128xf32>
    %358 = arith.mulf %349, %357 : vector<8x128xf32>
    %359 = arith.addf %356, %358 : vector<8x128xf32>
    %360 = vector.extract_strided_slice %246 {offsets = [32, 0], sizes = [8, 384], strides = [1, 1]} : vector<64x384xf32> to vector<8x384xf32>
    %cst_55 = arith.constant dense<0.000000e+00> : vector<8x384xf32>
    %361 = tpu.matmul %359, %242, %cst_55 {dimension_numbers = #tpu.dot_dimension_numbers<[1], [0], [0], [1], [0, 0, 1, 1], [], []>} : vector<8x128xf32>, vector<128x384xf32>, vector<8x384xf32> -> vector<8x384xf32>
    %362 = vector.extract_strided_slice %360 {offsets = [0, 0], sizes = [8, 128], strides = [1, 1]} : vector<8x384xf32> to vector<8x128xf32>
    %363 = vector.extract_strided_slice %361 {offsets = [0, 0], sizes = [8, 128], strides = [1, 1]} : vector<8x384xf32> to vector<8x128xf32>
    %364 = arith.addf %362, %363 : vector<8x128xf32>
    %365 = arith.negf %364 : vector<8x128xf32>
    %366 = math.exp %365 : vector<8x128xf32>
    %cst_56 = arith.constant 1.000000e+00 : f32
    %367 = vector.broadcast %cst_56 : f32 to vector<8x128xf32>
    %368 = arith.addf %367, %366 : vector<8x128xf32>
    %369 = arith.divf %367, %368 : vector<8x128xf32>
    %370 = vector.extract_strided_slice %360 {offsets = [0, 128], sizes = [8, 128], strides = [1, 1]} : vector<8x384xf32> to vector<8x128xf32>
    %371 = vector.extract_strided_slice %361 {offsets = [0, 128], sizes = [8, 128], strides = [1, 1]} : vector<8x384xf32> to vector<8x128xf32>
    %372 = arith.addf %370, %371 : vector<8x128xf32>
    %373 = arith.negf %372 : vector<8x128xf32>
    %374 = math.exp %373 : vector<8x128xf32>
    %cst_57 = arith.constant 1.000000e+00 : f32
    %375 = vector.broadcast %cst_57 : f32 to vector<8x128xf32>
    %376 = arith.addf %375, %374 : vector<8x128xf32>
    %377 = arith.divf %375, %376 : vector<8x128xf32>
    %378 = vector.extract_strided_slice %360 {offsets = [0, 256], sizes = [8, 128], strides = [1, 1]} : vector<8x384xf32> to vector<8x128xf32>
    %379 = vector.extract_strided_slice %361 {offsets = [0, 256], sizes = [8, 128], strides = [1, 1]} : vector<8x384xf32> to vector<8x128xf32>
    %380 = vector.broadcast %243 : vector<1x128xf32> to vector<8x128xf32>
    %381 = arith.addf %379, %380 : vector<8x128xf32>
    %382 = arith.mulf %369, %381 : vector<8x128xf32>
    %383 = arith.addf %378, %382 : vector<8x128xf32>
    %384 = math.tanh %383 : vector<8x128xf32>
    %385 = arith.subf %359, %384 : vector<8x128xf32>
    %386 = arith.mulf %377, %385 : vector<8x128xf32>
    %387 = arith.addf %384, %386 : vector<8x128xf32>
    %388 = vector.extract_strided_slice %246 {offsets = [40, 0], sizes = [8, 384], strides = [1, 1]} : vector<64x384xf32> to vector<8x384xf32>
    %cst_58 = arith.constant dense<0.000000e+00> : vector<8x384xf32>
    %389 = tpu.matmul %387, %242, %cst_58 {dimension_numbers = #tpu.dot_dimension_numbers<[1], [0], [0], [1], [0, 0, 1, 1], [], []>} : vector<8x128xf32>, vector<128x384xf32>, vector<8x384xf32> -> vector<8x384xf32>
    %390 = vector.extract_strided_slice %388 {offsets = [0, 0], sizes = [8, 128], strides = [1, 1]} : vector<8x384xf32> to vector<8x128xf32>
    %391 = vector.extract_strided_slice %389 {offsets = [0, 0], sizes = [8, 128], strides = [1, 1]} : vector<8x384xf32> to vector<8x128xf32>
    %392 = arith.addf %390, %391 : vector<8x128xf32>
    %393 = arith.negf %392 : vector<8x128xf32>
    %394 = math.exp %393 : vector<8x128xf32>
    %cst_59 = arith.constant 1.000000e+00 : f32
    %395 = vector.broadcast %cst_59 : f32 to vector<8x128xf32>
    %396 = arith.addf %395, %394 : vector<8x128xf32>
    %397 = arith.divf %395, %396 : vector<8x128xf32>
    %398 = vector.extract_strided_slice %388 {offsets = [0, 128], sizes = [8, 128], strides = [1, 1]} : vector<8x384xf32> to vector<8x128xf32>
    %399 = vector.extract_strided_slice %389 {offsets = [0, 128], sizes = [8, 128], strides = [1, 1]} : vector<8x384xf32> to vector<8x128xf32>
    %400 = arith.addf %398, %399 : vector<8x128xf32>
    %401 = arith.negf %400 : vector<8x128xf32>
    %402 = math.exp %401 : vector<8x128xf32>
    %cst_60 = arith.constant 1.000000e+00 : f32
    %403 = vector.broadcast %cst_60 : f32 to vector<8x128xf32>
    %404 = arith.addf %403, %402 : vector<8x128xf32>
    %405 = arith.divf %403, %404 : vector<8x128xf32>
    %406 = vector.extract_strided_slice %388 {offsets = [0, 256], sizes = [8, 128], strides = [1, 1]} : vector<8x384xf32> to vector<8x128xf32>
    %407 = vector.extract_strided_slice %389 {offsets = [0, 256], sizes = [8, 128], strides = [1, 1]} : vector<8x384xf32> to vector<8x128xf32>
    %408 = vector.broadcast %243 : vector<1x128xf32> to vector<8x128xf32>
    %409 = arith.addf %407, %408 : vector<8x128xf32>
    %410 = arith.mulf %397, %409 : vector<8x128xf32>
    %411 = arith.addf %406, %410 : vector<8x128xf32>
    %412 = math.tanh %411 : vector<8x128xf32>
    %413 = arith.subf %387, %412 : vector<8x128xf32>
    %414 = arith.mulf %405, %413 : vector<8x128xf32>
    %415 = arith.addf %412, %414 : vector<8x128xf32>
    %416 = vector.extract_strided_slice %246 {offsets = [48, 0], sizes = [8, 384], strides = [1, 1]} : vector<64x384xf32> to vector<8x384xf32>
    %cst_61 = arith.constant dense<0.000000e+00> : vector<8x384xf32>
    %417 = tpu.matmul %415, %242, %cst_61 {dimension_numbers = #tpu.dot_dimension_numbers<[1], [0], [0], [1], [0, 0, 1, 1], [], []>} : vector<8x128xf32>, vector<128x384xf32>, vector<8x384xf32> -> vector<8x384xf32>
    %418 = vector.extract_strided_slice %416 {offsets = [0, 0], sizes = [8, 128], strides = [1, 1]} : vector<8x384xf32> to vector<8x128xf32>
    %419 = vector.extract_strided_slice %417 {offsets = [0, 0], sizes = [8, 128], strides = [1, 1]} : vector<8x384xf32> to vector<8x128xf32>
    %420 = arith.addf %418, %419 : vector<8x128xf32>
    %421 = arith.negf %420 : vector<8x128xf32>
    %422 = math.exp %421 : vector<8x128xf32>
    %cst_62 = arith.constant 1.000000e+00 : f32
    %423 = vector.broadcast %cst_62 : f32 to vector<8x128xf32>
    %424 = arith.addf %423, %422 : vector<8x128xf32>
    %425 = arith.divf %423, %424 : vector<8x128xf32>
    %426 = vector.extract_strided_slice %416 {offsets = [0, 128], sizes = [8, 128], strides = [1, 1]} : vector<8x384xf32> to vector<8x128xf32>
    %427 = vector.extract_strided_slice %417 {offsets = [0, 128], sizes = [8, 128], strides = [1, 1]} : vector<8x384xf32> to vector<8x128xf32>
    %428 = arith.addf %426, %427 : vector<8x128xf32>
    %429 = arith.negf %428 : vector<8x128xf32>
    %430 = math.exp %429 : vector<8x128xf32>
    %cst_63 = arith.constant 1.000000e+00 : f32
    %431 = vector.broadcast %cst_63 : f32 to vector<8x128xf32>
    %432 = arith.addf %431, %430 : vector<8x128xf32>
    %433 = arith.divf %431, %432 : vector<8x128xf32>
    %434 = vector.extract_strided_slice %416 {offsets = [0, 256], sizes = [8, 128], strides = [1, 1]} : vector<8x384xf32> to vector<8x128xf32>
    %435 = vector.extract_strided_slice %417 {offsets = [0, 256], sizes = [8, 128], strides = [1, 1]} : vector<8x384xf32> to vector<8x128xf32>
    %436 = vector.broadcast %243 : vector<1x128xf32> to vector<8x128xf32>
    %437 = arith.addf %435, %436 : vector<8x128xf32>
    %438 = arith.mulf %425, %437 : vector<8x128xf32>
    %439 = arith.addf %434, %438 : vector<8x128xf32>
    %440 = math.tanh %439 : vector<8x128xf32>
    %441 = arith.subf %415, %440 : vector<8x128xf32>
    %442 = arith.mulf %433, %441 : vector<8x128xf32>
    %443 = arith.addf %440, %442 : vector<8x128xf32>
    %444 = vector.extract_strided_slice %246 {offsets = [56, 0], sizes = [8, 384], strides = [1, 1]} : vector<64x384xf32> to vector<8x384xf32>
    %cst_64 = arith.constant dense<0.000000e+00> : vector<8x384xf32>
    %445 = tpu.matmul %443, %242, %cst_64 {dimension_numbers = #tpu.dot_dimension_numbers<[1], [0], [0], [1], [0, 0, 1, 1], [], []>} : vector<8x128xf32>, vector<128x384xf32>, vector<8x384xf32> -> vector<8x384xf32>
    %446 = vector.extract_strided_slice %444 {offsets = [0, 0], sizes = [8, 128], strides = [1, 1]} : vector<8x384xf32> to vector<8x128xf32>
    %447 = vector.extract_strided_slice %445 {offsets = [0, 0], sizes = [8, 128], strides = [1, 1]} : vector<8x384xf32> to vector<8x128xf32>
    %448 = arith.addf %446, %447 : vector<8x128xf32>
    %449 = arith.negf %448 : vector<8x128xf32>
    %450 = math.exp %449 : vector<8x128xf32>
    %cst_65 = arith.constant 1.000000e+00 : f32
    %451 = vector.broadcast %cst_65 : f32 to vector<8x128xf32>
    %452 = arith.addf %451, %450 : vector<8x128xf32>
    %453 = arith.divf %451, %452 : vector<8x128xf32>
    %454 = vector.extract_strided_slice %444 {offsets = [0, 128], sizes = [8, 128], strides = [1, 1]} : vector<8x384xf32> to vector<8x128xf32>
    %455 = vector.extract_strided_slice %445 {offsets = [0, 128], sizes = [8, 128], strides = [1, 1]} : vector<8x384xf32> to vector<8x128xf32>
    %456 = arith.addf %454, %455 : vector<8x128xf32>
    %457 = arith.negf %456 : vector<8x128xf32>
    %458 = math.exp %457 : vector<8x128xf32>
    %cst_66 = arith.constant 1.000000e+00 : f32
    %459 = vector.broadcast %cst_66 : f32 to vector<8x128xf32>
    %460 = arith.addf %459, %458 : vector<8x128xf32>
    %461 = arith.divf %459, %460 : vector<8x128xf32>
    %462 = vector.extract_strided_slice %444 {offsets = [0, 256], sizes = [8, 128], strides = [1, 1]} : vector<8x384xf32> to vector<8x128xf32>
    %463 = vector.extract_strided_slice %445 {offsets = [0, 256], sizes = [8, 128], strides = [1, 1]} : vector<8x384xf32> to vector<8x128xf32>
    %464 = vector.broadcast %243 : vector<1x128xf32> to vector<8x128xf32>
    %465 = arith.addf %463, %464 : vector<8x128xf32>
    %466 = arith.mulf %453, %465 : vector<8x128xf32>
    %467 = arith.addf %462, %466 : vector<8x128xf32>
    %468 = math.tanh %467 : vector<8x128xf32>
    %469 = arith.subf %443, %468 : vector<8x128xf32>
    %470 = arith.mulf %461, %469 : vector<8x128xf32>
    %471 = arith.addf %468, %470 : vector<8x128xf32>
    %c8_67 = arith.constant 8 : index
    %c0_68 = arith.constant 0 : index
    %472 = vector.load %arg4[%c8_67, %c0_68] : memref<16x128xf32, #tpu.memory_space<vmem>>, vector<8x128xf32>
    tpu.vector_store %arg4[%c8_67, %c0_68], %471 {strides = array<i32>} : memref<16x128xf32, #tpu.memory_space<vmem>>, vector<8x128xf32>,
    %473 = tpu.concatenate %275, %303, %331, %359, %387, %415, %443, %471 in 0 : vector<8x128xf32>, vector<8x128xf32>, vector<8x128xf32>, vector<8x128xf32>, vector<8x128xf32>, vector<8x128xf32>, vector<8x128xf32>, vector<8x128xf32> -> vector<64x128xf32>
    %c464 = arith.constant 464 : index
    %c0_69 = arith.constant 0 : index
    %474 = vector.load %arg2[%c464, %c0_69] : memref<600x384xf32, #tpu.memory_space<vmem>>, vector<128x4xf32>
    %c592 = arith.constant 592 : index
    %c0_70 = arith.constant 0 : index
    %475 = vector.load %arg2[%c592, %c0_70] : memref<600x384xf32, #tpu.memory_space<vmem>>, vector<1x4xf32>
    %cst_71 = arith.constant dense<0.000000e+00> : vector<64x4xf32>
    %476 = tpu.matmul %473, %474, %cst_71 {dimension_numbers = #tpu.dot_dimension_numbers<[1], [0], [0], [1], [0, 0, 1, 1], [], []>} : vector<64x128xf32>, vector<128x4xf32>, vector<64x4xf32> -> vector<64x4xf32>
    %477 = vector.broadcast %475 : vector<1x4xf32> to vector<64x4xf32>
    %478 = arith.addf %476, %477 : vector<64x4xf32>
    %c0_72 = arith.constant 0 : index
    %c0_73 = arith.constant 0 : index
    %479 = vector.load %arg3[%c0_72, %c0_73] : memref<64x4xf32, #tpu.memory_space<vmem>>, vector<64x4xf32>
    tpu.vector_store %arg3[%c0_72, %c0_73], %478 {strides = array<i32>} : memref<64x4xf32, #tpu.memory_space<vmem>>, vector<64x4xf32>,
    return
  }
}

</mosaic_0001>

<bundles_post_ra>
// kernel: _lambda_.1
= control target key start
LH: loop header
LB: loop body
LE: loop exit
PB: predicated region body
PF: predicated region fallthrough
CT: control target
= control target key end

     0   :  { %10 = vsyncpa [#allocation3], 0  ;;  %s5897_s15 = smov [#allocation2]   ;;  %s6946_s0 = inlined_call_operand.vmem [shape: f32[64,16], index: 0, kind: input, shape index: {}]   ;;  %s6947_s1 = inlined_call_operand.vmem [shape: f32[16,128], index: 1, kind: input, shape index: {}, may-alias: {1,4}]   ;;  %s6948_s2 = inlined_call_operand.hbm [shape: f32[600,384], index: 2, kind: input, shape index: {}]   ;;  %s6949_s3 = inlined_call_operand.vmem [shape: f32[64,4], index: 3, kind: output, shape index: {0}]   ;;  %s6950_s4 = inlined_call_operand.vmem [shape: f32[16,128], index: 4, kind: output, shape index: {1}, may-alias: {1,4}]  }
   0x1   :  { %s20_s16 = sshll.u32 %s5897_s15, 4  ;;  %s5873_s19 = scalar_lea.hbm %s6948_s2, 28800  ;;  %s21_s16 = int_to_ptr.vmem [resolvable:$true] %s20_s16 }
   0x2   :  { %p5874_p0 = scmp.ne.s32.totalorder %s6948_s2, %s5873_s19  ;;  %p5877_p1 = scmp.lt.u32.totalorder %s5873_s19, %s6948_s2 }
   0x4   :  { %p5879_p2 = pnand %p5877_p1, %p5874_p0 }
   0x6   :  { %5882 = shalt.err (!%p5879_p2)
}
   0x7   :  { %s5883_s24 = scalar_lea.vmem %s21_s16, 28800  ;;  %p5888_p4 = scmp.lt.s32.totalorder %s21_s16, %s21_s16 }
   0x8   :  { %p5884_p3 = scmp.ne.s32.totalorder %s21_s16, %s5883_s24  ;;  %p5889_p5 = scmp.lt.s32.totalorder %s5883_s24, %s5883_s24 }
   0xa   :  { %p5890_p6 = por %p5889_p5, %p5888_p4 }
   0xc   :  { %p5891_p7 = pnand %p5890_p6, %p5884_p3 }
   0xe   :  { %5894 = shalt.err (!%p5891_p7)
}
   0xf   :  { %s5898_s25 = smov 384   ;;  %s5899_s26 = smov 24  }
  0x10   :  { %26 = dma.hbm_to_vmem [thread:$0]  %s6948_s2, 28800, %s21_s16, [#allocation3], %s5898_s25, %s5898_s25, %s5899_s26  }
  0x11   :  { %5895 = dma.done.wait [#allocation3], 28800  }
  0x12   :  { %5896 = vsyncadd [#allocation3], 4294938496  ;;  %vm41_vm0 = vcmask 130048   ;;  %v30_v0 = vld [vmem:[#allocation2] sm:$0xff]  ;;  %v31_v1 = vld [vmem:[#allocation2 + $0x18] sm:$0xff]  ;;  %v5900_v26 = vmov 0.0  }
  0x13   :  { %v33_v2 = vld [vmem:[%s6946_s0] sm:$0xff]  ;;  %v4638_v3 = vpack.c.bf16 %v31_v1, %v30_v0  ;;  %v34_v4 = vld [vmem:[%s6946_s0 + $0x8] sm:$0xff]  ;;  %v172_v5 = vld [vmem:[#allocation2 + $0x50] sm:$0xff]  ;;  %336 = vmatprep.mubr.f32.mxu1 %v5900_v26  ;;  %v5901_v27 = vmov 0.0|0.0   ;;  %vm247_vm1 = vcmask 195584   ;;  %vm5902_vm2 = vmmov 0  }
  0x14   :  { %3960 = vmatprep.mubr.msk.f32.mxu0 %vm41_vm0, %v33_v2  ;;  %v175_v6 = vld [vmem:[#allocation2 + $0x68] sm:$0xff]  ;;  %v174_v9 = vld [vmem:[#allocation2 + $0x60] sm:$0xff]  ;;  %v173_v10 = vld [vmem:[#allocation2 + $0x58] sm:$0xff]  ;;  %vm3541_vm3 = vcmask 31744  }
  0x15   :  { %4639 = vmatprep.subr.bf16.mxu0 %v4638_v3  ;;  %v4642_v7 = vpack.c.bf16 %v175_v6, %v172_v5  ;;  %v171_v8 = vld [vmem:[#allocation2 + $0x48] sm:$0xff]  ;;  %v35_v11 = vld [vmem:[%s6946_s0 + $0x10] sm:$0xff]  ;;  %v36_v15 = vld [vmem:[%s6946_s0 + $0x18] sm:$0xff] }
  0x16   :  { %4641 = vmatpush3.bf16.msra.mxu0 %v4638_v3  ;;  %v4644_v12 = vpack.c.bf16 %v174_v9, %v171_v8  ;;  %v176_v13 = vld [vmem:[#allocation2 + $0x70] sm:$0xff]  ;;  %v37_v16 = vld [vmem:[%s6946_s0 + $0x20] sm:$0xff]  ;;  %v38_v17 = vld [vmem:[%s6946_s0 + $0x28] sm:$0xff] }
  0x17   :  { %4643 = vmatprep.subr.bf16.mxu1 %v4642_v7  ;;  %v4646_v14 = vpack.c.bf16 %v176_v13, %v173_v10  ;;  %v39_v18 = vld [vmem:[%s6946_s0 + $0x30] sm:$0xff]  ;;  %v40_v19 = vld [vmem:[%s6946_s0 + $0x38] sm:$0xff]  ;;  %v178_v20 = vld [vmem:[#allocation2 + $0x80] sm:$0xff] }
  0x18   :  { %4645 = vmatpush1.bf16.msra.mxu1 %v4644_v12  ;;  %v183_v21 = vld [vmem:[#allocation2 + $0xb0] sm:$0xff]  ;;  %v186_v22 = vld [vmem:[#allocation2 + $0xc8] sm:$0xff]  ;;  %v177_v23 = vld [vmem:[#allocation2 + $0x78] sm:$0xff] }
  0x19   :  { %3961 = vmatmul.mubr.msk.f32.vlgmr.msra.gmra.mrb[0].mxu0 %vm41_vm0, %v34_v4  ;;  %4647 = vmatprep.subr.bf16.mxu0 %v4646_v14  ;;  %v179_v24 = vld [vmem:[#allocation2 + $0x88] sm:$0xff]  ;;  %v5972_v25 = vpack.c.bf16 %v186_v22, %v183_v21  ;;  %v185_v29 = vld [vmem:[#allocation2 + $0xc0] sm:$0xff]  ;;  %v5977_v30 = vld [vmem:[#allocation2 + $0x30] ss:$0 sm:$0xff] }
  0x1a   :  { %3963 = vmatprep.mubr.msk.f32.mxu0 %vm41_vm0, %v35_v11  ;;  %4649 = vmatpush3.bf16.msra.mxu0 %v4646_v14  ;;  %v182_v28 = vld [vmem:[#allocation2 + $0xa8] sm:$0xff]  ;;  %v189_v31 = vld [vmem:[#allocation2 + $0xe0] sm:$0xff]  ;;  %v192_v32 = vld [vmem:[#allocation2 + $0xf8] sm:$0xff] }
  0x1b   :  { %276 = vmatprep.subr.mxu1 %v178_v20  ;;  %3976 = vmatprep.subr.mxu0 %v179_v24  ;;  %v184_v34 = vld [vmem:[#allocation2 + $0xb8] sm:$0xff]  ;;  %v187_v35 = vld [vmem:[#allocation2 + $0xd0] sm:$0xff]  ;;  %v5979_v37 = vpack.c.bf16 %v185_v29, %v182_v28  ;;  %v5982_v39 = vpack.c.bf16 %v192_v32, %v189_v31  ;;  %v198_v44 = vld [vmem:[#allocation2 + $0x128] sm:$0xff] }
  0x1c   :  { %277 = vmatpush1.msra.mxu1 %v177_v23  ;;  %v188_v40 = vld [vmem:[#allocation2 + $0xd8] sm:$0xff]  ;;  %v191_v41 = vld [vmem:[#allocation2 + $0xf0] sm:$0xff]  ;;  %v5985_v45 = vpack.c.bf16 %v187_v35, %v184_v34  ;;  %v194_v52 = vld [vmem:[#allocation2 + $0x108] sm:$0xff] }
  0x1d   :  { %3964 = vmatmul.mubr.msk.f32.gmra.mrb[2].mxu0 %vm41_vm0, %v36_v15  ;;  %4651 = vmatprep.subr.bf16.mxu1 %v5972_v25  ;;  %v195_v43 = vld [vmem:[#allocation2 + $0x110] sm:$0xff]  ;;  %v5992_v49 = vpack.c.bf16 %v191_v41, %v188_v40  ;;  %v197_v53 = vld [vmem:[#allocation2 + $0x120] sm:$0xff]  ;;  %v204_v55 = vld [vmem:[#allocation2 + $0x158] sm:$0xff] }
  0x1e   :  { %3966 = vmatprep.mubr.msk.f32.mxu0 %vm41_vm0, %v37_v16  ;;  %3977 = vmatpush3.msra.mxu0 %v179_v24  ;;  %v5997_v51 = vpack.c.bf16 %v198_v44, %v195_v43  ;;  %v201_v54 = vld [vmem:[#allocation2 + $0x140] sm:$0xff]  ;;  %v190_v57 = vld [vmem:[#allocation2 + $0xe8] sm:$0xff]  ;;  %v6004_v59 = vpack.c.bf16 %v197_v53, %v194_v52  ;;  %v200_v0 = vld [vmem:[#allocation2 + $0x138] sm:$0xff] }
  0x1f   :  { %4682 = vmatprep.subr.bf16.mxu0 %v5901_v27  ;;  %v193_v58 = vld [vmem:[#allocation2 + $0x100] sm:$0xff]  ;;  %v6010_v63 = vpack.c.bf16 %v204_v55, %v201_v54  ;;  %v203_v1 = vld [vmem:[#allocation2 + $0x150] sm:$0xff]  ;;  %v210_v3 = vld [vmem:[#allocation2 + $0x188] sm:$0xff] }
  0x20   :  { %v207_v2 = vld [vmem:[#allocation2 + $0x170] sm:$0xff]  ;;  %v6013_v4 = vpack.c.bf16 %v193_v58, %v190_v57  ;;  %v6019_v6 = vpack.c.bf16 %v203_v1, %v200_v0  ;;  %v196_v8 = vld [vmem:[#allocation2 + $0x118] sm:$0xff]  ;;  %v206_v11 = vld [vmem:[#allocation2 + $0x168] sm:$0xff] }
  0x21   :  { %3967 = vmatmul.mubr.msk.f32.gmra.mrb[4].mxu0 %vm41_vm0, %v38_v17  ;;  %v199_v9 = vld [vmem:[#allocation2 + $0x130] sm:$0xff]  ;;  %v6023_v10 = vpack.c.bf16 %v210_v3, %v207_v2  ;;  %v209_v12 = vld [vmem:[#allocation2 + $0x180] sm:$0xff]  ;;  %v216_v16 = vld [vmem:[#allocation2 + $0x1b8] sm:$0xff] }
  0x22   :  { %3969 = vmatprep.mubr.msk.f32.mxu0 %vm41_vm0, %v39_v18  ;;  %v213_v15 = vld [vmem:[#allocation2 + $0x1a0] sm:$0xff]  ;;  %v6030_v17 = vpack.c.bf16 %v199_v9, %v196_v8  ;;  %v6034_v18 = vpack.c.bf16 %v209_v12, %v206_v11  ;;  %v212_v22 = vld [vmem:[#allocation2 + $0x198] sm:$0xff]  ;;  %v215_v23 = vld [vmem:[#allocation2 + $0x1b0] sm:$0xff] }
  0x23   :  { %v205_v20 = vld [vmem:[#allocation2 + $0x160] sm:$0xff]  ;;  %v6037_v21 = vpack.c.bf16 %v216_v16, %v213_v15  ;;  %v219_v24 = vld [vmem:[#allocation2 + $0x1d0] sm:$0xff]  ;;  %v222_v28 = vld [vmem:[#allocation2 + $0x1e8] sm:$0xff] }
  0x24   :  { %v208_v31 = vld [vmem:[#allocation2 + $0x178] sm:$0xff]  ;;  %v211_v32 = vld [vmem:[#allocation2 + $0x190] sm:$0xff]  ;;  %v218_v34 = vld [vmem:[#allocation2 + $0x1c8] sm:$0xff] }
  0x25   :  { %3970 = vmatmul.mubr.msk.f32.gmra.mrb[6].mxu0 %vm41_vm0, %v40_v19  ;;  %v202_v19 = vld [vmem:[#allocation2 + $0x148] sm:$0xff]  ;;  %v221_v35 = vld [vmem:[#allocation2 + $0x1e0] sm:$0xff]  ;;  %v6057_v40 = vpack.c.bf16 %v211_v32, %v208_v31  ;;  %v220_v52 = vld [vmem:[#allocation2 + $0x1d8] sm:$0xff] }
  0x26   :  { %v6045_v29 = vpack.c.bf16 %v205_v20, %v202_v19  ;;  %v6061_v41 = vpack.c.bf16 %v221_v35, %v218_v34  ;;  %v217_v43 = vld [vmem:[#allocation2 + $0x1c0] sm:$0xff]  ;;  %v223_v53 = vld [vmem:[#allocation2 + $0x1f0] sm:$0xff] }
  0x27   :  { %v6079_v54 = vpack.c.bf16 %v223_v53, %v220_v52  ;;  %v6086_v55 = vld [vmem:[%s6947_s1] sm:$0xff]  ;;  %v6164_v53 = vld [vmem:[#allocation2 + $0x228] ss:$0 sm:$0xff] }
  0x28   :  { %v229_v57 = vld [vmem:[#allocation2 + $0x220] sm:$0xff] }
  0x29   :  { %v181_v0 = vld [vmem:[#allocation2 + $0x90] ss:$8 sm:$0x7] }
  0xec   :  { %v3962_v33 = vpop.f32.mrb[0].mxu0 }
  0xed   :  { %v132_v36 = vpop.f32.mrb[1].mxu0  ;;  %v138_v42 = vadd.f32 %v3962_v33, %v5977_v30  ;;  %v6052_v33 = vpack.c.bf16 %v222_v28, %v219_v24 }
  0xee   :  { %v133_v38 = vadd.f32 %v132_v36, %v5977_v30  ;;  %v225_v36 = vld [vmem:[#allocation2 + $0x200] sm:$0xff] }
  0xf0   :  { %3567 = vmatmul.mubr.msk.f32.vlgmr.msra.gmra.mrb[0].mxu1 %vm247_vm1, %v133_v38  ;;  %3978 = vmatprep.mubr.msk.f32.mxu0 %vm247_vm1, %v133_v38  ;;  %v3965_v46 = vpop.f32.mrb[2].mxu0  ;;  %v228_v38 = vld [vmem:[#allocation2 + $0x218] sm:$0xff] }
  0xf1   :  { %4653 = vmatpush1.bf16.msra.mxu1 %v5979_v37  ;;  %v148_v47 = vadd.f32 %v3965_v46, %v5977_v30  ;;  %3979 = vmatmul.mubr.msk.f32.vlgmr.msra.gmra.mrb[8].mxu0 %vm247_vm1, %v138_v42  ;;  %v142_v48 = vpop.f32.mrb[3].mxu0  ;;  %v6064_v44 = vpack.c.bf16 %v228_v38, %v225_v36  ;;  %v224_v46 = vld [vmem:[#allocation2 + $0x1f8] sm:$0xff] }
  0xf2   :  { %v143_v50 = vadd.f32 %v142_v48, %v5977_v30  ;;  %342 = vmatprep.mubr.f32.mxu1 %v5900_v26  ;;  %4655 = vmatprep.subr.bf16.mxu1 %v5982_v39 }
  0xf3   :  { %4684 = vmatpush3.bf16.msra.mxu0 %v5985_v45 }
  0xf4   :  { %3568 = vmatmul.mubr.msk.f32.gmra.mrb[2].mxu1 %vm247_vm1, %v138_v42  ;;  %3981 = vmatprep.mubr.msk.f32.mxu0 %vm247_vm1, %v143_v50  ;;  %v3968_v56 = vpop.f32.mrb[4].mxu0  ;;  %v214_v42 = vld [vmem:[#allocation2 + $0x1a8] sm:$0xff] }
  0xf5   :  { %4657 = vmatpush1.bf16.msra.mxu1 %v5992_v49  ;;  %3982 = vmatmul.mubr.msk.f32.gmra.mrb[10].mxu0 %vm247_vm1, %v148_v47  ;;  %v152_v60 = vpop.f32.mrb[5].mxu0  ;;  %v158_v61 = vadd.f32 %v3968_v56, %v5977_v30  ;;  %v6069_v48 = vpack.c.bf16 %v217_v43, %v214_v42  ;;  %v226_v56 = vld [vmem:[#allocation2 + $0x208] sm:$0xff] }
  0xf6   :  { %348 = vmatprep.mubr.f32.mxu1 %v5900_v26  ;;  %4659 = vmatprep.subr.bf16.mxu1 %v5997_v51  ;;  %v153_v62 = vadd.f32 %v152_v60, %v5977_v30  ;;  %v6092_v58 = vpack.c.bf16 %v229_v57, %v226_v56  ;;  %v232_v60 = vlaneseq }
  0xf7   :  { %4685 = vmatprep.subr.bf16.mxu0 %v5901_v27 }
  0xf8   :  { %3569 = vmatmul.mubr.msk.f32.gmra.mrb[4].mxu1 %vm247_vm1, %v143_v50  ;;  %3984 = vmatprep.mubr.msk.f32.mxu0 %vm247_vm1, %v153_v62  ;;  %v3971_v5 = vpop.f32.mrb[6].mxu0 }
  0xf9   :  { %4661 = vmatpush1.bf16.msra.mxu1 %v6004_v59  ;;  %354 = vmatprep.mubr.f32.mxu1 %v5900_v26  ;;  %v162_v7 = vpop.f32.mrb[7].mxu0  ;;  %v168_v13 = vadd.f32 %v3971_v5, %v5977_v30 }
  0xfa   :  { %4663 = vmatprep.subr.bf16.mxu1 %v6010_v63  ;;  %3985 = vmatmul.mubr.msk.f32.gmra.mrb[12].mxu0 %vm247_vm1, %v158_v61  ;;  %v163_v14 = vadd.f32 %v162_v7, %v5977_v30  ;;  %v6049_v30 = vpack.c.bf16 %v215_v23, %v212_v22 }
  0xfb   :  { %4687 = vmatpush3.bf16.msra.mxu0 %v6013_v4 }
  0xfc   :  { %3570 = vmatmul.mubr.msk.f32.gmra.mrb[6].mxu1 %vm247_vm1, %v148_v47  ;;  %3987 = vmatprep.mubr.msk.f32.mxu0 %vm247_vm1, %v163_v14  ;;  %v227_v47 = vld [vmem:[#allocation2 + $0x210] sm:$0xff] }
  0xfd   :  { %4665 = vmatpush1.bf16.msra.mxu1 %v6019_v6  ;;  %360 = vmatprep.mubr.f32.mxu1 %v5900_v26  ;;  %v6073_v50 = vpack.c.bf16 %v227_v47, %v224_v46 }
  0xfe   :  { %4667 = vmatprep.subr.bf16.mxu1 %v6023_v10  ;;  %3988 = vmatmul.mubr.msk.f32.gmra.mrb[14].mxu0 %vm247_vm1, %v168_v13 }
  0xff   :  { %4688 = vmatprep.subr.bf16.mxu0 %v5901_v27  ;;  %4022 = vmatprep.mubr.msk.f32.mxu0 %vm5902_vm2, %v5900_v26 }
 0x100   :  { %3571 = vmatmul.mubr.msk.f32.gmra.mrb[8].mxu1 %vm247_vm1, %v153_v62  ;;  %4690 = vmatpush3.bf16.msra.mxu0 %v6030_v17 }
 0x101   :  { %4669 = vmatpush1.bf16.msra.mxu1 %v6034_v18  ;;  %366 = vmatprep.mubr.f32.mxu1 %v5900_v26 }
 0x102   :  { %4671 = vmatprep.subr.bf16.mxu1 %v6037_v21  ;;  %4691 = vmatprep.subr.bf16.mxu0 %v5901_v27 }
 0x104   :  { %3572 = vmatmul.mubr.msk.f32.gmra.mrb[10].mxu1 %vm247_vm1, %v158_v61  ;;  %4693 = vmatpush3.bf16.msra.mxu0 %v6045_v29  ;;  %v6133_v61 = vshrl.u32 %v232_v60, 7 }
 0x105   :  { %4673 = vmatpush1.bf16.msra.mxu1 %v6049_v30  ;;  %372 = vmatprep.mubr.f32.mxu1 %v5900_v26 }
 0x106   :  { %4675 = vmatprep.subr.bf16.mxu1 %v6052_v33  ;;  %4694 = vmatprep.subr.bf16.mxu0 %v5901_v27  ;;  %v242_v62 = vsub.s32 2, %v6133_v61  ;;  %v234_v23 = vsub.s32 0, %v6133_v61  ;;  %v238_v32 = vsub.s32 1, %v6133_v61 }
 0x108   :  { %3573 = vmatmul.mubr.msk.f32.gmra.mrb[12].mxu1 %vm247_vm1, %v163_v14  ;;  %4696 = vmatpush3.bf16.msra.mxu0 %v6057_v40  ;;  %v243_v1 = vrot.slane %v181_v0, %v242_v62  ;;  %v6155_v24 = vrot.slane %v181_v0, %v234_v23  ;;  %v6161_v36 = vrot.slane %v181_v0, %v238_v32 }
 0x109   :  { %4677 = vmatpush1.bf16.msra.mxu1 %v6061_v41  ;;  %378 = vmatprep.mubr.f32.mxu1 %v5900_v26 }
 0x10a   :  { %4679 = vmatprep.subr.bf16.mxu1 %v6064_v44  ;;  %4697 = vmatprep.subr.bf16.mxu0 %v5901_v27 }
 0x10c   :  { %3574 = vmatmul.mubr.msk.f32.gmra.mrb[14].mxu1 %vm247_vm1, %v168_v13  ;;  %4699 = vmatpush3.bf16.msra.mxu0 %v6069_v48 }
 0x10d   :  { %4681 = vmatpush1.bf16.msra.mxu1 %v6073_v50  ;;  %555 = vmatprep.mubr.f32.mxu1 %v5900_v26 }
 0x10e   :  { %4700 = vmatprep.subr.bf16.mxu0 %v5901_v27  ;;  %4707 = vmatprep.subr.bf16.mxu1 %v5972_v25 }
 0x110   :  { %556 = vmatmul.mubr.f32.vlgmr.msra.gmra.mrb[0].mxu1 %v6086_v55  ;;  %4702 = vmatpush3.bf16.msra.mxu0 %v6079_v54 }
 0x111   :  { %4703 = vmatprep.subr.bf16.mxu0 %v5901_v27  ;;  %4709 = vmatpush1.bf16.msra.mxu1 %v5979_v37 }
 0x112   :  { %4711 = vmatprep.subr.bf16.mxu1 %v5982_v39  ;;  %717 = vmatprep.mubr.f32.mxu1 %v5900_v26 }
 0x114   :  { %4705 = vmatpush3.bf16.msra.mxu0 %v6092_v58 }
 0x115   :  { %4738 = vmatprep.subr.bf16.mxu0 %v5901_v27  ;;  %4713 = vmatpush1.bf16.msra.mxu1 %v5992_v49 }
 0x116   :  { %4715 = vmatprep.subr.bf16.mxu1 %v5997_v51 }
 0x117   :  { %4023 = vmatmul.mubr.f32.vlgmr.msra.gmra.mrb[16].mxu0 %v6086_v55 }
 0x118   :  { %4740 = vmatpush3.bf16.msra.mxu0 %v5985_v45  ;;  %4057 = vmatprep.mubr.msk.f32.mxu0 %vm5902_vm2, %v5900_v26 }
 0x119   :  { %4741 = vmatprep.subr.bf16.mxu0 %v5901_v27  ;;  %4717 = vmatpush1.bf16.msra.mxu1 %v6004_v59 }
 0x11a   :  { %4719 = vmatprep.subr.bf16.mxu1 %v6010_v63 }
 0x11c   :  { %4743 = vmatpush3.bf16.msra.mxu0 %v6013_v4 }
 0x11d   :  { %4744 = vmatprep.subr.bf16.mxu0 %v5901_v27  ;;  %4721 = vmatpush1.bf16.msra.mxu1 %v6019_v6 }
 0x11e   :  { %4723 = vmatprep.subr.bf16.mxu1 %v6023_v10 }
 0x120   :  { %4746 = vmatpush3.bf16.msra.mxu0 %v6030_v17 }
 0x121   :  { %4747 = vmatprep.subr.bf16.mxu0 %v5901_v27  ;;  %4725 = vmatpush1.bf16.msra.mxu1 %v6034_v18 }
 0x122   :  { %4727 = vmatprep.subr.bf16.mxu1 %v6037_v21 }
 0x124   :  { %4749 = vmatpush3.bf16.msra.mxu0 %v6045_v29 }
 0x125   :  { %4750 = vmatprep.subr.bf16.mxu0 %v5901_v27  ;;  %4729 = vmatpush1.bf16.msra.mxu1 %v6049_v30 }
 0x126   :  { %4731 = vmatprep.subr.bf16.mxu1 %v6052_v33 }
 0x128   :  { %4752 = vmatpush3.bf16.msra.mxu0 %v6057_v40 }
 0x129   :  { %4753 = vmatprep.subr.bf16.mxu0 %v5901_v27  ;;  %4733 = vmatpush1.bf16.msra.mxu1 %v6061_v41 }
 0x12a   :  { %4735 = vmatprep.subr.bf16.mxu1 %v6064_v44 }
 0x12c   :  { %4755 = vmatpush3.bf16.msra.mxu0 %v6069_v48 }
 0x12d   :  { %4756 = vmatprep.subr.bf16.mxu0 %v5901_v27  ;;  %4737 = vmatpush1.bf16.msra.mxu1 %v6073_v50 }
 0x12e   :  { %4763 = vmatprep.subr.bf16.mxu1 %v5972_v25 }
 0x130   :  { %4758 = vmatpush3.bf16.msra.mxu0 %v6079_v54 }
 0x131   :  { %4759 = vmatprep.subr.bf16.mxu0 %v5901_v27 }
 0x134   :  { %4761 = vmatpush3.bf16.msra.mxu0 %v6092_v58 }
 0x135   :  { %4794 = vmatprep.subr.bf16.mxu0 %v5901_v27 }
 0x1c4   :  { %v3980_v2 = vpop.f32.mrb[8].mxu0 }
 0x1c5   :  { %v6138_v3 = vadd.f32 %v3980_v2, %v243_v1  ;;  %v451_v5 = vpop.f32.mrb[9].mxu0 }
 0x1c6   :  { %v452_v2 = vadd.f32 %v451_v5, %v243_v1 }
 0x1c8   :  { %v3983_v7 = vpop.f32.mrb[10].mxu0 }
 0x1c9   :  { %v6140_v8 = vadd.f32 %v3983_v7, %v243_v1  ;;  %v461_v9 = vpop.f32.mrb[11].mxu0 }
 0x1ca   :  { %v6142_v11 = vadd.f32 %v461_v9, %v243_v1 }
 0x1cd   :  { %v3986_v12 = vpop.f32.mrb[12].mxu0 }
 0x1ce   :  { %v6144_v13 = vadd.f32 %v3986_v12, %v243_v1  ;;  %v471_v14 = vpop.f32.mrb[13].mxu0 }
 0x1cf   :  { %v6146_v15 = vadd.f32 %v471_v14, %v243_v1 }
 0x1d1   :  { %v3989_v16 = vpop.f32.mrb[14].mxu0 }
 0x1d2   :  { %v6148_v19 = vadd.f32 %v3989_v16, %v243_v1  ;;  %v481_v20 = vpop.f32.mrb[15].mxu0 }
 0x1d3   :  { %v6150_v22 = vadd.f32 %v481_v20, %v243_v1 }
 0x1e3   :  { %v557_v28 = vpop.f32.mrb[0].mxu1 }
 0x1e4   :  { %v5642_v31 = vadd.f32 %v557_v28, %v6155_v24  ;;  %v559_v34 = vpop.f32.mrb[1].mxu1 }
 0x1e5   :  { %v5643_v43 = vadd.f32 %v559_v34, %v6161_v36 }
 0x1e6   :  { %v3583_v35 = vmul.f32 -1.442695, %v5642_v31 }
 0x1e7   :  { %v3584_v46 = vmul.f32 -1.442695, %v5643_v43 }
 0x1e8   :  { %5712 = vpow2.f32 %v3583_v35 }
 0x1e9   :  { %5714 = vpow2.f32 %v3584_v46 }
 0x1ea   :  { %v628_v38 = vpop.f32.mrb[16].mxu0 }
 0x1eb   :  { %v4024_v42 = vpop.f32.mrb[17].mxu0  ;;  %v646_v56 = vadd.f32 %v628_v38, %v6164_v53 }
 0x1f2   :  { %v5713_v47 = vpop.eup %5712 }
 0x1f3   :  { %v636_v52 = vadd.f32 1.0, %v5713_v47  ;;  %v5715_v57 = vpop.eup %5714 }
 0x1f4   :  { %v643_v9 = vadd.f32 1.0, %v5715_v57 }
 0x1f5   :  { %5716 = vrcp.f32 %v636_v52 }
 0x1ff   :  { %v5717_v60 = vpop.eup %5716 }
 0x200   :  { %v647_v7 = vmul.f32 %v5717_v60, %v646_v56 }
 0x202   :  { %v648_v0 = vadd.f32 %v647_v7, %v452_v2 }
 0x204   :  { %5718 = vtanh.f32 %v648_v0 }
 0x205   :  { %5720 = vrcp.f32 %v643_v9 }
 0x20e   :  { %v5719_v12 = vpop.eup %5718 }
 0x20f   :  { %v650_v14 = vsub.f32 %v6086_v55, %v5719_v12  ;;  %v5721_v16 = vpop.eup %5720 }
 0x211   :  { %v651_v20 = vmul.f32 %v5721_v16, %v650_v14 }
 0x213   :  { %v6168_v28 = vadd.f32 %v5719_v12, %v651_v20 }
 0x215   :  { %718 = vmatmul.mubr.f32.vlgmr.msra.gmra.mrb[2].mxu1 %v6168_v28  ;;  %4058 = vmatmul.mubr.f32.vlgmr.msra.gmra.mrb[18].mxu0 %v6168_v28 }
 0x216   :  { %4765 = vmatpush1.bf16.msra.mxu1 %v5979_v37  ;;  %4796 = vmatpush3.bf16.msra.mxu0 %v5985_v45 }
 0x217   :  { %4767 = vmatprep.subr.bf16.mxu1 %v5982_v39  ;;  %4797 = vmatprep.subr.bf16.mxu0 %v5901_v27 }
 0x218   :  { %879 = vmatprep.mubr.f32.mxu1 %v5900_v26  ;;  %4092 = vmatprep.mubr.msk.f32.mxu0 %vm5902_vm2, %v5900_v26 }
 0x21a   :  { %4769 = vmatpush1.bf16.msra.mxu1 %v5992_v49  ;;  %4799 = vmatpush3.bf16.msra.mxu0 %v6013_v4 }
 0x21b   :  { %4771 = vmatprep.subr.bf16.mxu1 %v5997_v51  ;;  %4800 = vmatprep.subr.bf16.mxu0 %v5901_v27 }
 0x21e   :  { %4773 = vmatpush1.bf16.msra.mxu1 %v6004_v59  ;;  %4802 = vmatpush3.bf16.msra.mxu0 %v6030_v17 }
 0x21f   :  { %4775 = vmatprep.subr.bf16.mxu1 %v6010_v63  ;;  %4803 = vmatprep.subr.bf16.mxu0 %v5901_v27 }
 0x222   :  { %4777 = vmatpush1.bf16.msra.mxu1 %v6019_v6  ;;  %4805 = vmatpush3.bf16.msra.mxu0 %v6045_v29 }
 0x223   :  { %4779 = vmatprep.subr.bf16.mxu1 %v6023_v10  ;;  %4806 = vmatprep.subr.bf16.mxu0 %v5901_v27 }
 0x226   :  { %4781 = vmatpush1.bf16.msra.mxu1 %v6034_v18  ;;  %4808 = vmatpush3.bf16.msra.mxu0 %v6057_v40 }
 0x227   :  { %4783 = vmatprep.subr.bf16.mxu1 %v6037_v21  ;;  %4809 = vmatprep.subr.bf16.mxu0 %v5901_v27 }
 0x22a   :  { %4785 = vmatpush1.bf16.msra.mxu1 %v6049_v30  ;;  %4811 = vmatpush3.bf16.msra.mxu0 %v6069_v48 }
 0x22b   :  { %4787 = vmatprep.subr.bf16.mxu1 %v6052_v33  ;;  %4812 = vmatprep.subr.bf16.mxu0 %v5901_v27 }
 0x22e   :  { %4789 = vmatpush1.bf16.msra.mxu1 %v6061_v41  ;;  %4814 = vmatpush3.bf16.msra.mxu0 %v6079_v54 }
 0x22f   :  { %4791 = vmatprep.subr.bf16.mxu1 %v6064_v44  ;;  %4815 = vmatprep.subr.bf16.mxu0 %v5901_v27 }
 0x232   :  { %4793 = vmatpush1.bf16.msra.mxu1 %v6073_v50  ;;  %4817 = vmatpush3.bf16.msra.mxu0 %v6092_v58 }
 0x233   :  { %4819 = vmatprep.subr.bf16.mxu1 %v5972_v25  ;;  %4850 = vmatprep.subr.bf16.mxu0 %v5901_v27 }
 0x2e8   :  { %v719_v55 = vpop.f32.mrb[2].mxu1  ;;  %v790_v1 = vpop.f32.mrb[18].mxu0 }
 0x2e9   :  { %v5644_v5 = vadd.f32 %v719_v55, %v6155_v24  ;;  %v721_v31 = vpop.f32.mrb[3].mxu1  ;;  %v4059_v34 = vpop.f32.mrb[19].mxu0  ;;  %v808_v52 = vadd.f32 %v790_v1, %v6164_v53 }
 0x2ea   :  { %v5645_v38 = vadd.f32 %v721_v31, %v6161_v36 }
 0x2eb   :  { %v3585_v35 = vmul.f32 -1.442695, %v5644_v5 }
 0x2ec   :  { %v3586_v42 = vmul.f32 -1.442695, %v5645_v38 }
 0x2ed   :  { %5722 = vpow2.f32 %v3585_v35 }
 0x2ee   :  { %5724 = vpow2.f32 %v3586_v42 }
 0x2f7   :  { %v5723_v43 = vpop.eup %5722 }
 0x2f8   :  { %v798_v46 = vadd.f32 1.0, %v5723_v43  ;;  %v5725_v47 = vpop.eup %5724 }
 0x2f9   :  { %v805_v2 = vadd.f32 1.0, %v5725_v47 }
 0x2fa   :  { %5726 = vrcp.f32 %v798_v46 }
 0x304   :  { %v5727_v56 = vpop.eup %5726 }
 0x305   :  { %v809_v57 = vmul.f32 %v5727_v56, %v808_v52 }
 0x307   :  { %v810_v60 = vadd.f32 %v809_v57, %v6138_v3 }
 0x309   :  { %5728 = vtanh.f32 %v810_v60 }
 0x30a   :  { %5730 = vrcp.f32 %v805_v2 }
 0x313   :  { %v5729_v7 = vpop.eup %5728 }
 0x314   :  { %v812_v9 = vsub.f32 %v6168_v28, %v5729_v7  ;;  %v5731_v0 = vpop.eup %5730 }
 0x316   :  { %v813_v12 = vmul.f32 %v5731_v0, %v812_v9 }
 0x318   :  { %v6212_v14 = vadd.f32 %v5729_v7, %v813_v12 }
 0x31a   :  { %880 = vmatmul.mubr.f32.vlgmr.msra.gmra.mrb[4].mxu1 %v6212_v14  ;;  %4093 = vmatmul.mubr.f32.vlgmr.msra.gmra.mrb[20].mxu0 %v6212_v14 }
 0x31b   :  { %4821 = vmatpush1.bf16.msra.mxu1 %v5979_v37  ;;  %4852 = vmatpush3.bf16.msra.mxu0 %v5985_v45 }
 0x31c   :  { %4823 = vmatprep.subr.bf16.mxu1 %v5982_v39  ;;  %4853 = vmatprep.subr.bf16.mxu0 %v5901_v27 }
 0x31d   :  { %1041 = vmatprep.mubr.f32.mxu1 %v5900_v26  ;;  %4127 = vmatprep.mubr.msk.f32.mxu0 %vm5902_vm2, %v5900_v26 }
 0x31f   :  { %4825 = vmatpush1.bf16.msra.mxu1 %v5992_v49  ;;  %4855 = vmatpush3.bf16.msra.mxu0 %v6013_v4 }
 0x320   :  { %4827 = vmatprep.subr.bf16.mxu1 %v5997_v51  ;;  %4856 = vmatprep.subr.bf16.mxu0 %v5901_v27 }
 0x323   :  { %4829 = vmatpush1.bf16.msra.mxu1 %v6004_v59  ;;  %4858 = vmatpush3.bf16.msra.mxu0 %v6030_v17 }
 0x324   :  { %4831 = vmatprep.subr.bf16.mxu1 %v6010_v63  ;;  %4859 = vmatprep.subr.bf16.mxu0 %v5901_v27 }
 0x327   :  { %4833 = vmatpush1.bf16.msra.mxu1 %v6019_v6  ;;  %4861 = vmatpush3.bf16.msra.mxu0 %v6045_v29 }
 0x328   :  { %4835 = vmatprep.subr.bf16.mxu1 %v6023_v10  ;;  %4862 = vmatprep.subr.bf16.mxu0 %v5901_v27 }
 0x32b   :  { %4837 = vmatpush1.bf16.msra.mxu1 %v6034_v18  ;;  %4864 = vmatpush3.bf16.msra.mxu0 %v6057_v40 }
 0x32c   :  { %4839 = vmatprep.subr.bf16.mxu1 %v6037_v21  ;;  %4865 = vmatprep.subr.bf16.mxu0 %v5901_v27 }
 0x32f   :  { %4841 = vmatpush1.bf16.msra.mxu1 %v6049_v30  ;;  %4867 = vmatpush3.bf16.msra.mxu0 %v6069_v48 }
 0x330   :  { %4843 = vmatprep.subr.bf16.mxu1 %v6052_v33  ;;  %4868 = vmatprep.subr.bf16.mxu0 %v5901_v27 }
 0x333   :  { %4845 = vmatpush1.bf16.msra.mxu1 %v6061_v41  ;;  %4870 = vmatpush3.bf16.msra.mxu0 %v6079_v54 }
 0x334   :  { %4847 = vmatprep.subr.bf16.mxu1 %v6064_v44  ;;  %4871 = vmatprep.subr.bf16.mxu0 %v5901_v27 }
 0x337   :  { %4849 = vmatpush1.bf16.msra.mxu1 %v6073_v50  ;;  %4873 = vmatpush3.bf16.msra.mxu0 %v6092_v58 }
 0x338   :  { %4875 = vmatprep.subr.bf16.mxu1 %v5972_v25  ;;  %4906 = vmatprep.subr.bf16.mxu0 %v5901_v27 }
 0x3ed   :  { %v881_v3 = vpop.f32.mrb[4].mxu1  ;;  %v952_v16 = vpop.f32.mrb[20].mxu0 }
 0x3ee   :  { %v5646_v20 = vadd.f32 %v881_v3, %v6155_v24  ;;  %v883_v55 = vpop.f32.mrb[5].mxu1  ;;  %v4094_v1 = vpop.f32.mrb[21].mxu0  ;;  %v970_v43 = vadd.f32 %v952_v16, %v6164_v53 }
 0x3ef   :  { %v5647_v31 = vadd.f32 %v883_v55, %v6161_v36 }
 0x3f0   :  { %v3587_v5 = vmul.f32 -1.442695, %v5646_v20 }
 0x3f1   :  { %v3588_v34 = vmul.f32 -1.442695, %v5647_v31 }
 0x3f2   :  { %5732 = vpow2.f32 %v3587_v5 }
 0x3f3   :  { %5734 = vpow2.f32 %v3588_v34 }
 0x3fc   :  { %v5733_v35 = vpop.eup %5732 }
 0x3fd   :  { %v960_v38 = vadd.f32 1.0, %v5733_v35  ;;  %v5735_v42 = vpop.eup %5734 }
 0x3fe   :  { %v967_v56 = vadd.f32 1.0, %v5735_v42 }
 0x3ff   :  { %5736 = vrcp.f32 %v960_v38 }
 0x409   :  { %v5737_v46 = vpop.eup %5736 }
 0x40a   :  { %v971_v47 = vmul.f32 %v5737_v46, %v970_v43 }
 0x40c   :  { %v972_v52 = vadd.f32 %v971_v47, %v6142_v11 }
 0x40e   :  { %5738 = vtanh.f32 %v972_v52 }
 0x40f   :  { %5740 = vrcp.f32 %v967_v56 }
 0x418   :  { %v5739_v57 = vpop.eup %5738 }
 0x419   :  { %v974_v60 = vsub.f32 %v6212_v14, %v5739_v57  ;;  %v5741_v2 = vpop.eup %5740 }
 0x41b   :  { %v975_v7 = vmul.f32 %v5741_v2, %v974_v60 }
 0x41d   :  { %v6256_v9 = vadd.f32 %v5739_v57, %v975_v7 }
 0x41f   :  { %1042 = vmatmul.mubr.f32.vlgmr.msra.gmra.mrb[6].mxu1 %v6256_v9  ;;  %4128 = vmatmul.mubr.f32.vlgmr.msra.gmra.mrb[22].mxu0 %v6256_v9 }
 0x420   :  { %4877 = vmatpush1.bf16.msra.mxu1 %v5979_v37  ;;  %4908 = vmatpush3.bf16.msra.mxu0 %v5985_v45 }
 0x421   :  { %4879 = vmatprep.subr.bf16.mxu1 %v5982_v39  ;;  %4909 = vmatprep.subr.bf16.mxu0 %v5901_v27 }
 0x422   :  { %1203 = vmatprep.mubr.f32.mxu1 %v5900_v26  ;;  %4162 = vmatprep.mubr.msk.f32.mxu0 %vm5902_vm2, %v5900_v26 }
 0x424   :  { %4881 = vmatpush1.bf16.msra.mxu1 %v5992_v49  ;;  %4911 = vmatpush3.bf16.msra.mxu0 %v6013_v4 }
 0x425   :  { %4883 = vmatprep.subr.bf16.mxu1 %v5997_v51  ;;  %4912 = vmatprep.subr.bf16.mxu0 %v5901_v27 }
 0x428   :  { %4885 = vmatpush1.bf16.msra.mxu1 %v6004_v59  ;;  %4914 = vmatpush3.bf16.msra.mxu0 %v6030_v17 }
 0x429   :  { %4887 = vmatprep.subr.bf16.mxu1 %v6010_v63  ;;  %4915 = vmatprep.subr.bf16.mxu0 %v5901_v27 }
 0x42c   :  { %4889 = vmatpush1.bf16.msra.mxu1 %v6019_v6  ;;  %4917 = vmatpush3.bf16.msra.mxu0 %v6045_v29 }
 0x42d   :  { %4891 = vmatprep.subr.bf16.mxu1 %v6023_v10  ;;  %4918 = vmatprep.subr.bf16.mxu0 %v5901_v27 }
 0x430   :  { %4893 = vmatpush1.bf16.msra.mxu1 %v6034_v18  ;;  %4920 = vmatpush3.bf16.msra.mxu0 %v6057_v40 }
 0x431   :  { %4895 = vmatprep.subr.bf16.mxu1 %v6037_v21  ;;  %4921 = vmatprep.subr.bf16.mxu0 %v5901_v27 }
 0x434   :  { %4897 = vmatpush1.bf16.msra.mxu1 %v6049_v30  ;;  %4923 = vmatpush3.bf16.msra.mxu0 %v6069_v48 }
 0x435   :  { %4899 = vmatprep.subr.bf16.mxu1 %v6052_v33  ;;  %4924 = vmatprep.subr.bf16.mxu0 %v5901_v27 }
 0x438   :  { %4901 = vmatpush1.bf16.msra.mxu1 %v6061_v41  ;;  %4926 = vmatpush3.bf16.msra.mxu0 %v6079_v54 }
 0x439   :  { %4903 = vmatprep.subr.bf16.mxu1 %v6064_v44  ;;  %4927 = vmatprep.subr.bf16.mxu0 %v5901_v27 }
 0x43c   :  { %4905 = vmatpush1.bf16.msra.mxu1 %v6073_v50  ;;  %4929 = vmatpush3.bf16.msra.mxu0 %v6092_v58 }
 0x43d   :  { %4931 = vmatprep.subr.bf16.mxu1 %v5972_v25  ;;  %4962 = vmatprep.subr.bf16.mxu0 %v5901_v27 }
 0x4f2   :  { %v1043_v11 = vpop.f32.mrb[6].mxu1  ;;  %v1114_v0 = vpop.f32.mrb[22].mxu0 }
 0x4f3   :  { %v5648_v12 = vadd.f32 %v1043_v11, %v6155_v24  ;;  %v1045_v3 = vpop.f32.mrb[7].mxu1  ;;  %v4129_v16 = vpop.f32.mrb[23].mxu0  ;;  %v1132_v35 = vadd.f32 %v1114_v0, %v6164_v53 }
 0x4f4   :  { %v5649_v55 = vadd.f32 %v1045_v3, %v6161_v36 }
 0x4f5   :  { %v3589_v20 = vmul.f32 -1.442695, %v5648_v12 }
 0x4f6   :  { %v3590_v1 = vmul.f32 -1.442695, %v5649_v55 }
 0x4f7   :  { %5742 = vpow2.f32 %v3589_v20 }
 0x4f8   :  { %5744 = vpow2.f32 %v3590_v1 }
 0x501   :  { %v5743_v5 = vpop.eup %5742 }
 0x502   :  { %v1122_v31 = vadd.f32 1.0, %v5743_v5  ;;  %v5745_v34 = vpop.eup %5744 }
 0x503   :  { %v1129_v46 = vadd.f32 1.0, %v5745_v34 }
 0x504   :  { %5746 = vrcp.f32 %v1122_v31 }
 0x50e   :  { %v5747_v38 = vpop.eup %5746 }
 0x50f   :  { %v1133_v42 = vmul.f32 %v5747_v38, %v1132_v35 }
 0x511   :  { %v1134_v43 = vadd.f32 %v1133_v42, %v6140_v8 }
 0x513   :  { %5748 = vtanh.f32 %v1134_v43 }
 0x514   :  { %5750 = vrcp.f32 %v1129_v46 }
 0x51d   :  { %v5749_v47 = vpop.eup %5748 }
 0x51e   :  { %v1136_v52 = vsub.f32 %v6256_v9, %v5749_v47  ;;  %v5751_v56 = vpop.eup %5750 }
 0x520   :  { %v1137_v57 = vmul.f32 %v5751_v56, %v1136_v52 }
 0x522   :  { %v6300_v60 = vadd.f32 %v5749_v47, %v1137_v57 }
 0x524   :  { %1204 = vmatmul.mubr.f32.vlgmr.msra.gmra.mrb[8].mxu1 %v6300_v60  ;;  %4163 = vmatmul.mubr.f32.vlgmr.msra.gmra.mrb[24].mxu0 %v6300_v60 }
 0x525   :  { %4933 = vmatpush1.bf16.msra.mxu1 %v5979_v37  ;;  %4964 = vmatpush3.bf16.msra.mxu0 %v5985_v45 }
 0x526   :  { %4935 = vmatprep.subr.bf16.mxu1 %v5982_v39  ;;  %4965 = vmatprep.subr.bf16.mxu0 %v5901_v27 }
 0x527   :  { %1365 = vmatprep.mubr.f32.mxu1 %v5900_v26  ;;  %4197 = vmatprep.mubr.msk.f32.mxu0 %vm5902_vm2, %v5900_v26 }
 0x529   :  { %4937 = vmatpush1.bf16.msra.mxu1 %v5992_v49  ;;  %4967 = vmatpush3.bf16.msra.mxu0 %v6013_v4 }
 0x52a   :  { %4939 = vmatprep.subr.bf16.mxu1 %v5997_v51  ;;  %4968 = vmatprep.subr.bf16.mxu0 %v5901_v27 }
 0x52d   :  { %4941 = vmatpush1.bf16.msra.mxu1 %v6004_v59  ;;  %4970 = vmatpush3.bf16.msra.mxu0 %v6030_v17 }
 0x52e   :  { %4943 = vmatprep.subr.bf16.mxu1 %v6010_v63  ;;  %4971 = vmatprep.subr.bf16.mxu0 %v5901_v27 }
 0x531   :  { %4945 = vmatpush1.bf16.msra.mxu1 %v6019_v6  ;;  %4973 = vmatpush3.bf16.msra.mxu0 %v6045_v29 }
 0x532   :  { %4947 = vmatprep.subr.bf16.mxu1 %v6023_v10  ;;  %4974 = vmatprep.subr.bf16.mxu0 %v5901_v27 }
 0x535   :  { %4949 = vmatpush1.bf16.msra.mxu1 %v6034_v18  ;;  %4976 = vmatpush3.bf16.msra.mxu0 %v6057_v40 }
 0x536   :  { %4951 = vmatprep.subr.bf16.mxu1 %v6037_v21  ;;  %4977 = vmatprep.subr.bf16.mxu0 %v5901_v27 }
 0x539   :  { %4953 = vmatpush1.bf16.msra.mxu1 %v6049_v30  ;;  %4979 = vmatpush3.bf16.msra.mxu0 %v6069_v48 }
 0x53a   :  { %4955 = vmatprep.subr.bf16.mxu1 %v6052_v33  ;;  %4980 = vmatprep.subr.bf16.mxu0 %v5901_v27 }
 0x53d   :  { %4957 = vmatpush1.bf16.msra.mxu1 %v6061_v41  ;;  %4982 = vmatpush3.bf16.msra.mxu0 %v6079_v54 }
 0x53e   :  { %4959 = vmatprep.subr.bf16.mxu1 %v6064_v44  ;;  %4983 = vmatprep.subr.bf16.mxu0 %v5901_v27 }
 0x541   :  { %4961 = vmatpush1.bf16.msra.mxu1 %v6073_v50  ;;  %4985 = vmatpush3.bf16.msra.mxu0 %v6092_v58 }
 0x542   :  { %4987 = vmatprep.subr.bf16.mxu1 %v5972_v25  ;;  %5018 = vmatprep.subr.bf16.mxu0 %v5901_v27 }
 0x5f7   :  { %v1205_v8 = vpop.f32.mrb[8].mxu1  ;;  %v1276_v2 = vpop.f32.mrb[24].mxu0 }
 0x5f8   :  { %v5650_v7 = vadd.f32 %v1205_v8, %v6155_v24  ;;  %v1207_v11 = vpop.f32.mrb[9].mxu1  ;;  %v4164_v0 = vpop.f32.mrb[25].mxu0  ;;  %v1294_v5 = vadd.f32 %v1276_v2, %v6164_v53 }
 0x5f9   :  { %v5651_v3 = vadd.f32 %v1207_v11, %v6161_v36 }
 0x5fa   :  { %v3591_v12 = vmul.f32 -1.442695, %v5650_v7 }
 0x5fb   :  { %v3592_v16 = vmul.f32 -1.442695, %v5651_v3 }
 0x5fc   :  { %5752 = vpow2.f32 %v3591_v12 }
 0x5fd   :  { %5754 = vpow2.f32 %v3592_v16 }
 0x606   :  { %v5753_v20 = vpop.eup %5752 }
 0x607   :  { %v1284_v55 = vadd.f32 1.0, %v5753_v20  ;;  %v5755_v1 = vpop.eup %5754 }
 0x608   :  { %v1291_v38 = vadd.f32 1.0, %v5755_v1 }
 0x609   :  { %5756 = vrcp.f32 %v1284_v55 }
 0x613   :  { %v5757_v31 = vpop.eup %5756 }
 0x614   :  { %v1295_v34 = vmul.f32 %v5757_v31, %v1294_v5 }
 0x616   :  { %v1296_v35 = vadd.f32 %v1295_v34, %v6146_v15 }
 0x618   :  { %5758 = vtanh.f32 %v1296_v35 }
 0x619   :  { %5760 = vrcp.f32 %v1291_v38 }
 0x622   :  { %v5759_v42 = vpop.eup %5758 }
 0x623   :  { %v1298_v43 = vsub.f32 %v6300_v60, %v5759_v42  ;;  %v5761_v46 = vpop.eup %5760 }
 0x625   :  { %v1299_v47 = vmul.f32 %v5761_v46, %v1298_v43  ;;  %v1788_v43 = vld [vmem:[#allocation2 + $0x240] sm:$0xff]  ;;  %v1791_v46 = vld [vmem:[#allocation2 + $0x258] sm:$0xff] }
 0x627   :  { %v6344_v52 = vadd.f32 %v5759_v42, %v1299_v47 }
 0x629   :  { %1366 = vmatmul.mubr.f32.vlgmr.msra.gmra.mrb[10].mxu1 %v6344_v52  ;;  %4198 = vmatmul.mubr.f32.vlgmr.msra.gmra.mrb[26].mxu0 %v6344_v52 }
 0x62a   :  { %4989 = vmatpush1.bf16.msra.mxu1 %v5979_v37  ;;  %5020 = vmatpush3.bf16.msra.mxu0 %v5985_v45 }
 0x62b   :  { %4991 = vmatprep.subr.bf16.mxu1 %v5982_v39  ;;  %5021 = vmatprep.subr.bf16.mxu0 %v5901_v27 }
 0x62c   :  { %1527 = vmatprep.mubr.f32.mxu1 %v5900_v26  ;;  %4232 = vmatprep.mubr.msk.f32.mxu0 %vm5902_vm2, %v5900_v26 }
 0x62e   :  { %4993 = vmatpush1.bf16.msra.mxu1 %v5992_v49  ;;  %5023 = vmatpush3.bf16.msra.mxu0 %v6013_v4 }
 0x62f   :  { %4995 = vmatprep.subr.bf16.mxu1 %v5997_v51  ;;  %5024 = vmatprep.subr.bf16.mxu0 %v5901_v27 }
 0x632   :  { %4997 = vmatpush1.bf16.msra.mxu1 %v6004_v59  ;;  %5026 = vmatpush3.bf16.msra.mxu0 %v6030_v17 }
 0x633   :  { %4999 = vmatprep.subr.bf16.mxu1 %v6010_v63  ;;  %5027 = vmatprep.subr.bf16.mxu0 %v5901_v27 }
 0x636   :  { %5001 = vmatpush1.bf16.msra.mxu1 %v6019_v6  ;;  %5029 = vmatpush3.bf16.msra.mxu0 %v6045_v29 }
 0x637   :  { %5003 = vmatprep.subr.bf16.mxu1 %v6023_v10  ;;  %5030 = vmatprep.subr.bf16.mxu0 %v5901_v27 }
 0x63a   :  { %5005 = vmatpush1.bf16.msra.mxu1 %v6034_v18  ;;  %5032 = vmatpush3.bf16.msra.mxu0 %v6057_v40 }
 0x63b   :  { %5007 = vmatprep.subr.bf16.mxu1 %v6037_v21  ;;  %5033 = vmatprep.subr.bf16.mxu0 %v5901_v27 }
 0x63e   :  { %5009 = vmatpush1.bf16.msra.mxu1 %v6049_v30  ;;  %5035 = vmatpush3.bf16.msra.mxu0 %v6069_v48 }
 0x63f   :  { %5011 = vmatprep.subr.bf16.mxu1 %v6052_v33  ;;  %5036 = vmatprep.subr.bf16.mxu0 %v5901_v27 }
 0x642   :  { %5013 = vmatpush1.bf16.msra.mxu1 %v6061_v41  ;;  %5038 = vmatpush3.bf16.msra.mxu0 %v6079_v54 }
 0x643   :  { %5015 = vmatprep.subr.bf16.mxu1 %v6064_v44  ;;  %5039 = vmatprep.subr.bf16.mxu0 %v5901_v27 }
 0x646   :  { %5017 = vmatpush1.bf16.msra.mxu1 %v6073_v50  ;;  %5041 = vmatpush3.bf16.msra.mxu0 %v6092_v58 }
 0x647   :  { %5043 = vmatprep.subr.bf16.mxu1 %v5972_v25  ;;  %5074 = vmatprep.subr.bf16.mxu0 %v5901_v27 }
 0x6fc   :  { %v1367_v15 = vpop.f32.mrb[10].mxu1  ;;  %v1438_v56 = vpop.f32.mrb[26].mxu0 }
 0x6fd   :  { %v5652_v57 = vadd.f32 %v1367_v15, %v6155_v24  ;;  %v1369_v8 = vpop.f32.mrb[11].mxu1  ;;  %v4199_v2 = vpop.f32.mrb[27].mxu0  ;;  %v1456_v25 = vadd.f32 %v1438_v56, %v6164_v53  ;;  %v1795_v15 = vld [vmem:[#allocation2 + $0x278] sm:$0xff]  ;;  %v1798_v56 = vld [vmem:[#allocation2 + $0x290] sm:$0xff] }
 0x6fe   :  { %v5653_v11 = vadd.f32 %v1369_v8, %v6161_v36  ;;  %v1796_v8 = vld [vmem:[#allocation2 + $0x280] sm:$0xff]  ;;  %v1799_v2 = vld [vmem:[#allocation2 + $0x298] sm:$0xff] }
 0x6ff   :  { %v3593_v7 = vmul.f32 -1.442695, %v5652_v57 }
 0x700   :  { %v3594_v0 = vmul.f32 -1.442695, %v5653_v11  ;;  %v5102_v11 = vpack.c.bf16 %v1798_v56, %v1795_v15  ;;  %v1826_v15 = vld [vmem:[#allocation2 + $0x370] sm:$0xff]  ;;  %v1829_v56 = vld [vmem:[#allocation2 + $0x388] sm:$0xff] }
 0x701   :  { %5762 = vpow2.f32 %v3593_v7  ;;  %v5100_v7 = vpack.c.bf16 %v1791_v46, %v1788_v43  ;;  %v1821_v43 = vld [vmem:[#allocation2 + $0x348] sm:$0xff] }
 0x702   :  { %5764 = vpow2.f32 %v3594_v0  ;;  %v1794_v0 = vld [vmem:[#allocation2 + $0x270] sm:$0xff]  ;;  %v1825_v46 = vld [vmem:[#allocation2 + $0x368] sm:$0xff] }
 0x70b   :  { %v5763_v12 = vpop.eup %5762 }
 0x70c   :  { %v1446_v3 = vadd.f32 1.0, %v5763_v12  ;;  %v5765_v16 = vpop.eup %5764  ;;  %v1801_v12 = vld [vmem:[#allocation2 + $0x2a8] sm:$0xff] }
 0x70d   :  { %v1453_v5 = vadd.f32 1.0, %v5765_v16  ;;  %v1804_v16 = vld [vmem:[#allocation2 + $0x2c0] sm:$0xff] }
 0x70e   :  { %5766 = vrcp.f32 %v1446_v3  ;;  %v5134_v3 = vpack.c.bf16 %v1799_v2, %v1796_v8  ;;  %v5154_v2 = vpack.c.bf16 %v1829_v56, %v1826_v15  ;;  %v1878_v15 = vld [vmem:[#allocation2 + $0x518] sm:$0xff] }
 0x70f   :  { %v1874_v56 = vld [vmem:[#allocation2 + $0x4f8] sm:$0xff] }
 0x718   :  { %v5767_v20 = vpop.eup %5766 }
 0x719   :  { %v1457_v55 = vmul.f32 %v5767_v20, %v1456_v25  ;;  %v1802_v25 = vld [vmem:[#allocation2 + $0x2b0] sm:$0xff]  ;;  %v1805_v20 = vld [vmem:[#allocation2 + $0x2c8] sm:$0xff] }
 0x71b   :  { %v1458_v1 = vadd.f32 %v1457_v55, %v6144_v13 }
 0x71d   :  { %5768 = vtanh.f32 %v1458_v1  ;;  %v5106_v1 = vpack.c.bf16 %v1804_v16, %v1801_v12  ;;  %v1832_v12 = vld [vmem:[#allocation2 + $0x3a0] sm:$0xff] }
 0x71e   :  { %5770 = vrcp.f32 %v1453_v5  ;;  %v5138_v5 = vpack.c.bf16 %v1805_v20, %v1802_v25 }
 0x727   :  { %v5769_v31 = vpop.eup %5768 }
 0x728   :  { %v1460_v34 = vsub.f32 %v6344_v52, %v5769_v31  ;;  %v5771_v35 = vpop.eup %5770 }
 0x72a   :  { %v1461_v38 = vmul.f32 %v5771_v35, %v1460_v34  ;;  %v1803_v34 = vld [vmem:[#allocation2 + $0x2b8] sm:$0xff] }
 0x72b   :  { %v1807_v35 = vld [vmem:[#allocation2 + $0x2d8] sm:$0xff] }
 0x72c   :  { %v6388_v42 = vadd.f32 %v5769_v31, %v1461_v38  ;;  %v1800_v31 = vld [vmem:[#allocation2 + $0x2a0] sm:$0xff]  ;;  %v1810_v38 = vld [vmem:[#allocation2 + $0x2f0] sm:$0xff] }
 0x72e   :  { %1528 = vmatmul.mubr.f32.vlgmr.msra.gmra.mrb[12].mxu1 %v6388_v42  ;;  %4233 = vmatmul.mubr.f32.vlgmr.msra.gmra.mrb[28].mxu0 %v6388_v42 }
 0x72f   :  { %5045 = vmatpush1.bf16.msra.mxu1 %v5979_v37  ;;  %5076 = vmatpush3.bf16.msra.mxu0 %v5985_v45  ;;  %v1789_v37 = vld [vmem:[#allocation2 + $0x248] sm:$0xff]  ;;  %v1790_v45 = vld [vmem:[#allocation2 + $0x250] sm:$0xff] }
 0x730   :  { %5047 = vmatprep.subr.bf16.mxu1 %v5982_v39  ;;  %5077 = vmatprep.subr.bf16.mxu0 %v5901_v27  ;;  %v1792_v39 = vld [vmem:[#allocation2 + $0x260] sm:$0xff] }
 0x731   :  { %1689 = vmatprep.mubr.f32.mxu1 %v5900_v26  ;;  %4267 = vmatprep.mubr.msk.f32.mxu0 %vm5902_vm2, %v5900_v26 }
 0x733   :  { %5049 = vmatpush1.bf16.msra.mxu1 %v5992_v49  ;;  %5079 = vmatpush3.bf16.msra.mxu0 %v6013_v4  ;;  %v5098_v49 = vpack.c.bf16 %v1792_v39, %v1789_v37  ;;  %v1808_v37 = vld [vmem:[#allocation2 + $0x2e0] sm:$0xff]  ;;  %v1811_v39 = vld [vmem:[#allocation2 + $0x2f8] sm:$0xff] }
 0x734   :  { %5051 = vmatprep.subr.bf16.mxu1 %v5997_v51  ;;  %5080 = vmatprep.subr.bf16.mxu0 %v5901_v27  ;;  %v1793_v51 = vld [vmem:[#allocation2 + $0x268] sm:$0xff] }
 0x737   :  { %5053 = vmatpush1.bf16.msra.mxu1 %v6004_v59  ;;  %5082 = vmatpush3.bf16.msra.mxu0 %v6030_v17  ;;  %v5130_v59 = vpack.c.bf16 %v1793_v51, %v1790_v45  ;;  %v5108_v45 = vpack.c.bf16 %v1803_v34, %v1800_v31  ;;  %v5142_v51 = vpack.c.bf16 %v1811_v39, %v1808_v37  ;;  %v1838_v31 = vld [vmem:[#allocation2 + $0x3d8] sm:$0xff]  ;;  %v1847_v37 = vld [vmem:[#allocation2 + $0x420] sm:$0xff] }
 0x738   :  { %5055 = vmatprep.subr.bf16.mxu1 %v6010_v63  ;;  %5083 = vmatprep.subr.bf16.mxu0 %v5901_v27 }
 0x73b   :  { %5057 = vmatpush1.bf16.msra.mxu1 %v6019_v6  ;;  %5085 = vmatpush3.bf16.msra.mxu0 %v6045_v29 }
 0x73c   :  { %5059 = vmatprep.subr.bf16.mxu1 %v6023_v10  ;;  %5086 = vmatprep.subr.bf16.mxu0 %v5901_v27 }
 0x73f   :  { %5061 = vmatpush1.bf16.msra.mxu1 %v6034_v18  ;;  %5088 = vmatpush3.bf16.msra.mxu0 %v6057_v40 }
 0x740   :  { %5063 = vmatprep.subr.bf16.mxu1 %v6037_v21  ;;  %5089 = vmatprep.subr.bf16.mxu0 %v5901_v27 }
 0x743   :  { %5065 = vmatpush1.bf16.msra.mxu1 %v6049_v30  ;;  %5091 = vmatpush3.bf16.msra.mxu0 %v6069_v48 }
 0x744   :  { %5067 = vmatprep.subr.bf16.mxu1 %v6052_v33  ;;  %5092 = vmatprep.subr.bf16.mxu0 %v5901_v27 }
 0x747   :  { %5069 = vmatpush1.bf16.msra.mxu1 %v6061_v41  ;;  %5094 = vmatpush3.bf16.msra.mxu0 %v6079_v54 }
 0x748   :  { %5071 = vmatprep.subr.bf16.mxu1 %v6064_v44  ;;  %5095 = vmatprep.subr.bf16.mxu0 %v5901_v27 }
 0x74b   :  { %5073 = vmatpush1.bf16.msra.mxu1 %v6073_v50  ;;  %5097 = vmatpush3.bf16.msra.mxu0 %v6092_v58 }
 0x74c   :  { %5099 = vmatprep.subr.bf16.mxu1 %v5098_v49  ;;  %5131 = vmatprep.subr.bf16.mxu0 %v5130_v59  ;;  %v5110_v49 = vpack.c.bf16 %v1810_v38, %v1807_v35  ;;  %v1844_v38 = vld [vmem:[#allocation2 + $0x408] sm:$0xff] }
 0x74d   :  { %v6465_v39 = vpack.c.bf16 %v1847_v37, %v1844_v38  ;;  %v1864_v38 = vld [vmem:[#allocation2 + $0x4a8] sm:$0xff]  ;;  %v1867_v37 = vld [vmem:[#allocation2 + $0x4c0] sm:$0xff] }
 0x801   :  { %v1529_v63 = vpop.f32.mrb[12].mxu1  ;;  %v1600_v4 = vpop.f32.mrb[28].mxu0 }
 0x802   :  { %v5654_v6 = vadd.f32 %v1529_v63, %v6155_v24  ;;  %v1531_v10 = vpop.f32.mrb[13].mxu1  ;;  %v4234_v17 = vpop.f32.mrb[29].mxu0  ;;  %v1618_v41 = vadd.f32 %v1600_v4, %v6164_v53  ;;  %v1809_v63 = vld [vmem:[#allocation2 + $0x2e8] sm:$0xff] }
 0x803   :  { %v5655_v21 = vadd.f32 %v1531_v10, %v6161_v36  ;;  %v1813_v4 = vld [vmem:[#allocation2 + $0x308] sm:$0xff]  ;;  %v1814_v10 = vld [vmem:[#allocation2 + $0x310] sm:$0xff] }
 0x804   :  { %v3595_v18 = vmul.f32 -1.442695, %v5654_v6  ;;  %v1816_v6 = vld [vmem:[#allocation2 + $0x320] sm:$0xff]  ;;  %v1817_v17 = vld [vmem:[#allocation2 + $0x328] sm:$0xff] }
 0x805   :  { %v3596_v29 = vmul.f32 -1.442695, %v5655_v21  ;;  %v5114_v21 = vpack.c.bf16 %v1816_v6, %v1813_v4  ;;  %v1857_v6 = vld [vmem:[#allocation2 + $0x470] sm:$0xff] }
 0x806   :  { %5772 = vpow2.f32 %v3595_v18 }
 0x807   :  { %5774 = vpow2.f32 %v3596_v29  ;;  %v5146_v29 = vpack.c.bf16 %v1817_v17, %v1814_v10  ;;  %v1860_v10 = vld [vmem:[#allocation2 + $0x488] sm:$0xff] }
 0x808   :  { %v6475_v17 = vpack.c.bf16 %v1860_v10, %v1857_v6  ;;  %v1876_v6 = vld [vmem:[#allocation2 + $0x508] sm:$0xff]  ;;  %v1879_v10 = vld [vmem:[#allocation2 + $0x520] sm:$0xff] }
 0x810   :  { %v5773_v30 = vpop.eup %5772 }
 0x811   :  { %v1608_v33 = vadd.f32 1.0, %v5773_v30  ;;  %v5775_v40 = vpop.eup %5774  ;;  %v1812_v30 = vld [vmem:[#allocation2 + $0x300] sm:$0xff] }
 0x812   :  { %v1615_v54 = vadd.f32 1.0, %v5775_v40  ;;  %v1819_v40 = vld [vmem:[#allocation2 + $0x338] sm:$0xff] }
 0x813   :  { %5776 = vrcp.f32 %v1608_v33  ;;  %v1815_v33 = vld [vmem:[#allocation2 + $0x318] sm:$0xff] }
 0x81d   :  { %v5777_v44 = vpop.eup %5776 }
 0x81e   :  { %v1619_v48 = vmul.f32 %v5777_v44, %v1618_v41  ;;  %v1822_v41 = vld [vmem:[#allocation2 + $0x350] sm:$0xff]  ;;  %v1820_v44 = vld [vmem:[#allocation2 + $0x340] sm:$0xff] }
 0x820   :  { %v1620_v50 = vadd.f32 %v1619_v48, %v6150_v22  ;;  %v1797_v22 = vld [vmem:[#allocation2 + $0x288] sm:$0xff]  ;;  %v1823_v48 = vld [vmem:[#allocation2 + $0x358] sm:$0xff] }
 0x821   :  { %v5104_v55 = vpack.c.bf16 %v1797_v22, %v1794_v0  ;;  %v1831_v0 = vld [vmem:[#allocation2 + $0x398] sm:$0xff]  ;;  %v1834_v22 = vld [vmem:[#allocation2 + $0x3b0] sm:$0xff] }
 0x822   :  { %5778 = vtanh.f32 %v1620_v50  ;;  %v5116_v50 = vpack.c.bf16 %v1815_v33, %v1812_v30  ;;  %v5126_v25 = vpack.c.bf16 %v1834_v22, %v1831_v0  ;;  %v1863_v30 = vld [vmem:[#allocation2 + $0x4a0] sm:$0xff]  ;;  %v1866_v33 = vld [vmem:[#allocation2 + $0x4b8] sm:$0xff]  ;;  %v1881_v22 = vld [vmem:[#allocation2 + $0x530] sm:$0xff] }
 0x823   :  { %5780 = vrcp.f32 %v1615_v54  ;;  %v5118_v54 = vpack.c.bf16 %v1822_v41, %v1819_v40  ;;  %v6481_v40 = vpack.c.bf16 %v1866_v33, %v1863_v30  ;;  %v1862_v41 = vld [vmem:[#allocation2 + $0x498] sm:$0xff]  ;;  %v1885_v30 = vld [vmem:[#allocation2 + $0x550] sm:$0xff] }
 0x82c   :  { %v5779_v58 = vpop.eup %5778 }
 0x82d   :  { %v1622_v13 = vsub.f32 %v6388_v42, %v5779_v58  ;;  %v5781_v47 = vpop.eup %5780 }
 0x82f   :  { %v1623_v57 = vmul.f32 %v5781_v47, %v1622_v13  ;;  %v1818_v13 = vld [vmem:[#allocation2 + $0x330] sm:$0xff]  ;;  %v1828_v47 = vld [vmem:[#allocation2 + $0x380] sm:$0xff] }
 0x830   :  { %v5122_v8 = vpack.c.bf16 %v1828_v47, %v1825_v46  ;;  %v1875_v47 = vld [vmem:[#allocation2 + $0x500] sm:$0xff] }
 0x831   :  { %v6430_v53 = vadd.f32 %v5779_v58, %v1623_v57  ;;  %v5150_v58 = vpack.c.bf16 %v1823_v48, %v1820_v44  ;;  %v5120_v57 = vpack.c.bf16 %v1821_v43, %v1818_v13  ;;  %v1865_v44 = vld [vmem:[#allocation2 + $0x4b0] sm:$0xff]  ;;  %v1868_v13 = vld [vmem:[#allocation2 + $0x4c8] sm:$0xff]  ;;  %v1871_v43 = vld [vmem:[#allocation2 + $0x4e0] sm:$0xff] }
 0x832   :  { %v6483_v48 = vpack.c.bf16 %v1865_v44, %v1862_v41  ;;  %v6489_v46 = vpack.c.bf16 %v1871_v43, %v1868_v13 }
 0x833   :  { %1690 = vmatmul.mubr.f32.vlgmr.msra.gmra.mrb[14].mxu1 %v6430_v53  ;;  %4268 = vmatmul.mubr.f32.vlgmr.msra.gmra.mrb[30].mxu0 %v6430_v53 }
 0x834   :  { %5101 = vmatpush1.bf16.msra.mxu1 %v5100_v7  ;;  %5133 = vmatpush3.bf16.msra.mxu0 %v5130_v59  ;;  %v1806_v59 = vld [vmem:[#allocation2 + $0x2d0] sm:$0xff]  ;;  %v1824_v7 = vld [vmem:[#allocation2 + $0x360] sm:$0xff] }
 0x835   :  { %4302 = vmatprep.mubr.f32.mxu0 %v6168_v28  ;;  %5103 = vmatprep.subr.bf16.mxu1 %v5102_v11  ;;  %v5112_v18 = vpack.c.bf16 %v1809_v63, %v1806_v59  ;;  %v1827_v11 = vld [vmem:[#allocation2 + $0x378] sm:$0xff]  ;;  %v1853_v63 = vld [vmem:[#allocation2 + $0x450] sm:$0xff] }
 0x836   :  { %5135 = vmatprep.subr.bf16.mxu0 %v5134_v3  ;;  %1967 = vmatprep.mubr.f32.mxu1 %v5900_v26  ;;  %v5124_v16 = vpack.c.bf16 %v1827_v11, %v1824_v7  ;;  %v1850_v59 = vld [vmem:[#allocation2 + $0x438] sm:$0xff]  ;;  %v1843_v7 = vld [vmem:[#allocation2 + $0x400] sm:$0xff] }
 0x837   :  { %v6471_v4 = vpack.c.bf16 %v1853_v63, %v1850_v59  ;;  %v1873_v59 = vld [vmem:[#allocation2 + $0x4f0] sm:$0xff] }
 0x838   :  { %5105 = vmatpush1.bf16.msra.mxu1 %v5104_v55  ;;  %5137 = vmatpush3.bf16.msra.mxu0 %v5134_v3  ;;  %v1835_v3 = vld [vmem:[#allocation2 + $0x3b8] sm:$0xff]  ;;  %v1830_v55 = vld [vmem:[#allocation2 + $0x390] sm:$0xff] }
 0x839   :  { %5107 = vmatprep.subr.bf16.mxu1 %v5106_v1  ;;  %5139 = vmatprep.subr.bf16.mxu0 %v5138_v5  ;;  %v5158_v20 = vpack.c.bf16 %v1835_v3, %v1832_v12  ;;  %v1833_v1 = vld [vmem:[#allocation2 + $0x3a8] sm:$0xff] }
 0x83a   :  { %v1884_v12 = vld [vmem:[#allocation2 + $0x548] sm:$0xff] }
 0x83b   :  { %v6500_v3 = vpack.c.bf16 %v1884_v12, %v1881_v22 }
 0x83c   :  { %5109 = vmatpush1.bf16.msra.mxu1 %v5108_v45  ;;  %5141 = vmatpush3.bf16.msra.mxu0 %v5138_v5  ;;  %v5128_v5 = vpack.c.bf16 %v1833_v1, %v1830_v55  ;;  %v1851_v45 = vld [vmem:[#allocation2 + $0x440] sm:$0xff]  ;;  %v1846_v55 = vld [vmem:[#allocation2 + $0x418] sm:$0xff]  ;;  %v1849_v1 = vld [vmem:[#allocation2 + $0x430] sm:$0xff] }
 0x83d   :  { %5111 = vmatprep.subr.bf16.mxu1 %v5110_v49  ;;  %5143 = vmatprep.subr.bf16.mxu0 %v5142_v51  ;;  %v1854_v49 = vld [vmem:[#allocation2 + $0x458] sm:$0xff] }
 0x840   :  { %5113 = vmatpush1.bf16.msra.mxu1 %v5112_v18  ;;  %5145 = vmatpush3.bf16.msra.mxu0 %v5142_v51  ;;  %v6469_v51 = vpack.c.bf16 %v1854_v49, %v1851_v45  ;;  %v1856_v18 = vld [vmem:[#allocation2 + $0x468] sm:$0xff]  ;;  %v6521_v45 = vpack.c.bf16 %v1867_v37, %v1864_v38  ;;  %v1870_v49 = vld [vmem:[#allocation2 + $0x4d8] sm:$0xff] }
 0x841   :  { %5115 = vmatprep.subr.bf16.mxu1 %v5114_v21  ;;  %5147 = vmatprep.subr.bf16.mxu0 %v5146_v29  ;;  %v1859_v21 = vld [vmem:[#allocation2 + $0x480] sm:$0xff]  ;;  %v6525_v63 = vpack.c.bf16 %v1873_v59, %v1870_v49 }
 0x844   :  { %5117 = vmatpush1.bf16.msra.mxu1 %v5116_v50  ;;  %5149 = vmatpush3.bf16.msra.mxu0 %v5146_v29  ;;  %v6477_v29 = vpack.c.bf16 %v1859_v21, %v1856_v18  ;;  %v1869_v50 = vld [vmem:[#allocation2 + $0x4d0] sm:$0xff]  ;;  %v6529_v18 = vpack.c.bf16 %v1879_v10, %v1876_v6  ;;  %v1882_v21 = vld [vmem:[#allocation2 + $0x538] sm:$0xff] }
 0x845   :  { %5119 = vmatprep.subr.bf16.mxu1 %v5118_v54  ;;  %5151 = vmatprep.subr.bf16.mxu0 %v5150_v58  ;;  %v1872_v54 = vld [vmem:[#allocation2 + $0x4e8] sm:$0xff]  ;;  %v6533_v33 = vpack.c.bf16 %v1885_v30, %v1882_v21 }
 0x848   :  { %5121 = vmatpush1.bf16.msra.mxu1 %v5120_v57  ;;  %5153 = vmatpush3.bf16.msra.mxu0 %v5150_v58  ;;  %v6487_v58 = vpack.c.bf16 %v1872_v54, %v1869_v50  ;;  %v6492_v57 = vpack.c.bf16 %v1878_v15, %v1875_v47 }
 0x849   :  { %5123 = vmatprep.subr.bf16.mxu1 %v5122_v8  ;;  %5155 = vmatprep.subr.bf16.mxu0 %v5154_v2  ;;  %v1877_v8 = vld [vmem:[#allocation2 + $0x510] sm:$0xff] }
 0x84a   :  { %v6495_v11 = vpack.c.bf16 %v1877_v8, %v1874_v56 }
 0x84c   :  { %5125 = vmatpush1.bf16.msra.mxu1 %v5124_v16  ;;  %5157 = vmatpush3.bf16.msra.mxu0 %v5154_v2  ;;  %v1840_v2 = vld [vmem:[#allocation2 + $0x3e8] sm:$0xff] }
 0x84d   :  { %5127 = vmatprep.subr.bf16.mxu1 %v5126_v25  ;;  %5159 = vmatprep.subr.bf16.mxu0 %v5158_v20  ;;  %v6497_v0 = vpack.c.bf16 %v1843_v7, %v1840_v2  ;;  %v1880_v16 = vld [vmem:[#allocation2 + $0x528] sm:$0xff]  ;;  %v1883_v25 = vld [vmem:[#allocation2 + $0x540] sm:$0xff] }
 0x84e   :  { %v5872_v7 = vld [vmem:[#allocation2 + $0x228] ss:$0 sm:$0xff] }
 0x850   :  { %5129 = vmatpush1.bf16.msra.mxu1 %v5128_v5  ;;  %5161 = vmatpush3.bf16.msra.mxu0 %v5158_v20  ;;  %v6506_v20 = vpack.c.bf16 %v1883_v25, %v1880_v16  ;;  %v6508_v5 = vpack.c.bf16 %v1849_v1, %v1846_v55 }
 0x851   :  { %5194 = vmatprep.subr.bf16.mxu0 %v5901_v27 }
 0x853   :  { %1968 = vmatmul.mubr.f32.vlgmr.msra.gmra.mrb[16].mxu1 %v6168_v28  ;;  %4303 = vmatmul.mubr.f32.vlgmr.msra.gmra.mrb[32].mxu0 %v6212_v14  ;;  %v1839_v28 = vld [vmem:[#allocation2 + $0x3e0] sm:$0xff] }
 0x854   :  { %4305 = vmatprep.mubr.f32.mxu0 %v6256_v9  ;;  %1973 = vmatprep.mubr.f32.mxu1 %v5900_v26 }
 0x855   :  { %5196 = vmatpush3.bf16.msra.mxu0 %v6497_v0 }
 0x856   :  { %5197 = vmatprep.subr.bf16.mxu0 %v5901_v27 }
 0x857   :  { %1974 = vmatmul.mubr.f32.gmra.mrb[18].mxu1 %v6212_v14  ;;  %4306 = vmatmul.mubr.f32.gmra.mrb[34].mxu0 %v6300_v60  ;;  %v1842_v14 = vld [vmem:[#allocation2 + $0x3f8] sm:$0xff] }
 0x858   :  { %4308 = vmatprep.mubr.f32.mxu0 %v6344_v52  ;;  %1979 = vmatprep.mubr.f32.mxu1 %v5900_v26 }
 0x859   :  { %5199 = vmatpush3.bf16.msra.mxu0 %v6508_v5 }
 0x85a   :  { %5200 = vmatprep.subr.bf16.mxu0 %v5901_v27 }
 0x85b   :  { %1980 = vmatmul.mubr.f32.gmra.mrb[20].mxu1 %v6256_v9  ;;  %4309 = vmatmul.mubr.f32.gmra.mrb[36].mxu0 %v6388_v42  ;;  %v6457_v9 = vpack.c.bf16 %v1842_v14, %v1839_v28  ;;  %v1852_v28 = vld [vmem:[#allocation2 + $0x448] sm:$0xff]  ;;  %v1855_v14 = vld [vmem:[#allocation2 + $0x460] sm:$0xff] }
 0x85c   :  { %4311 = vmatprep.mubr.f32.mxu0 %v6430_v53  ;;  %1985 = vmatprep.mubr.f32.mxu1 %v5900_v26 }
 0x85d   :  { %5163 = vmatprep.subr.bf16.mxu1 %v6457_v9 }
 0x85f   :  { %1986 = vmatmul.mubr.f32.gmra.mrb[22].mxu1 %v6300_v60  ;;  %v1841_v60 = vld [vmem:[#allocation2 + $0x3f0] sm:$0xff] }
 0x860   :  { %1991 = vmatprep.mubr.f32.mxu1 %v5900_v26  ;;  %v6459_v34 = vpack.c.bf16 %v1841_v60, %v1838_v31  ;;  %v1858_v31 = vld [vmem:[#allocation2 + $0x478] sm:$0xff]  ;;  %v6514_v60 = vpack.c.bf16 %v1855_v14, %v1852_v28 }
 0x862   :  { %5165 = vmatpush1.bf16.msra.mxu1 %v6459_v34  ;;  %5202 = vmatpush3.bf16.msra.mxu0 %v6514_v60 }
 0x863   :  { %1992 = vmatmul.mubr.f32.gmra.mrb[24].mxu1 %v6344_v52  ;;  %v1845_v52 = vld [vmem:[#allocation2 + $0x410] sm:$0xff]  ;;  %5203 = vmatprep.subr.bf16.mxu0 %v5901_v27 }
 0x864   :  { %1997 = vmatprep.mubr.f32.mxu1 %v5900_v26 }
 0x867   :  { %1998 = vmatmul.mubr.f32.gmra.mrb[26].mxu1 %v6388_v42  ;;  %v1848_v42 = vld [vmem:[#allocation2 + $0x428] sm:$0xff] }
 0x868   :  { %2003 = vmatprep.mubr.f32.mxu1 %v5900_v26  ;;  %v6463_v35 = vpack.c.bf16 %v1848_v42, %v1845_v52  ;;  %v1861_v52 = vld [vmem:[#allocation2 + $0x490] sm:$0xff] }
 0x869   :  { %v6517_v42 = vpack.c.bf16 %v1861_v52, %v1858_v31 }
 0x86a   :  { %5167 = vmatprep.subr.bf16.mxu1 %v6463_v35 }
 0x86b   :  { %2004 = vmatmul.mubr.f32.gmra.mrb[28].mxu1 %v6430_v53  ;;  %5205 = vmatpush3.bf16.msra.mxu0 %v6517_v42 }
 0x86c   :  { %2009 = vmatprep.mubr.f32.mxu1 %v5900_v26  ;;  %5169 = vmatpush1.bf16.msra.mxu1 %v6465_v39 }
 0x86d   :  { %5171 = vmatprep.subr.bf16.mxu1 %v6469_v51  ;;  %5206 = vmatprep.subr.bf16.mxu0 %v5901_v27 }
 0x86f   :  { %5208 = vmatpush3.bf16.msra.mxu0 %v6521_v45 }
 0x870   :  { %5173 = vmatpush1.bf16.msra.mxu1 %v6471_v4  ;;  %5209 = vmatprep.subr.bf16.mxu0 %v5901_v27 }
 0x871   :  { %5175 = vmatprep.subr.bf16.mxu1 %v6475_v17 }
 0x873   :  { %5211 = vmatpush3.bf16.msra.mxu0 %v6525_v63 }
 0x874   :  { %5177 = vmatpush1.bf16.msra.mxu1 %v6477_v29  ;;  %5212 = vmatprep.subr.bf16.mxu0 %v5901_v27 }
 0x875   :  { %5179 = vmatprep.subr.bf16.mxu1 %v6481_v40 }
 0x877   :  { %5214 = vmatpush3.bf16.msra.mxu0 %v6529_v18 }
 0x878   :  { %5181 = vmatpush1.bf16.msra.mxu1 %v6483_v48  ;;  %5215 = vmatprep.subr.bf16.mxu0 %v5901_v27 }
 0x879   :  { %5183 = vmatprep.subr.bf16.mxu1 %v6487_v58 }
 0x87b   :  { %5217 = vmatpush3.bf16.msra.mxu0 %v6533_v33 }
 0x87c   :  { %5185 = vmatpush1.bf16.msra.mxu1 %v6489_v46  ;;  %5250 = vmatprep.subr.bf16.mxu0 %v5901_v27 }
 0x87d   :  { %5187 = vmatprep.subr.bf16.mxu1 %v6492_v57 }
 0x880   :  { %5189 = vmatpush1.bf16.msra.mxu1 %v6495_v11 }
 0x881   :  { %5191 = vmatprep.subr.bf16.mxu1 %v6500_v3 }
 0x884   :  { %5193 = vmatpush1.bf16.msra.mxu1 %v6506_v20 }
 0x885   :  { %5219 = vmatprep.subr.bf16.mxu1 %v6457_v9 }
 0x906   :  { %v1691_v41 = vpop.f32.mrb[14].mxu1  ;;  %v1762_v44 = vpop.f32.mrb[30].mxu0 }
 0x907   :  { %v5656_v50 = vadd.f32 %v1691_v41, %v6155_v24  ;;  %v1693_v54 = vpop.f32.mrb[15].mxu1  ;;  %v4269_v13 = vpop.f32.mrb[31].mxu0  ;;  %v1780_v22 = vadd.f32 %v5872_v7, %v1762_v44 }
 0x908   :  { %v5657_v47 = vadd.f32 %v1693_v54, %v6161_v36 }
 0x909   :  { %v3597_v43 = vmul.f32 -1.442695, %v5656_v50 }
 0x90a   :  { %v3598_v15 = vmul.f32 -1.442695, %v5657_v47 }
 0x90b   :  { %5782 = vpow2.f32 %v3597_v43 }
 0x90c   :  { %5784 = vpow2.f32 %v3598_v15 }
 0x915   :  { %v5783_v56 = vpop.eup %5782 }
 0x916   :  { %v1770_v8 = vadd.f32 1.0, %v5783_v56  ;;  %v5785_v2 = vpop.eup %5784 }
 0x917   :  { %v1777_v55 = vadd.f32 1.0, %v5785_v2 }
 0x918   :  { %5786 = vrcp.f32 %v1770_v8 }
 0x922   :  { %v5787_v12 = vpop.eup %5786 }
 0x923   :  { %v1781_v16 = vmul.f32 %v5787_v12, %v1780_v22 }
 0x925   :  { %v1782_v25 = vadd.f32 %v1781_v16, %v6148_v19 }
 0x926   :  { %v6541_v24 = vpop.f32.mrb[32].mxu0 }
 0x927   :  { %5788 = vtanh.f32 %v1782_v25  ;;  %v6543_v1 = vpop.f32.mrb[33].mxu0 }
 0x928   :  { %5790 = vrcp.f32 %v1777_v55 }
 0x92a   :  { %v6545_v36 = vpop.f32.mrb[34].mxu0 }
 0x92b   :  { %v6547_v28 = vpop.f32.mrb[35].mxu0 }
 0x92e   :  { %v6549_v14 = vpop.f32.mrb[36].mxu0 }
 0x92f   :  { %v6551_v31 = vpop.f32.mrb[37].mxu0 }
 0x931   :  { %v5789_v52 = vpop.eup %5788 }
 0x932   :  { %v1784_v38 = vsub.f32 %v6430_v53, %v5789_v52  ;;  %v5791_v37 = vpop.eup %5790  ;;  %v1837_v53 = vld [vmem:[#allocation2 + $0x3c0] ss:$8 sm:$0x7] }
 0x933   :  { %v6608_v21 = vrot.slane %v1837_v53, %v234_v23  ;;  %v6613_v43 = vrot.slane %v1837_v53, %v238_v32  ;;  %v6616_v23 = vld [vmem:[#allocation2 + $0x558] ss:$0 sm:$0xff]  ;;  %v6620_v2 = vrot.slane %v1837_v53, %v242_v62 }
 0x934   :  { %v1785_v19 = vmul.f32 %v5791_v37, %v1784_v38 }
 0x935   :  { %v2083_v32 = vadd.f32 %v6543_v1, %v6620_v2 }
 0x936   :  { %v1786_v49 = vadd.f32 %v5789_v52, %v1785_v19 }
 0x938   :  { %1787 = vst [vmem:[%s6950_s4] sm:$0xff] %v1786_v49  ;;  %2010 = vmatmul.mubr.f32.gmra.mrb[30].mxu1 %v1786_v49  ;;  %4312 = vmatmul.mubr.f32.gmra.mrb[38].mxu0 %v1786_v49 }
 0x939   :  { %2186 = vmatprep.mubr.f32.mxu1 %v5900_v26  ;;  %4346 = vmatprep.mubr.msk.f32.mxu0 %vm5902_vm2, %v5900_v26 }
 0x93f   :  { %v6561_v59 = vld [vmem:[%s6947_s1 + $0x8] sm:$0xff] }
 0x940   :  { %2187 = vmatmul.mubr.f32.vlgmr.msra.gmra.mrb[16].mxu1 %v6561_v59  ;;  %4347 = vmatmul.mubr.f32.vlgmr.msra.gmra.mrb[40].mxu0 %v6561_v59 }
 0x941   :  { %5221 = vmatpush1.bf16.msra.mxu1 %v6459_v34  ;;  %5252 = vmatpush3.bf16.msra.mxu0 %v6497_v0 }
 0x942   :  { %5223 = vmatprep.subr.bf16.mxu1 %v6463_v35  ;;  %5253 = vmatprep.subr.bf16.mxu0 %v5901_v27 }
 0x943   :  { %2348 = vmatprep.mubr.f32.mxu1 %v5900_v26  ;;  %4381 = vmatprep.mubr.msk.f32.mxu0 %vm5902_vm2, %v5900_v26 }
 0x945   :  { %5225 = vmatpush1.bf16.msra.mxu1 %v6465_v39  ;;  %5255 = vmatpush3.bf16.msra.mxu0 %v6508_v5 }
 0x946   :  { %5227 = vmatprep.subr.bf16.mxu1 %v6469_v51  ;;  %5256 = vmatprep.subr.bf16.mxu0 %v5901_v27 }
 0x949   :  { %5229 = vmatpush1.bf16.msra.mxu1 %v6471_v4  ;;  %5258 = vmatpush3.bf16.msra.mxu0 %v6514_v60 }
 0x94a   :  { %5231 = vmatprep.subr.bf16.mxu1 %v6475_v17  ;;  %5259 = vmatprep.subr.bf16.mxu0 %v5901_v27 }
 0x94d   :  { %5233 = vmatpush1.bf16.msra.mxu1 %v6477_v29  ;;  %5261 = vmatpush3.bf16.msra.mxu0 %v6517_v42 }
 0x94e   :  { %5235 = vmatprep.subr.bf16.mxu1 %v6481_v40  ;;  %5262 = vmatprep.subr.bf16.mxu0 %v5901_v27 }
 0x951   :  { %5237 = vmatpush1.bf16.msra.mxu1 %v6483_v48  ;;  %5264 = vmatpush3.bf16.msra.mxu0 %v6521_v45 }
 0x952   :  { %5239 = vmatprep.subr.bf16.mxu1 %v6487_v58  ;;  %5265 = vmatprep.subr.bf16.mxu0 %v5901_v27 }
 0x955   :  { %5241 = vmatpush1.bf16.msra.mxu1 %v6489_v46  ;;  %5267 = vmatpush3.bf16.msra.mxu0 %v6525_v63 }
 0x956   :  { %5243 = vmatprep.subr.bf16.mxu1 %v6492_v57  ;;  %5268 = vmatprep.subr.bf16.mxu0 %v5901_v27 }
 0x959   :  { %5245 = vmatpush1.bf16.msra.mxu1 %v6495_v11  ;;  %5270 = vmatpush3.bf16.msra.mxu0 %v6529_v18 }
 0x95a   :  { %5247 = vmatprep.subr.bf16.mxu1 %v6500_v3  ;;  %5271 = vmatprep.subr.bf16.mxu0 %v5901_v27 }
 0x95d   :  { %5249 = vmatpush1.bf16.msra.mxu1 %v6506_v20  ;;  %5273 = vmatpush3.bf16.msra.mxu0 %v6533_v33 }
 0x95e   :  { %5275 = vmatprep.subr.bf16.mxu1 %v6457_v9  ;;  %5306 = vmatprep.subr.bf16.mxu0 %v5901_v27 }
 0xa0b   :  { %v6602_v6 = vpop.f32.mrb[38].mxu0 }
 0xa0c   :  { %v6604_v10 = vpop.f32.mrb[39].mxu0 }
 0xa13   :  { %v2188_v30 = vpop.f32.mrb[16].mxu1  ;;  %v2259_v41 = vpop.f32.mrb[40].mxu0 }
 0xa14   :  { %v5658_v44 = vadd.f32 %v2188_v30, %v6608_v21  ;;  %v2190_v50 = vpop.f32.mrb[17].mxu1  ;;  %v4348_v54 = vpop.f32.mrb[41].mxu0  ;;  %v2277_v7 = vadd.f32 %v2259_v41, %v6616_v23 }
 0xa15   :  { %v5659_v47 = vadd.f32 %v2190_v50, %v6613_v43 }
 0xa16   :  { %v3599_v13 = vmul.f32 -1.442695, %v5658_v44 }
 0xa17   :  { %v3600_v15 = vmul.f32 -1.442695, %v5659_v47 }
 0xa18   :  { %5792 = vpow2.f32 %v3599_v13 }
 0xa19   :  { %5794 = vpow2.f32 %v3600_v15 }
 0xa22   :  { %v5793_v56 = vpop.eup %5792 }
 0xa23   :  { %v2267_v8 = vadd.f32 1.0, %v5793_v56  ;;  %v5795_v22 = vpop.eup %5794  ;;  %v2088_v56 = vadd.f32 %v6541_v24, %v6620_v2 }
 0xa24   :  { %v2274_v25 = vadd.f32 1.0, %v5795_v22 }
 0xa25   :  { %5796 = vrcp.f32 %v2267_v8 }
 0xa2f   :  { %v5797_v12 = vpop.eup %5796 }
 0xa30   :  { %v2278_v16 = vmul.f32 %v5797_v12, %v2277_v7 }
 0xa32   :  { %v2279_v55 = vadd.f32 %v2278_v16, %v2083_v32 }
 0xa34   :  { %5798 = vtanh.f32 %v2279_v55 }
 0xa35   :  { %5800 = vrcp.f32 %v2274_v25 }
 0xa3e   :  { %v5799_v52 = vpop.eup %5798 }
 0xa3f   :  { %v2281_v38 = vsub.f32 %v6561_v59, %v5799_v52  ;;  %v5801_v37 = vpop.eup %5800 }
 0xa41   :  { %v2282_v19 = vmul.f32 %v5801_v37, %v2281_v38 }
 0xa43   :  { %v6626_v61 = vadd.f32 %v5799_v52, %v2282_v19 }
 0xa45   :  { %2349 = vmatmul.mubr.f32.vlgmr.msra.gmra.mrb[18].mxu1 %v6626_v61  ;;  %4382 = vmatmul.mubr.f32.vlgmr.msra.gmra.mrb[42].mxu0 %v6626_v61 }
 0xa46   :  { %5277 = vmatpush1.bf16.msra.mxu1 %v6459_v34  ;;  %5308 = vmatpush3.bf16.msra.mxu0 %v6497_v0 }
 0xa47   :  { %5279 = vmatprep.subr.bf16.mxu1 %v6463_v35  ;;  %5309 = vmatprep.subr.bf16.mxu0 %v5901_v27 }
 0xa48   :  { %2510 = vmatprep.mubr.f32.mxu1 %v5900_v26  ;;  %4416 = vmatprep.mubr.msk.f32.mxu0 %vm5902_vm2, %v5900_v26 }
 0xa4a   :  { %5281 = vmatpush1.bf16.msra.mxu1 %v6465_v39  ;;  %5311 = vmatpush3.bf16.msra.mxu0 %v6508_v5 }
 0xa4b   :  { %5283 = vmatprep.subr.bf16.mxu1 %v6469_v51  ;;  %5312 = vmatprep.subr.bf16.mxu0 %v5901_v27 }
 0xa4e   :  { %5285 = vmatpush1.bf16.msra.mxu1 %v6471_v4  ;;  %5314 = vmatpush3.bf16.msra.mxu0 %v6514_v60 }
 0xa4f   :  { %5287 = vmatprep.subr.bf16.mxu1 %v6475_v17  ;;  %5315 = vmatprep.subr.bf16.mxu0 %v5901_v27 }
 0xa52   :  { %5289 = vmatpush1.bf16.msra.mxu1 %v6477_v29  ;;  %5317 = vmatpush3.bf16.msra.mxu0 %v6517_v42 }
 0xa53   :  { %5291 = vmatprep.subr.bf16.mxu1 %v6481_v40  ;;  %5318 = vmatprep.subr.bf16.mxu0 %v5901_v27 }
 0xa56   :  { %5293 = vmatpush1.bf16.msra.mxu1 %v6483_v48  ;;  %5320 = vmatpush3.bf16.msra.mxu0 %v6521_v45 }
 0xa57   :  { %5295 = vmatprep.subr.bf16.mxu1 %v6487_v58  ;;  %5321 = vmatprep.subr.bf16.mxu0 %v5901_v27 }
 0xa5a   :  { %5297 = vmatpush1.bf16.msra.mxu1 %v6489_v46  ;;  %5323 = vmatpush3.bf16.msra.mxu0 %v6525_v63 }
 0xa5b   :  { %5299 = vmatprep.subr.bf16.mxu1 %v6492_v57  ;;  %5324 = vmatprep.subr.bf16.mxu0 %v5901_v27 }
 0xa5e   :  { %5301 = vmatpush1.bf16.msra.mxu1 %v6495_v11  ;;  %5326 = vmatpush3.bf16.msra.mxu0 %v6529_v18 }
 0xa5f   :  { %5303 = vmatprep.subr.bf16.mxu1 %v6500_v3  ;;  %5327 = vmatprep.subr.bf16.mxu0 %v5901_v27 }
 0xa62   :  { %5305 = vmatpush1.bf16.msra.mxu1 %v6506_v20  ;;  %5329 = vmatpush3.bf16.msra.mxu0 %v6533_v33 }
 0xa63   :  { %5331 = vmatprep.subr.bf16.mxu1 %v6457_v9  ;;  %5362 = vmatprep.subr.bf16.mxu0 %v5901_v27 }
 0xb18   :  { %v2350_v62 = vpop.f32.mrb[18].mxu1  ;;  %v2421_v1 = vpop.f32.mrb[42].mxu0 }
 0xb19   :  { %v5660_v49 = vadd.f32 %v2350_v62, %v6608_v21  ;;  %v2352_v59 = vpop.f32.mrb[19].mxu1  ;;  %v4383_v53 = vpop.f32.mrb[43].mxu0  ;;  %v2439_v47 = vadd.f32 %v2421_v1, %v6616_v23 }
 0xb1a   :  { %v5661_v41 = vadd.f32 %v2352_v59, %v6613_v43 }
 0xb1b   :  { %v3601_v30 = vmul.f32 -1.442695, %v5660_v49 }
 0xb1c   :  { %v3602_v44 = vmul.f32 -1.442695, %v5661_v41 }
 0xb1d   :  { %5802 = vpow2.f32 %v3601_v30 }
 0xb1e   :  { %5804 = vpow2.f32 %v3602_v44 }
 0xb27   :  { %v5803_v50 = vpop.eup %5802 }
 0xb28   :  { %v2429_v54 = vadd.f32 1.0, %v5803_v50  ;;  %v5805_v13 = vpop.eup %5804  ;;  %v2093_v50 = vadd.f32 %v6547_v28, %v6620_v2 }
 0xb29   :  { %v2436_v22 = vadd.f32 1.0, %v5805_v13 }
 0xb2a   :  { %5806 = vrcp.f32 %v2429_v54 }
 0xb34   :  { %v5807_v15 = vpop.eup %5806 }
 0xb35   :  { %v2440_v8 = vmul.f32 %v5807_v15, %v2439_v47 }
 0xb37   :  { %v2441_v7 = vadd.f32 %v2440_v8, %v2088_v56 }
 0xb39   :  { %5808 = vtanh.f32 %v2441_v7 }
 0xb3a   :  { %5810 = vrcp.f32 %v2436_v22 }
 0xb43   :  { %v5809_v12 = vpop.eup %5808 }
 0xb44   :  { %v2443_v32 = vsub.f32 %v6626_v61, %v5809_v12  ;;  %v5811_v16 = vpop.eup %5810 }
 0xb46   :  { %v2444_v25 = vmul.f32 %v5811_v16, %v2443_v32 }
 0xb48   :  { %v6671_v55 = vadd.f32 %v5809_v12, %v2444_v25 }
 0xb4a   :  { %2511 = vmatmul.mubr.f32.vlgmr.msra.gmra.mrb[20].mxu1 %v6671_v55  ;;  %4417 = vmatmul.mubr.f32.vlgmr.msra.gmra.mrb[44].mxu0 %v6671_v55 }
 0xb4b   :  { %5333 = vmatpush1.bf16.msra.mxu1 %v6459_v34  ;;  %5364 = vmatpush3.bf16.msra.mxu0 %v6497_v0 }
 0xb4c   :  { %5335 = vmatprep.subr.bf16.mxu1 %v6463_v35  ;;  %5365 = vmatprep.subr.bf16.mxu0 %v5901_v27 }
 0xb4d   :  { %2672 = vmatprep.mubr.f32.mxu1 %v5900_v26  ;;  %4451 = vmatprep.mubr.msk.f32.mxu0 %vm5902_vm2, %v5900_v26 }
 0xb4f   :  { %5337 = vmatpush1.bf16.msra.mxu1 %v6465_v39  ;;  %5367 = vmatpush3.bf16.msra.mxu0 %v6508_v5 }
 0xb50   :  { %5339 = vmatprep.subr.bf16.mxu1 %v6469_v51  ;;  %5368 = vmatprep.subr.bf16.mxu0 %v5901_v27 }
 0xb53   :  { %5341 = vmatpush1.bf16.msra.mxu1 %v6471_v4  ;;  %5370 = vmatpush3.bf16.msra.mxu0 %v6514_v60 }
 0xb54   :  { %5343 = vmatprep.subr.bf16.mxu1 %v6475_v17  ;;  %5371 = vmatprep.subr.bf16.mxu0 %v5901_v27 }
 0xb57   :  { %5345 = vmatpush1.bf16.msra.mxu1 %v6477_v29  ;;  %5373 = vmatpush3.bf16.msra.mxu0 %v6517_v42 }
 0xb58   :  { %5347 = vmatprep.subr.bf16.mxu1 %v6481_v40  ;;  %5374 = vmatprep.subr.bf16.mxu0 %v5901_v27 }
 0xb5b   :  { %5349 = vmatpush1.bf16.msra.mxu1 %v6483_v48  ;;  %5376 = vmatpush3.bf16.msra.mxu0 %v6521_v45 }
 0xb5c   :  { %5351 = vmatprep.subr.bf16.mxu1 %v6487_v58  ;;  %5377 = vmatprep.subr.bf16.mxu0 %v5901_v27 }
 0xb5f   :  { %5353 = vmatpush1.bf16.msra.mxu1 %v6489_v46  ;;  %5379 = vmatpush3.bf16.msra.mxu0 %v6525_v63 }
 0xb60   :  { %5355 = vmatprep.subr.bf16.mxu1 %v6492_v57  ;;  %5380 = vmatprep.subr.bf16.mxu0 %v5901_v27 }
 0xb63   :  { %5357 = vmatpush1.bf16.msra.mxu1 %v6495_v11  ;;  %5382 = vmatpush3.bf16.msra.mxu0 %v6529_v18 }
 0xb64   :  { %5359 = vmatprep.subr.bf16.mxu1 %v6500_v3  ;;  %5383 = vmatprep.subr.bf16.mxu0 %v5901_v27 }
 0xb67   :  { %5361 = vmatpush1.bf16.msra.mxu1 %v6506_v20  ;;  %5385 = vmatpush3.bf16.msra.mxu0 %v6533_v33 }
 0xb68   :  { %5387 = vmatprep.subr.bf16.mxu1 %v6457_v9  ;;  %5418 = vmatprep.subr.bf16.mxu0 %v5901_v27 }
 0xc1d   :  { %v2512_v24 = vpop.f32.mrb[20].mxu1  ;;  %v2583_v52 = vpop.f32.mrb[44].mxu0 }
 0xc1e   :  { %v5662_v38 = vadd.f32 %v2512_v24, %v6608_v21  ;;  %v2514_v37 = vpop.f32.mrb[21].mxu1  ;;  %v4418_v19 = vpop.f32.mrb[45].mxu0  ;;  %v2601_v41 = vadd.f32 %v2583_v52, %v6616_v23 }
 0xc1f   :  { %v5663_v1 = vadd.f32 %v2514_v37, %v6613_v43 }
 0xc20   :  { %v3603_v62 = vmul.f32 -1.442695, %v5662_v38 }
 0xc21   :  { %v3604_v49 = vmul.f32 -1.442695, %v5663_v1 }
 0xc22   :  { %5812 = vpow2.f32 %v3603_v62 }
 0xc23   :  { %5814 = vpow2.f32 %v3604_v49 }
 0xc2c   :  { %v5813_v59 = vpop.eup %5812 }
 0xc2d   :  { %v2591_v53 = vadd.f32 1.0, %v5813_v59  ;;  %v5815_v30 = vpop.eup %5814  ;;  %v2098_v59 = vadd.f32 %v6545_v36, %v6620_v2 }
 0xc2e   :  { %v2598_v47 = vadd.f32 1.0, %v5815_v30 }
 0xc2f   :  { %5816 = vrcp.f32 %v2591_v53 }
 0xc39   :  { %v5817_v44 = vpop.eup %5816 }
 0xc3a   :  { %v2602_v54 = vmul.f32 %v5817_v44, %v2601_v41 }
 0xc3c   :  { %v2603_v13 = vadd.f32 %v2602_v54, %v2093_v50 }
 0xc3e   :  { %5818 = vtanh.f32 %v2603_v13 }
 0xc3f   :  { %5820 = vrcp.f32 %v2598_v47 }
 0xc48   :  { %v5819_v15 = vpop.eup %5818 }
 0xc49   :  { %v2605_v56 = vsub.f32 %v6671_v55, %v5819_v15  ;;  %v5821_v8 = vpop.eup %5820 }
 0xc4b   :  { %v2606_v7 = vmul.f32 %v5821_v8, %v2605_v56 }
 0xc4d   :  { %v6716_v22 = vadd.f32 %v5819_v15, %v2606_v7 }
 0xc4f   :  { %2673 = vmatmul.mubr.f32.vlgmr.msra.gmra.mrb[22].mxu1 %v6716_v22  ;;  %4452 = vmatmul.mubr.f32.vlgmr.msra.gmra.mrb[46].mxu0 %v6716_v22 }
 0xc50   :  { %5389 = vmatpush1.bf16.msra.mxu1 %v6459_v34  ;;  %5420 = vmatpush3.bf16.msra.mxu0 %v6497_v0 }
 0xc51   :  { %5391 = vmatprep.subr.bf16.mxu1 %v6463_v35  ;;  %5421 = vmatprep.subr.bf16.mxu0 %v5901_v27 }
 0xc52   :  { %2834 = vmatprep.mubr.f32.mxu1 %v5900_v26  ;;  %4486 = vmatprep.mubr.msk.f32.mxu0 %vm5902_vm2, %v5900_v26 }
 0xc54   :  { %5393 = vmatpush1.bf16.msra.mxu1 %v6465_v39  ;;  %5423 = vmatpush3.bf16.msra.mxu0 %v6508_v5 }
 0xc55   :  { %5395 = vmatprep.subr.bf16.mxu1 %v6469_v51  ;;  %5424 = vmatprep.subr.bf16.mxu0 %v5901_v27 }
 0xc58   :  { %5397 = vmatpush1.bf16.msra.mxu1 %v6471_v4  ;;  %5426 = vmatpush3.bf16.msra.mxu0 %v6514_v60 }
 0xc59   :  { %5399 = vmatprep.subr.bf16.mxu1 %v6475_v17  ;;  %5427 = vmatprep.subr.bf16.mxu0 %v5901_v27 }
 0xc5c   :  { %5401 = vmatpush1.bf16.msra.mxu1 %v6477_v29  ;;  %5429 = vmatpush3.bf16.msra.mxu0 %v6517_v42 }
 0xc5d   :  { %5403 = vmatprep.subr.bf16.mxu1 %v6481_v40  ;;  %5430 = vmatprep.subr.bf16.mxu0 %v5901_v27 }
 0xc60   :  { %5405 = vmatpush1.bf16.msra.mxu1 %v6483_v48  ;;  %5432 = vmatpush3.bf16.msra.mxu0 %v6521_v45 }
 0xc61   :  { %5407 = vmatprep.subr.bf16.mxu1 %v6487_v58  ;;  %5433 = vmatprep.subr.bf16.mxu0 %v5901_v27 }
 0xc64   :  { %5409 = vmatpush1.bf16.msra.mxu1 %v6489_v46  ;;  %5435 = vmatpush3.bf16.msra.mxu0 %v6525_v63 }
 0xc65   :  { %5411 = vmatprep.subr.bf16.mxu1 %v6492_v57  ;;  %5436 = vmatprep.subr.bf16.mxu0 %v5901_v27 }
 0xc68   :  { %5413 = vmatpush1.bf16.msra.mxu1 %v6495_v11  ;;  %5438 = vmatpush3.bf16.msra.mxu0 %v6529_v18 }
 0xc69   :  { %5415 = vmatprep.subr.bf16.mxu1 %v6500_v3  ;;  %5439 = vmatprep.subr.bf16.mxu0 %v5901_v27 }
 0xc6c   :  { %5417 = vmatpush1.bf16.msra.mxu1 %v6506_v20  ;;  %5441 = vmatpush3.bf16.msra.mxu0 %v6533_v33 }
 0xc6d   :  { %5443 = vmatprep.subr.bf16.mxu1 %v6457_v9  ;;  %5474 = vmatprep.subr.bf16.mxu0 %v5901_v27 }
 0xd22   :  { %v2674_v28 = vpop.f32.mrb[22].mxu1  ;;  %v2745_v12 = vpop.f32.mrb[46].mxu0 }
 0xd23   :  { %v5664_v32 = vadd.f32 %v2674_v28, %v6608_v21  ;;  %v2676_v16 = vpop.f32.mrb[23].mxu1  ;;  %v4453_v25 = vpop.f32.mrb[47].mxu0  ;;  %v2763_v1 = vadd.f32 %v2745_v12, %v6616_v23 }
 0xd24   :  { %v5665_v52 = vadd.f32 %v2676_v16, %v6613_v43 }
 0xd25   :  { %v3605_v24 = vmul.f32 -1.442695, %v5664_v32 }
 0xd26   :  { %v3606_v38 = vmul.f32 -1.442695, %v5665_v52 }
 0xd27   :  { %5822 = vpow2.f32 %v3605_v24 }
 0xd28   :  { %5824 = vpow2.f32 %v3606_v38 }
 0xd31   :  { %v5823_v37 = vpop.eup %5822 }
 0xd32   :  { %v2753_v19 = vadd.f32 1.0, %v5823_v37  ;;  %v5825_v62 = vpop.eup %5824  ;;  %v2103_v37 = vadd.f32 %v6551_v31, %v6620_v2 }
 0xd33   :  { %v2760_v41 = vadd.f32 1.0, %v5825_v62 }
 0xd34   :  { %5826 = vrcp.f32 %v2753_v19 }
 0xd3e   :  { %v5827_v49 = vpop.eup %5826 }
 0xd3f   :  { %v2764_v53 = vmul.f32 %v5827_v49, %v2763_v1 }
 0xd41   :  { %v2765_v30 = vadd.f32 %v2764_v53, %v2098_v59 }
 0xd43   :  { %5828 = vtanh.f32 %v2765_v30 }
 0xd44   :  { %5830 = vrcp.f32 %v2760_v41 }
 0xd4d   :  { %v5829_v44 = vpop.eup %5828 }
 0xd4e   :  { %v2767_v50 = vsub.f32 %v6716_v22, %v5829_v44  ;;  %v5831_v54 = vpop.eup %5830 }
 0xd50   :  { %v2768_v13 = vmul.f32 %v5831_v54, %v2767_v50 }
 0xd52   :  { %v6761_v47 = vadd.f32 %v5829_v44, %v2768_v13 }
 0xd54   :  { %2835 = vmatmul.mubr.f32.vlgmr.msra.gmra.mrb[24].mxu1 %v6761_v47  ;;  %4487 = vmatmul.mubr.f32.vlgmr.msra.gmra.mrb[48].mxu0 %v6761_v47 }
 0xd55   :  { %5445 = vmatpush1.bf16.msra.mxu1 %v6459_v34  ;;  %5476 = vmatpush3.bf16.msra.mxu0 %v6497_v0 }
 0xd56   :  { %5447 = vmatprep.subr.bf16.mxu1 %v6463_v35  ;;  %5477 = vmatprep.subr.bf16.mxu0 %v5901_v27 }
 0xd57   :  { %2996 = vmatprep.mubr.f32.mxu1 %v5900_v26  ;;  %4521 = vmatprep.mubr.msk.f32.mxu0 %vm5902_vm2, %v5900_v26 }
 0xd59   :  { %5449 = vmatpush1.bf16.msra.mxu1 %v6465_v39  ;;  %5479 = vmatpush3.bf16.msra.mxu0 %v6508_v5 }
 0xd5a   :  { %5451 = vmatprep.subr.bf16.mxu1 %v6469_v51  ;;  %5480 = vmatprep.subr.bf16.mxu0 %v5901_v27 }
 0xd5d   :  { %5453 = vmatpush1.bf16.msra.mxu1 %v6471_v4  ;;  %5482 = vmatpush3.bf16.msra.mxu0 %v6514_v60 }
 0xd5e   :  { %5455 = vmatprep.subr.bf16.mxu1 %v6475_v17  ;;  %5483 = vmatprep.subr.bf16.mxu0 %v5901_v27 }
 0xd61   :  { %5457 = vmatpush1.bf16.msra.mxu1 %v6477_v29  ;;  %5485 = vmatpush3.bf16.msra.mxu0 %v6517_v42 }
 0xd62   :  { %5459 = vmatprep.subr.bf16.mxu1 %v6481_v40  ;;  %5486 = vmatprep.subr.bf16.mxu0 %v5901_v27 }
 0xd65   :  { %5461 = vmatpush1.bf16.msra.mxu1 %v6483_v48  ;;  %5488 = vmatpush3.bf16.msra.mxu0 %v6521_v45 }
 0xd66   :  { %5463 = vmatprep.subr.bf16.mxu1 %v6487_v58  ;;  %5489 = vmatprep.subr.bf16.mxu0 %v5901_v27 }
 0xd69   :  { %5465 = vmatpush1.bf16.msra.mxu1 %v6489_v46  ;;  %5491 = vmatpush3.bf16.msra.mxu0 %v6525_v63 }
 0xd6a   :  { %5467 = vmatprep.subr.bf16.mxu1 %v6492_v57  ;;  %5492 = vmatprep.subr.bf16.mxu0 %v5901_v27 }
 0xd6d   :  { %5469 = vmatpush1.bf16.msra.mxu1 %v6495_v11  ;;  %5494 = vmatpush3.bf16.msra.mxu0 %v6529_v18 }
 0xd6e   :  { %5471 = vmatprep.subr.bf16.mxu1 %v6500_v3  ;;  %5495 = vmatprep.subr.bf16.mxu0 %v5901_v27 }
 0xd71   :  { %5473 = vmatpush1.bf16.msra.mxu1 %v6506_v20  ;;  %5497 = vmatpush3.bf16.msra.mxu0 %v6533_v33 }
 0xd72   :  { %5499 = vmatprep.subr.bf16.mxu1 %v6457_v9  ;;  %5530 = vmatprep.subr.bf16.mxu0 %v5901_v27 }
 0xe27   :  { %v2836_v36 = vpop.f32.mrb[24].mxu1  ;;  %v2907_v15 = vpop.f32.mrb[48].mxu0 }
 0xe28   :  { %v5666_v56 = vadd.f32 %v2836_v36, %v6608_v21  ;;  %v2838_v8 = vpop.f32.mrb[25].mxu1  ;;  %v4488_v7 = vpop.f32.mrb[49].mxu0  ;;  %v2925_v52 = vadd.f32 %v2907_v15, %v6616_v23 }
 0xe29   :  { %v5667_v12 = vadd.f32 %v2838_v8, %v6613_v43 }
 0xe2a   :  { %v3607_v28 = vmul.f32 -1.442695, %v5666_v56 }
 0xe2b   :  { %v3608_v32 = vmul.f32 -1.442695, %v5667_v12 }
 0xe2c   :  { %5832 = vpow2.f32 %v3607_v28 }
 0xe2d   :  { %5834 = vpow2.f32 %v3608_v32  ;;  %v2108_v32 = vadd.f32 %v6549_v14, %v6620_v2 }
 0xe36   :  { %v5833_v16 = vpop.eup %5832 }
 0xe37   :  { %v2915_v25 = vadd.f32 1.0, %v5833_v16  ;;  %v5835_v24 = vpop.eup %5834 }
 0xe38   :  { %v2922_v1 = vadd.f32 1.0, %v5835_v24 }
 0xe39   :  { %5836 = vrcp.f32 %v2915_v25 }
 0xe43   :  { %v5837_v38 = vpop.eup %5836 }
 0xe44   :  { %v2926_v19 = vmul.f32 %v5837_v38, %v2925_v52 }
 0xe46   :  { %v2927_v62 = vadd.f32 %v2926_v19, %v2103_v37 }
 0xe48   :  { %5838 = vtanh.f32 %v2927_v62 }
 0xe49   :  { %5840 = vrcp.f32 %v2922_v1 }
 0xe52   :  { %v5839_v49 = vpop.eup %5838 }
 0xe53   :  { %v2929_v59 = vsub.f32 %v6761_v47, %v5839_v49  ;;  %v5841_v53 = vpop.eup %5840 }
 0xe55   :  { %v2930_v30 = vmul.f32 %v5841_v53, %v2929_v59  ;;  %v3423_v59 = vld [vmem:[#allocation2 + $0x5d0] sm:$0xff]  ;;  %v3424_v53 = vld [vmem:[#allocation2 + $0x5e8] sm:$0xff] }
 0xe57   :  { %v6806_v41 = vadd.f32 %v5839_v49, %v2930_v30  ;;  %v3425_v30 = vld [vmem:[#allocation2 + $0x600] sm:$0xff] }
 0xe59   :  { %2997 = vmatmul.mubr.f32.vlgmr.msra.gmra.mrb[26].mxu1 %v6806_v41  ;;  %4522 = vmatmul.mubr.f32.vlgmr.msra.gmra.mrb[50].mxu0 %v6806_v41 }
 0xe5a   :  { %5501 = vmatpush1.bf16.msra.mxu1 %v6459_v34  ;;  %5532 = vmatpush3.bf16.msra.mxu0 %v6497_v0 }
 0xe5b   :  { %5503 = vmatprep.subr.bf16.mxu1 %v6463_v35  ;;  %5533 = vmatprep.subr.bf16.mxu0 %v5901_v27 }
 0xe5c   :  { %3158 = vmatprep.mubr.f32.mxu1 %v5900_v26  ;;  %4556 = vmatprep.mubr.msk.f32.mxu0 %vm5902_vm2, %v5900_v26 }
 0xe5e   :  { %5505 = vmatpush1.bf16.msra.mxu1 %v6465_v39  ;;  %5535 = vmatpush3.bf16.msra.mxu0 %v6508_v5 }
 0xe5f   :  { %5507 = vmatprep.subr.bf16.mxu1 %v6469_v51  ;;  %5536 = vmatprep.subr.bf16.mxu0 %v5901_v27 }
 0xe62   :  { %5509 = vmatpush1.bf16.msra.mxu1 %v6471_v4  ;;  %5538 = vmatpush3.bf16.msra.mxu0 %v6514_v60 }
 0xe63   :  { %5511 = vmatprep.subr.bf16.mxu1 %v6475_v17  ;;  %5539 = vmatprep.subr.bf16.mxu0 %v5901_v27 }
 0xe66   :  { %5513 = vmatpush1.bf16.msra.mxu1 %v6477_v29  ;;  %5541 = vmatpush3.bf16.msra.mxu0 %v6517_v42 }
 0xe67   :  { %5515 = vmatprep.subr.bf16.mxu1 %v6481_v40  ;;  %5542 = vmatprep.subr.bf16.mxu0 %v5901_v27 }
 0xe6a   :  { %5517 = vmatpush1.bf16.msra.mxu1 %v6483_v48  ;;  %5544 = vmatpush3.bf16.msra.mxu0 %v6521_v45 }
 0xe6b   :  { %5519 = vmatprep.subr.bf16.mxu1 %v6487_v58  ;;  %5545 = vmatprep.subr.bf16.mxu0 %v5901_v27 }
 0xe6e   :  { %5521 = vmatpush1.bf16.msra.mxu1 %v6489_v46  ;;  %5547 = vmatpush3.bf16.msra.mxu0 %v6525_v63 }
 0xe6f   :  { %5523 = vmatprep.subr.bf16.mxu1 %v6492_v57  ;;  %5548 = vmatprep.subr.bf16.mxu0 %v5901_v27 }
 0xe72   :  { %5525 = vmatpush1.bf16.msra.mxu1 %v6495_v11  ;;  %5550 = vmatpush3.bf16.msra.mxu0 %v6529_v18 }
 0xe73   :  { %5527 = vmatprep.subr.bf16.mxu1 %v6500_v3  ;;  %5551 = vmatprep.subr.bf16.mxu0 %v5901_v27 }
 0xe76   :  { %5529 = vmatpush1.bf16.msra.mxu1 %v6506_v20  ;;  %5553 = vmatpush3.bf16.msra.mxu0 %v6533_v33 }
 0xe77   :  { %5555 = vmatprep.subr.bf16.mxu1 %v6457_v9  ;;  %5586 = vmatprep.subr.bf16.mxu0 %v5901_v27 }
 0xf2c   :  { %v2998_v31 = vpop.f32.mrb[26].mxu1  ;;  %v3069_v44 = vpop.f32.mrb[50].mxu0 }
 0xf2d   :  { %v5668_v50 = vadd.f32 %v2998_v31, %v6608_v21  ;;  %v3000_v54 = vpop.f32.mrb[27].mxu1  ;;  %v4523_v13 = vpop.f32.mrb[51].mxu0  ;;  %v3087_v9 = vadd.f32 %v3069_v44, %v6616_v23  ;;  %v3426_v31 = vld [vmem:[#allocation2 + $0x618] sm:$0xff] }
 0xf2e   :  { %v5669_v15 = vadd.f32 %v3000_v54, %v6613_v43  ;;  %v5622_v44 = vpack.c.bf16 %v3426_v31, %v3425_v30  ;;  %v3428_v54 = vld [vmem:[#allocation2 + $0x648] sm:$0xff] }
 0xf2f   :  { %v3609_v36 = vmul.f32 -1.442695, %v5668_v50  ;;  %v3427_v50 = vld [vmem:[#allocation2 + $0x630] sm:$0xff] }
 0xf30   :  { %v3610_v56 = vmul.f32 -1.442695, %v5669_v15  ;;  %v5626_v13 = vpack.c.bf16 %v3428_v54, %v3427_v50  ;;  %v3430_v15 = vld [vmem:[#allocation2 + $0x678] sm:$0xff] }
 0xf31   :  { %5842 = vpow2.f32 %v3609_v36  ;;  %v3429_v36 = vld [vmem:[#allocation2 + $0x660] sm:$0xff] }
 0xf32   :  { %5844 = vpow2.f32 %v3610_v56  ;;  %v5630_v56 = vpack.c.bf16 %v3430_v15, %v3429_v36 }
 0xf3b   :  { %v5843_v8 = vpop.eup %5842 }
 0xf3c   :  { %v3077_v7 = vadd.f32 1.0, %v5843_v8  ;;  %v5845_v28 = vpop.eup %5844  ;;  %v3431_v8 = vld [vmem:[#allocation2 + $0x690] sm:$0xff] }
 0xf3d   :  { %v3084_v24 = vadd.f32 1.0, %v5845_v28  ;;  %v3433_v28 = vld [vmem:[#allocation2 + $0x6c0] sm:$0xff] }
 0xf3e   :  { %5846 = vrcp.f32 %v3077_v7  ;;  %v3432_v7 = vld [vmem:[#allocation2 + $0x6a8] sm:$0xff] }
 0xf48   :  { %v5847_v12 = vpop.eup %5846 }
 0xf49   :  { %v3088_v16 = vmul.f32 %v5847_v12, %v3087_v9  ;;  %v3434_v9 = vld [vmem:[#allocation2 + $0x6d8] sm:$0xff] }
 0xf4a   :  { %v5638_v12 = vpack.c.bf16 %v3434_v9, %v3433_v28 }
 0xf4b   :  { %v3089_v25 = vadd.f32 %v3088_v16, %v2108_v32 }
 0xf4d   :  { %5848 = vtanh.f32 %v3089_v25 }
 0xf4e   :  { %5850 = vrcp.f32 %v3084_v24 }
 0xf57   :  { %v5849_v52 = vpop.eup %5848 }
 0xf58   :  { %v3091_v38 = vsub.f32 %v6806_v41, %v5849_v52  ;;  %v5851_v37 = vpop.eup %5850 }
 0xf5a   :  { %v3092_v19 = vmul.f32 %v5851_v37, %v3091_v38 }
 0xf5c   :  { %v6851_v62 = vadd.f32 %v5849_v52, %v3092_v19 }
 0xf5e   :  { %3159 = vmatmul.mubr.f32.vlgmr.msra.gmra.mrb[28].mxu1 %v6851_v62  ;;  %4557 = vmatmul.mubr.f32.vlgmr.msra.gmra.mrb[52].mxu0 %v6851_v62 }
 0xf5f   :  { %5557 = vmatpush1.bf16.msra.mxu1 %v6459_v34  ;;  %5588 = vmatpush3.bf16.msra.mxu0 %v6497_v0  ;;  %v3420_v34 = vld [vmem:[#allocation2 + $0x588] sm:$0xff] }
 0xf60   :  { %5559 = vmatprep.subr.bf16.mxu1 %v6463_v35  ;;  %5589 = vmatprep.subr.bf16.mxu0 %v5901_v27 }
 0xf61   :  { %3320 = vmatprep.mubr.f32.mxu1 %v5900_v26  ;;  %4591 = vmatprep.mubr.msk.f32.mxu0 %vm5902_vm2, %v5900_v26  ;;  %v3419_v26 = vld [vmem:[#allocation2 + $0x570] sm:$0xff] }
 0xf62   :  { %v5610_v35 = vpack.c.bf16 %v3420_v34, %v3419_v26  ;;  %v2118_v26 = vadd.f32 %v6602_v6, %v6620_v2 }
 0xf63   :  { %5561 = vmatpush1.bf16.msra.mxu1 %v6465_v39  ;;  %5591 = vmatpush3.bf16.msra.mxu0 %v6508_v5 }
 0xf64   :  { %5563 = vmatprep.subr.bf16.mxu1 %v6469_v51  ;;  %5592 = vmatprep.subr.bf16.mxu0 %v5901_v27 }
 0xf67   :  { %5565 = vmatpush1.bf16.msra.mxu1 %v6471_v4  ;;  %5594 = vmatpush3.bf16.msra.mxu0 %v6514_v60 }
 0xf68   :  { %5567 = vmatprep.subr.bf16.mxu1 %v6475_v17  ;;  %5595 = vmatprep.subr.bf16.mxu0 %v5901_v27 }
 0xf6b   :  { %5569 = vmatpush1.bf16.msra.mxu1 %v6477_v29  ;;  %5597 = vmatpush3.bf16.msra.mxu0 %v6517_v42 }
 0xf6c   :  { %5571 = vmatprep.subr.bf16.mxu1 %v6481_v40  ;;  %5598 = vmatprep.subr.bf16.mxu0 %v5901_v27 }
 0xf6f   :  { %5573 = vmatpush1.bf16.msra.mxu1 %v6483_v48  ;;  %5600 = vmatpush3.bf16.msra.mxu0 %v6521_v45 }
 0xf70   :  { %5575 = vmatprep.subr.bf16.mxu1 %v6487_v58  ;;  %5601 = vmatprep.subr.bf16.mxu0 %v5901_v27 }
 0xf73   :  { %5577 = vmatpush1.bf16.msra.mxu1 %v6489_v46  ;;  %5603 = vmatpush3.bf16.msra.mxu0 %v6525_v63 }
 0xf74   :  { %5579 = vmatprep.subr.bf16.mxu1 %v6492_v57  ;;  %5604 = vmatprep.subr.bf16.mxu0 %v5901_v27 }
 0xf77   :  { %5581 = vmatpush1.bf16.msra.mxu1 %v6495_v11  ;;  %5606 = vmatpush3.bf16.msra.mxu0 %v6529_v18  ;;  %v3421_v18 = vld [vmem:[#allocation2 + $0x5a0] sm:$0xff] }
 0xf78   :  { %5583 = vmatprep.subr.bf16.mxu1 %v6500_v3  ;;  %5607 = vmatprep.subr.bf16.mxu0 %v5901_v27  ;;  %v2113_v3 = vadd.f32 %v6604_v10, %v6620_v2  ;;  %v5618_v10 = vpack.c.bf16 %v3424_v53, %v3423_v59 }
 0xf7b   :  { %5585 = vmatpush1.bf16.msra.mxu1 %v6506_v20  ;;  %5609 = vmatpush3.bf16.msra.mxu0 %v6533_v33  ;;  %v3422_v33 = vld [vmem:[#allocation2 + $0x5b8] sm:$0xff] }
 0xf7c   :  { %5611 = vmatprep.subr.bf16.mxu1 %v5610_v35  ;;  %v5614_v49 = vpack.c.bf16 %v3422_v33, %v3421_v18 }
0x1031   :  { %v3160_v39 = vpop.f32.mrb[28].mxu1  ;;  %v3231_v51 = vpop.f32.mrb[52].mxu0 }
0x1032   :  { %v5670_v4 = vadd.f32 %v3160_v39, %v6608_v21  ;;  %v3162_v17 = vpop.f32.mrb[29].mxu1  ;;  %v4558_v29 = vpop.f32.mrb[53].mxu0  ;;  %v3249_v11 = vadd.f32 %v3231_v51, %v6616_v23 }
0x1033   :  { %v5671_v48 = vadd.f32 %v3162_v17, %v6613_v43 }
0x1034   :  { %v3611_v40 = vmul.f32 -1.442695, %v5670_v4 }
0x1035   :  { %v3612_v58 = vmul.f32 -1.442695, %v5671_v48 }
0x1036   :  { %5852 = vpow2.f32 %v3611_v40 }
0x1037   :  { %5854 = vpow2.f32 %v3612_v58 }
0x1040   :  { %v5853_v27 = vpop.eup %5852 }
0x1041   :  { %v3239_v46 = vadd.f32 1.0, %v5853_v27  ;;  %v5855_v57 = vpop.eup %5854 }
0x1042   :  { %v3246_v60 = vadd.f32 1.0, %v5855_v57 }
0x1043   :  { %5856 = vrcp.f32 %v3239_v46 }
0x104d   :  { %v5857_v0 = vpop.eup %5856 }
0x104e   :  { %v3250_v20 = vmul.f32 %v5857_v0, %v3249_v11 }
0x1050   :  { %v3251_v5 = vadd.f32 %v3250_v20, %v2113_v3 }
0x1052   :  { %5858 = vtanh.f32 %v3251_v5 }
0x1053   :  { %5860 = vrcp.f32 %v3246_v60 }
0x105c   :  { %v5859_v42 = vpop.eup %5858 }
0x105d   :  { %v3253_v45 = vsub.f32 %v6851_v62, %v5859_v42  ;;  %v5861_v63 = vpop.eup %5860 }
0x105f   :  { %v3254_v14 = vmul.f32 %v5861_v63, %v3253_v45 }
0x1061   :  { %v6894_v1 = vadd.f32 %v5859_v42, %v3254_v14 }
0x1063   :  { %3321 = vmatmul.mubr.f32.vlgmr.msra.gmra.mrb[30].mxu1 %v6894_v1  ;;  %4592 = vmatmul.mubr.f32.vlgmr.msra.gmra.mrb[54].mxu0 %v6894_v1 }
0x1064   :  { %5613 = vmatpush3.bf16.msra.mxu1 %v5610_v35  ;;  %4626 = vmatprep.mubr.f32.mxu1 %v6626_v61  ;;  %v5634_v61 = vpack.c.bf16 %v3432_v7, %v3431_v8 }
0x1065   :  { %5615 = vmatprep.subr.bf16.mxu1 %v5614_v49 }
0x1068   :  { %5617 = vmatpush3.bf16.msra.mxu1 %v5614_v49 }
0x1069   :  { %5619 = vmatprep.subr.bf16.mxu1 %v5618_v10 }
0x106c   :  { %5621 = vmatpush3.bf16.msra.mxu1 %v5618_v10 }
0x106d   :  { %5623 = vmatprep.subr.bf16.mxu1 %v5622_v44 }
0x1070   :  { %5625 = vmatpush3.bf16.msra.mxu1 %v5622_v44 }
0x1071   :  { %5627 = vmatprep.subr.bf16.mxu1 %v5626_v13 }
0x1074   :  { %5629 = vmatpush3.bf16.msra.mxu1 %v5626_v13 }
0x1075   :  { %5631 = vmatprep.subr.bf16.mxu1 %v5630_v56 }
0x1078   :  { %5633 = vmatpush3.bf16.msra.mxu1 %v5630_v56 }
0x1079   :  { %5635 = vmatprep.subr.bf16.mxu1 %v5634_v61 }
0x107c   :  { %5637 = vmatpush3.bf16.msra.mxu1 %v5634_v61 }
0x107d   :  { %5639 = vmatprep.subr.bf16.mxu1 %v5638_v12 }
0x1080   :  { %5641 = vmatpush3.bf16.msra.mxu1 %v5638_v12 }
0x1083   :  { %4627 = vmatmul.mubr.f32.vlgmr.msra.gmra.mrb[32].mxu1 %v6671_v55 }
0x1084   :  { %4629 = vmatprep.mubr.f32.mxu1 %v6716_v22 }
0x1087   :  { %4630 = vmatmul.mubr.f32.gmra.mrb[34].mxu1 %v6761_v47 }
0x1088   :  { %4632 = vmatprep.mubr.f32.mxu1 %v6806_v41 }
0x108b   :  { %4633 = vmatmul.mubr.f32.gmra.mrb[36].mxu1 %v6851_v62 }
0x108c   :  { %4635 = vmatprep.mubr.f32.mxu1 %v6894_v1 }
0x1136   :  { %v3322_v32 = vpop.f32.mrb[30].mxu1  ;;  %v3393_v16 = vpop.f32.mrb[54].mxu0 }
0x1137   :  { %v5672_v25 = vadd.f32 %v3322_v32, %v6608_v21  ;;  %v3324_v24 = vpop.f32.mrb[31].mxu1  ;;  %v4593_v52 = vpop.f32.mrb[55].mxu0  ;;  %v3411_v41 = vadd.f32 %v3393_v16, %v6616_v23  ;;  %v3435_v21 = vld [vmem:[#allocation2 + $0x6f0] ss:$0 sm:$0xff] }
0x1138   :  { %v5673_v55 = vadd.f32 %v3324_v24, %v6613_v43 }
0x1139   :  { %v3613_v38 = vmul.f32 -1.442695, %v5672_v25 }
0x113a   :  { %v3614_v37 = vmul.f32 -1.442695, %v5673_v55 }
0x113b   :  { %5862 = vpow2.f32 %v3613_v38 }
0x113c   :  { %5864 = vpow2.f32 %v3614_v37 }
0x1145   :  { %v5863_v22 = vpop.eup %5862 }
0x1146   :  { %v3401_v19 = vadd.f32 1.0, %v5863_v22  ;;  %v5865_v47 = vpop.eup %5864 }
0x1147   :  { %v3408_v39 = vadd.f32 1.0, %v5865_v47 }
0x1148   :  { %5866 = vrcp.f32 %v3401_v19 }
0x1152   :  { %v5867_v62 = vpop.eup %5866 }
0x1153   :  { %v3412_v34 = vmul.f32 %v5867_v62, %v3411_v41 }
0x1155   :  { %v3413_v35 = vadd.f32 %v3412_v34, %v2118_v26 }
0x1156   :  { %v4628_v51 = vpop.f32.mrb[32].mxu1 }
0x1157   :  { %5868 = vtanh.f32 %v3413_v35  ;;  %v3508_v43 = vadd.f32 %v4628_v51, %v3435_v21  ;;  %v3502_v4 = vpop.f32.mrb[33].mxu1 }
0x1158   :  { %v3503_v17 = vadd.f32 %v3502_v4, %v3435_v21  ;;  %5870 = vrcp.f32 %v3408_v39 }
0x1159   :  { %3543 = vst.msk [vmem:[%s6949_s3 + $0x8] sm:$0xff] %vm3541_vm3, %v3508_v43 }
0x115a   :  { %3542 = vst.msk [vmem:[%s6949_s3] sm:$0xff] %vm3541_vm3, %v3503_v17  ;;  %v4631_v6 = vpop.f32.mrb[34].mxu1 }
0x115b   :  { %v3518_v23 = vadd.f32 %v4631_v6, %v3435_v21  ;;  %v3512_v2 = vpop.f32.mrb[35].mxu1 }
0x115c   :  { %v3513_v29 = vadd.f32 %v3512_v2, %v3435_v21 }
0x115d   :  { %3545 = vst.msk [vmem:[%s6949_s3 + $0x18] sm:$0xff] %vm3541_vm3, %v3518_v23 }
0x115e   :  { %3544 = vst.msk [vmem:[%s6949_s3 + $0x10] sm:$0xff] %vm3541_vm3, %v3513_v29  ;;  %v4634_v40 = vpop.f32.mrb[36].mxu1 }
0x115f   :  { %v3528_v48 = vadd.f32 %v4634_v40, %v3435_v21  ;;  %v3522_v58 = vpop.f32.mrb[37].mxu1 }
0x1160   :  { %v3523_v27 = vadd.f32 %v3522_v58, %v3435_v21 }
0x1161   :  { %v5869_v46 = vpop.eup %5868  ;;  %3547 = vst.msk [vmem:[%s6949_s3 + $0x28] sm:$0xff] %vm3541_vm3, %v3528_v48 }
0x1162   :  { %3546 = vst.msk [vmem:[%s6949_s3 + $0x20] sm:$0xff] %vm3541_vm3, %v3523_v27  ;;  %v3415_v57 = vsub.f32 %v6894_v1, %v5869_v46  ;;  %v5871_v11 = vpop.eup %5870 }
0x1164   :  { %v3416_v0 = vmul.f32 %v5871_v11, %v3415_v57 }
0x1166   :  { %v3417_v3 = vadd.f32 %v5869_v46, %v3416_v0 }
0x1168   :  { %3418 = vst [vmem:[%s6950_s4 + $0x8] sm:$0xff] %v3417_v3  ;;  %4636 = vmatmul.mubr.f32.gmra.mrb[38].mxu1 %v3417_v3 }
0x123b   :  { %v4637_v20 = vpop.f32.mrb[38].mxu1 }
0x123c   :  { %v3538_v5 = vadd.f32 %v4637_v20, %v3435_v21  ;;  %v3532_v60 = vpop.f32.mrb[39].mxu1 }
0x123d   :  { %v3533_v42 = vadd.f32 %v3532_v60, %v3435_v21 }
0x123e   :  { %3549 = vst.msk [vmem:[%s6949_s3 + $0x38] sm:$0xff] %vm3541_vm3, %v3538_v5 }
0x123f   :  { %3548 = vst.msk [vmem:[%s6949_s3 + $0x30] sm:$0xff] %vm3541_vm3, %v3533_v42 }
0x1240   :  { %3558 = vsyncpa [#allocation3], 1 }

</bundles_post_ra>
